<compile_context>
chip_gen: v7x
topology: tpu7x:2x2x1
jax: 0.10.0
libtpu: 0.0.40
codegen_flags: <defaults>
</compile_context>

<pallas_src>
import functools

import jax
import jax.numpy as jnp
from jax.experimental import pallas as pl
from jax.experimental.pallas import tpu as pltpu

PMAX = 4                 # largest spatial padding (9x9 conv)
RH = 8                   # top halo rows (>= PMAX; 8 keeps interior stores sublane aligned)
RB = 8                   # bottom halo rows (>= PMAX)
KSIZES = (9, 7, 5, 3)    # conv kernel sizes, in execution order


# -----------------------------------------------------------------------------
# Fused kernel: one batch element per grid step, all four layers in VMEM.
# -----------------------------------------------------------------------------
def _res_block_v2_kernel(x_ref, w9_ref, w7_ref, w5_ref, w3_ref,
                         sc_ref, bi_ref, out_ref,
                         bx_ref, bh_ref, bx1_ref, *, H, W, C):
    WC = W * C                         # lane-dense image row width
    WPC = (W + 2 * PMAX) * C           # padded lane-slab width
    col0 = PMAX * C                    # interior lane offset

    # -- zero only the halo strips; interiors are fully overwritten below ----
    def zero_halo(buf):
        buf[pl.ds(0, RH), :] = jnp.zeros((RH, WPC), jnp.bfloat16)
        buf[pl.ds(RH + H, RB), :] = jnp.zeros((RB, WPC), jnp.bfloat16)
        buf[pl.ds(RH, H), pl.ds(0, col0)] = jnp.zeros((H, col0), jnp.bfloat16)
        buf[pl.ds(RH, H), pl.ds(col0 + WC, PMAX * C)] = (
            jnp.zeros((H, PMAX * C), jnp.bfloat16))

    zero_halo(bx_ref)
    zero_halo(bh_ref)
    zero_halo(bx1_ref)

    def store_interior(buf, val_f32):
        # single f32 -> bf16 cast per layer, at store time
        buf[pl.ds(RH, H), pl.ds(col0, WC)] = val_f32.astype(jnp.bfloat16)

    def conv_bn(buf, w_ref, k, layer):
        """BN(conv_k(buf interior)) -> f32 (H, W*C) in lane-dense layout."""
        p = k // 2
        acc = jnp.zeros((H, WC), jnp.float32)      # register accumulator
        for dy in range(k):                        # static unroll (k <= 9)
            lhs = buf[pl.ds(RH - p + dy, H), :]    # (H, WPC) bf16 row slab
            acc = acc + jnp.dot(lhs, w_ref[dy],    # (WPC, W*C) Toeplitz slice
                                preferred_element_type=jnp.float32)
        scale = sc_ref[pl.ds(layer, 1), :]         # (1, W*C) folded BN scale
        bias = bi_ref[pl.ds(layer, 1), :]          # (1, W*C) folded BN bias
        return acc * scale + bias

    x0 = x_ref[0]                                  # (H, W*C) f32 residual
    store_interior(bx_ref, x0)

    # ---- block_1: x1 = relu( BN(conv7( relu(BN(conv9(x))) )) + x ) ---------
    h = jnp.maximum(conv_bn(bx_ref, w9_ref, 9, 0), 0.0)
    store_interior(bh_ref, h)
    x1 = jnp.maximum(conv_bn(bh_ref, w7_ref, 7, 1) + x0, 0.0)
    store_interior(bx1_ref, x1)

    # ---- block_2: x2 = relu( BN(conv3( relu(BN(conv5(x1))) )) + x1 ) -------
    h = jnp.maximum(conv_bn(bx1_ref, w5_ref, 5, 2), 0.0)
    store_interior(bh_ref, h)
    x2 = jnp.maximum(conv_bn(bh_ref, w3_ref, 3, 3) + x1, 0.0)

    out_ref[...] = x2.reshape(1, H, WC)            # f32, already lane-dense


# -----------------------------------------------------------------------------
# Parameter packing helpers
# -----------------------------------------------------------------------------
def _fold_bn(gamma, beta, mean, var, eps=1e-5):
    scale = gamma / jnp.sqrt(var + eps)
    bias = beta - mean * scale
    return scale.astype(jnp.float32), bias.astype(jnp.float32)


def _pack_toeplitz(w_oihw, W, dtype=jnp.bfloat16):
    """(Cout, Cin, k, k) -> (k, (W+2*PMAX)*Cin, W*Cout) block-Toeplitz weights.

    T[dy, (PMAX + w + dx - k//2)*Cin + ci, w*Cout + co] = w[co, ci, dy, dx], so
    that sum_dy buf_rows(dy) @ T[dy] computes the conv with the column taps and
    the output-pixel axis folded into the MXU K / N dims (no channel padding).
    """
    cout, cin, k, _ = w_oihw.shape
    p = k // 2
    wp = W + 2 * PMAX
    w_t = jnp.transpose(w_oihw, (2, 3, 1, 0))           # (dy, dx, cin, cout)
    rb = jnp.arange(wp)[:, None]                        # padded-buffer column
    wj = jnp.arange(W)[None, :]                         # output column
    dx = rb - wj - (PMAX - p)                           # (wp, W)
    valid = (dx >= 0) & (dx < k)
    blocks = w_t[:, jnp.clip(dx, 0, k - 1)]             # (k, wp, W, cin, cout)
    blocks = jnp.where(valid[None, :, :, None, None], blocks, 0.0)
    t = jnp.transpose(blocks, (0, 1, 3, 2, 4)).reshape(k, wp * cin, W * cout)
    return t.astype(dtype)


# -----------------------------------------------------------------------------
# Wrapper: one pallas_call for the whole Res_BlockV2 forward
# -----------------------------------------------------------------------------
def res_block_v2(x_nhwc, params):
    """x_nhwc: (N, H, W, C) f32.  Returns (N, H, W, C) f32."""
    N, H, W, C = x_nhwc.shape
    assert params[0]["w"].shape[0] == C, "residual add requires Cin == Cout"
    WC = W * C
    WPC = (W + 2 * PMAX) * C
    RTOT = RH + H + RB

    # Lane-dense (N, H, W*C) slabs: a pure reshape, no padding / extra pass.
    x_in = x_nhwc.reshape(N, H, WC)

    ws = [_pack_toeplitz(prm["w"], W) for prm in params]
    sb = [_fold_bn(prm["gamma"], prm["beta"], prm["mean"], prm["var"])
          for prm in params]
    scales = jnp.stack([jnp.tile(s, W) for s, _ in sb])   # (4, W*C) f32
    biases = jnp.stack([jnp.tile(b, W) for _, b in sb])   # (4, W*C) f32

    kernel = functools.partial(_res_block_v2_kernel, H=H, W=W, C=C)

    out = pl.pallas_call(
        kernel,
        out_shape=jax.ShapeDtypeStruct((N, H, WC), jnp.float32),
        grid=(N,),
        in_specs=[pl.BlockSpec((1, H, WC), lambda n: (n, 0, 0))]
                + [pl.BlockSpec((k, WPC, WC), lambda n: (0, 0, 0))
                   for k in KSIZES]
                + [pl.BlockSpec((4, WC), lambda n: (0, 0)),
                   pl.BlockSpec((4, WC), lambda n: (0, 0))],
        out_specs=pl.BlockSpec((1, H, WC), lambda n: (n, 0, 0)),
        scratch_shapes=[pltpu.VMEM((RTOT, WPC), jnp.bfloat16)
                        for _ in range(3)],      # padded x / h / x1 (bf16)
        compiler_params=pltpu.CompilerParams(
            dimension_semantics=("parallel",)),
    )(x_in, *ws, scales, biases)

    return out.reshape(N, H, W, C)


# -----------------------------------------------------------------------------
# Deterministic synthetic parameters
# -----------------------------------------------------------------------------
def init_params(key, cin, cout):
    cins = [cin, cout, cin, cout]
    params = []
    for k, ci in zip(KSIZES, cins):
        key, kw, kg, kb, km, kv = jax.random.split(key, 6)
        w = jax.random.normal(kw, (cout, ci, k, k), jnp.float32) * 0.05
        gamma = 1.0 + 0.1 * jax.random.normal(kg, (cout,), jnp.float32)
        beta = 0.1 * jax.random.normal(kb, (cout,), jnp.float32)
        mean = 0.1 * jax.random.normal(km, (cout,), jnp.float32)
        var = 0.5 + jax.random.uniform(kv, (cout,), jnp.float32)
        params.append(dict(w=w, gamma=gamma, beta=beta, mean=mean, var=var, k=k))
    return params


# -----------------------------------------------------------------------------
# Pure-JAX f32 reference (same math, via lax.conv) for verification
# -----------------------------------------------------------------------------
def _ref_conv(x, w_oihw, pad):
    w_hwio = jnp.transpose(w_oihw, (2, 3, 1, 0))
    return jax.lax.conv_general_dilated(
        x, w_hwio, (1, 1), [(pad, pad), (pad, pad)],
        dimension_numbers=("NHWC", "HWIO", "NHWC"))


def res_block_v2_ref(x, params):
    def conv_bn(inp, p):
        y = _ref_conv(inp, p["w"], p["k"] // 2)
        scale = p["gamma"] / jnp.sqrt(p["var"] + 1e-5)
        bias = p["beta"] - p["mean"] * scale
        return y * scale.reshape(1, 1, 1, -1) + bias.reshape(1, 1, 1, -1)

    h = jax.nn.relu(conv_bn(x, params[0]))
    x1 = jax.nn.relu(conv_bn(h, params[1]) + x)
    h = jax.nn.relu(conv_bn(x1, params[2]))
    x2 = jax.nn.relu(conv_bn(h, params[3]) + x1)
    return x2


# -----------------------------------------------------------------------------
if __name__ == "__main__":
    key = jax.random.PRNGKey(0)
    N, C, H, W = 2, 8, 16, 16          # small synthetic shapes (in_ch == out_ch)

    kx, kp = jax.random.split(key)
    x_nchw = jax.random.normal(kx, (N, C, H, W), jnp.float32)   # PyTorch layout
    x_nhwc = jnp.transpose(x_nchw, (0, 2, 3, 1))                # kernel layout

    params = init_params(kp, C, C)

    out = jax.block_until_ready(jax.jit(res_block_v2)(x_nhwc, params))
    ref = jax.block_until_ready(res_block_v2_ref(x_nhwc, params))

    assert out.shape == (N, H, W, C)
    err = float(jnp.max(jnp.abs(out - ref)) / (jnp.max(jnp.abs(ref)) + 1e-6))
    assert err < 2e-2, f"relative max error {err}"   # bf16-operand MXU path

    _ = jnp.transpose(out, (0, 3, 1, 2))   # back to PyTorch NCHW if needed
    print("KERNEL_OK")
</pallas_src>

<mosaic_0001>
module attributes {stable_mosaic.version = 11 : i64} {
  func.func @_res_block_v2_kernel(%arg0: i32, %arg1: memref<1x16x128xf32, #tpu.memory_space<vmem>>, %arg2: memref<9x192x128xbf16, #tpu.memory_space<vmem>>, %arg3: memref<7x192x128xbf16, #tpu.memory_space<vmem>>, %arg4: memref<5x192x128xbf16, #tpu.memory_space<vmem>>, %arg5: memref<3x192x128xbf16, #tpu.memory_space<vmem>>, %arg6: memref<4x128xf32, #tpu.memory_space<vmem>>, %arg7: memref<4x128xf32, #tpu.memory_space<vmem>>, %arg8: memref<1x16x128xf32, #tpu.memory_space<vmem>>, %arg9: memref<32x192xbf16, #tpu.memory_space<vmem>>, %arg10: memref<32x192xbf16, #tpu.memory_space<vmem>>, %arg11: memref<32x192xbf16, #tpu.memory_space<vmem>>) attributes {dimension_semantics = [#tpu.dimension_semantics<parallel>], iteration_bounds = array<i64: 2>, scalar_prefetch = 0 : i64, scratch_operands = 3 : i64, tpu.core_type = #tpu.core_type<tc>, window_params = [{transform_indices = @transform_0, window_bounds = array<i64: 1, 16, 128>}, {pipeline_mode = #tpu.pipeline_mode<synchronous>, transform_indices = @transform_1, window_bounds = array<i64: 9, 192, 128>}, {pipeline_mode = #tpu.pipeline_mode<synchronous>, transform_indices = @transform_2, window_bounds = array<i64: 7, 192, 128>}, {pipeline_mode = #tpu.pipeline_mode<synchronous>, transform_indices = @transform_3, window_bounds = array<i64: 5, 192, 128>}, {pipeline_mode = #tpu.pipeline_mode<synchronous>, transform_indices = @transform_4, window_bounds = array<i64: 3, 192, 128>}, {pipeline_mode = #tpu.pipeline_mode<synchronous>, transform_indices = @transform_5, window_bounds = array<i64: 4, 128>}, {pipeline_mode = #tpu.pipeline_mode<synchronous>, transform_indices = @transform_6, window_bounds = array<i64: 4, 128>}, {transform_indices = @transform_7, window_bounds = array<i64: 1, 16, 128>}]} {
    %cst = arith.constant 0.000000e+00 : bf16
    %0 = vector.broadcast %cst : bf16 to vector<8x192xbf16>
    %c0 = arith.constant 0 : index
    %c0_0 = arith.constant 0 : index
    %1 = vector.load %arg9[%c0, %c0_0] : memref<32x192xbf16, #tpu.memory_space<vmem>>, vector<8x192xbf16>
    tpu.vector_store %arg9[%c0, %c0_0], %0 {strides = array<i32>} : memref<32x192xbf16, #tpu.memory_space<vmem>>, vector<8x192xbf16>,
    %cst_1 = arith.constant 0.000000e+00 : bf16
    %2 = vector.broadcast %cst_1 : bf16 to vector<8x192xbf16>
    %c24 = arith.constant 24 : index
    %c0_2 = arith.constant 0 : index
    %3 = vector.load %arg9[%c24, %c0_2] : memref<32x192xbf16, #tpu.memory_space<vmem>>, vector<8x192xbf16>
    tpu.vector_store %arg9[%c24, %c0_2], %2 {strides = array<i32>} : memref<32x192xbf16, #tpu.memory_space<vmem>>, vector<8x192xbf16>,
    %cst_3 = arith.constant 0.000000e+00 : bf16
    %4 = vector.broadcast %cst_3 : bf16 to vector<16x32xbf16>
    %c8 = arith.constant 8 : index
    %c0_4 = arith.constant 0 : index
    %5 = vector.load %arg9[%c8, %c0_4] : memref<32x192xbf16, #tpu.memory_space<vmem>>, vector<16x32xbf16>
    tpu.vector_store %arg9[%c8, %c0_4], %4 {strides = array<i32>} : memref<32x192xbf16, #tpu.memory_space<vmem>>, vector<16x32xbf16>,
    %cst_5 = arith.constant 0.000000e+00 : bf16
    %6 = vector.broadcast %cst_5 : bf16 to vector<16x32xbf16>
    %c8_6 = arith.constant 8 : index
    %c160 = arith.constant 160 : index
    %7 = vector.load %arg9[%c8_6, %c160] : memref<32x192xbf16, #tpu.memory_space<vmem>>, vector<16x32xbf16>
    tpu.vector_store %arg9[%c8_6, %c160], %6 {strides = array<i32>} : memref<32x192xbf16, #tpu.memory_space<vmem>>, vector<16x32xbf16>,
    %cst_7 = arith.constant 0.000000e+00 : bf16
    %8 = vector.broadcast %cst_7 : bf16 to vector<8x192xbf16>
    %c0_8 = arith.constant 0 : index
    %c0_9 = arith.constant 0 : index
    %9 = vector.load %arg10[%c0_8, %c0_9] : memref<32x192xbf16, #tpu.memory_space<vmem>>, vector<8x192xbf16>
    tpu.vector_store %arg10[%c0_8, %c0_9], %8 {strides = array<i32>} : memref<32x192xbf16, #tpu.memory_space<vmem>>, vector<8x192xbf16>,
    %cst_10 = arith.constant 0.000000e+00 : bf16
    %10 = vector.broadcast %cst_10 : bf16 to vector<8x192xbf16>
    %c24_11 = arith.constant 24 : index
    %c0_12 = arith.constant 0 : index
    %11 = vector.load %arg10[%c24_11, %c0_12] : memref<32x192xbf16, #tpu.memory_space<vmem>>, vector<8x192xbf16>
    tpu.vector_store %arg10[%c24_11, %c0_12], %10 {strides = array<i32>} : memref<32x192xbf16, #tpu.memory_space<vmem>>, vector<8x192xbf16>,
    %cst_13 = arith.constant 0.000000e+00 : bf16
    %12 = vector.broadcast %cst_13 : bf16 to vector<16x32xbf16>
    %c8_14 = arith.constant 8 : index
    %c0_15 = arith.constant 0 : index
    %13 = vector.load %arg10[%c8_14, %c0_15] : memref<32x192xbf16, #tpu.memory_space<vmem>>, vector<16x32xbf16>
    tpu.vector_store %arg10[%c8_14, %c0_15], %12 {strides = array<i32>} : memref<32x192xbf16, #tpu.memory_space<vmem>>, vector<16x32xbf16>,
    %cst_16 = arith.constant 0.000000e+00 : bf16
    %14 = vector.broadcast %cst_16 : bf16 to vector<16x32xbf16>
    %c8_17 = arith.constant 8 : index
    %c160_18 = arith.constant 160 : index
    %15 = vector.load %arg10[%c8_17, %c160_18] : memref<32x192xbf16, #tpu.memory_space<vmem>>, vector<16x32xbf16>
    tpu.vector_store %arg10[%c8_17, %c160_18], %14 {strides = array<i32>} : memref<32x192xbf16, #tpu.memory_space<vmem>>, vector<16x32xbf16>,
    %cst_19 = arith.constant 0.000000e+00 : bf16
    %16 = vector.broadcast %cst_19 : bf16 to vector<8x192xbf16>
    %c0_20 = arith.constant 0 : index
    %c0_21 = arith.constant 0 : index
    %17 = vector.load %arg11[%c0_20, %c0_21] : memref<32x192xbf16, #tpu.memory_space<vmem>>, vector<8x192xbf16>
    tpu.vector_store %arg11[%c0_20, %c0_21], %16 {strides = array<i32>} : memref<32x192xbf16, #tpu.memory_space<vmem>>, vector<8x192xbf16>,
    %cst_22 = arith.constant 0.000000e+00 : bf16
    %18 = vector.broadcast %cst_22 : bf16 to vector<8x192xbf16>
    %c24_23 = arith.constant 24 : index
    %c0_24 = arith.constant 0 : index
    %19 = vector.load %arg11[%c24_23, %c0_24] : memref<32x192xbf16, #tpu.memory_space<vmem>>, vector<8x192xbf16>
    tpu.vector_store %arg11[%c24_23, %c0_24], %18 {strides = array<i32>} : memref<32x192xbf16, #tpu.memory_space<vmem>>, vector<8x192xbf16>,
    %cst_25 = arith.constant 0.000000e+00 : bf16
    %20 = vector.broadcast %cst_25 : bf16 to vector<16x32xbf16>
    %c8_26 = arith.constant 8 : index
    %c0_27 = arith.constant 0 : index
    %21 = vector.load %arg11[%c8_26, %c0_27] : memref<32x192xbf16, #tpu.memory_space<vmem>>, vector<16x32xbf16>
    tpu.vector_store %arg11[%c8_26, %c0_27], %20 {strides = array<i32>} : memref<32x192xbf16, #tpu.memory_space<vmem>>, vector<16x32xbf16>,
    %cst_28 = arith.constant 0.000000e+00 : bf16
    %22 = vector.broadcast %cst_28 : bf16 to vector<16x32xbf16>
    %c8_29 = arith.constant 8 : index
    %c160_30 = arith.constant 160 : index
    %23 = vector.load %arg11[%c8_29, %c160_30] : memref<32x192xbf16, #tpu.memory_space<vmem>>, vector<16x32xbf16>
    tpu.vector_store %arg11[%c8_29, %c160_30], %22 {strides = array<i32>} : memref<32x192xbf16, #tpu.memory_space<vmem>>, vector<16x32xbf16>,
    %c0_31 = arith.constant 0 : index
    %c0_32 = arith.constant 0 : index
    %c0_33 = arith.constant 0 : index
    %24 = vector.load %arg1[%c0_31, %c0_32, %c0_33] : memref<1x16x128xf32, #tpu.memory_space<vmem>>, vector<1x16x128xf32>
    %25 = vector.shape_cast %24 : vector<1x16x128xf32> to vector<16x128xf32>
    %26 = arith.truncf %25 : vector<16x128xf32> to vector<16x128xbf16>
    %c8_34 = arith.constant 8 : index
    %c32 = arith.constant 32 : index
    %27 = vector.load %arg9[%c8_34, %c32] : memref<32x192xbf16, #tpu.memory_space<vmem>>, vector<16x128xbf16>
    tpu.vector_store %arg9[%c8_34, %c32], %26 {strides = array<i32>} : memref<32x192xbf16, #tpu.memory_space<vmem>>, vector<16x128xbf16>,
    %cst_35 = arith.constant 0.000000e+00 : f32
    %28 = vector.broadcast %cst_35 : f32 to vector<16x128xf32>
    %c4 = arith.constant 4 : index
    %c0_36 = arith.constant 0 : index
    %29 = vector.load %arg9[%c4, %c0_36] : memref<32x192xbf16, #tpu.memory_space<vmem>>, vector<16x192xbf16>
    %c0_37 = arith.constant 0 : index
    %c0_38 = arith.constant 0 : index
    %c0_39 = arith.constant 0 : index
    %30 = vector.load %arg2[%c0_37, %c0_38, %c0_39] : memref<9x192x128xbf16, #tpu.memory_space<vmem>>, vector<1x192x128xbf16>
    %31 = vector.shape_cast %30 : vector<1x192x128xbf16> to vector<192x128xbf16>
    %cst_40 = arith.constant dense<0.000000e+00> : vector<16x128xf32>
    %32 = tpu.matmul %29, %31, %cst_40 {dimension_numbers = #tpu.dot_dimension_numbers<[1], [0], [0], [1], [0, 0, 1, 1], [], []>} : vector<16x192xbf16>, vector<192x128xbf16>, vector<16x128xf32> -> vector<16x128xf32>
    %33 = arith.addf %28, %32 : vector<16x128xf32>
    %c5 = arith.constant 5 : index
    %c0_41 = arith.constant 0 : index
    %34 = vector.load %arg9[%c5, %c0_41] : memref<32x192xbf16, #tpu.memory_space<vmem>>, vector<16x192xbf16>
    %c1 = arith.constant 1 : index
    %c0_42 = arith.constant 0 : index
    %c0_43 = arith.constant 0 : index
    %35 = vector.load %arg2[%c1, %c0_42, %c0_43] : memref<9x192x128xbf16, #tpu.memory_space<vmem>>, vector<1x192x128xbf16>
    %36 = vector.shape_cast %35 : vector<1x192x128xbf16> to vector<192x128xbf16>
    %cst_44 = arith.constant dense<0.000000e+00> : vector<16x128xf32>
    %37 = tpu.matmul %34, %36, %cst_44 {dimension_numbers = #tpu.dot_dimension_numbers<[1], [0], [0], [1], [0, 0, 1, 1], [], []>} : vector<16x192xbf16>, vector<192x128xbf16>, vector<16x128xf32> -> vector<16x128xf32>
    %38 = arith.addf %33, %37 : vector<16x128xf32>
    %c6 = arith.constant 6 : index
    %c0_45 = arith.constant 0 : index
    %39 = vector.load %arg9[%c6, %c0_45] : memref<32x192xbf16, #tpu.memory_space<vmem>>, vector<16x192xbf16>
    %c2 = arith.constant 2 : index
    %c0_46 = arith.constant 0 : index
    %c0_47 = arith.constant 0 : index
    %40 = vector.load %arg2[%c2, %c0_46, %c0_47] : memref<9x192x128xbf16, #tpu.memory_space<vmem>>, vector<1x192x128xbf16>
    %41 = vector.shape_cast %40 : vector<1x192x128xbf16> to vector<192x128xbf16>
    %cst_48 = arith.constant dense<0.000000e+00> : vector<16x128xf32>
    %42 = tpu.matmul %39, %41, %cst_48 {dimension_numbers = #tpu.dot_dimension_numbers<[1], [0], [0], [1], [0, 0, 1, 1], [], []>} : vector<16x192xbf16>, vector<192x128xbf16>, vector<16x128xf32> -> vector<16x128xf32>
    %43 = arith.addf %38, %42 : vector<16x128xf32>
    %c7 = arith.constant 7 : index
    %c0_49 = arith.constant 0 : index
    %44 = vector.load %arg9[%c7, %c0_49] : memref<32x192xbf16, #tpu.memory_space<vmem>>, vector<16x192xbf16>
    %c3 = arith.constant 3 : index
    %c0_50 = arith.constant 0 : index
    %c0_51 = arith.constant 0 : index
    %45 = vector.load %arg2[%c3, %c0_50, %c0_51] : memref<9x192x128xbf16, #tpu.memory_space<vmem>>, vector<1x192x128xbf16>
    %46 = vector.shape_cast %45 : vector<1x192x128xbf16> to vector<192x128xbf16>
    %cst_52 = arith.constant dense<0.000000e+00> : vector<16x128xf32>
    %47 = tpu.matmul %44, %46, %cst_52 {dimension_numbers = #tpu.dot_dimension_numbers<[1], [0], [0], [1], [0, 0, 1, 1], [], []>} : vector<16x192xbf16>, vector<192x128xbf16>, vector<16x128xf32> -> vector<16x128xf32>
    %48 = arith.addf %43, %47 : vector<16x128xf32>
    %c8_53 = arith.constant 8 : index
    %c0_54 = arith.constant 0 : index
    %49 = vector.load %arg9[%c8_53, %c0_54] : memref<32x192xbf16, #tpu.memory_space<vmem>>, vector<16x192xbf16>
    %c4_55 = arith.constant 4 : index
    %c0_56 = arith.constant 0 : index
    %c0_57 = arith.constant 0 : index
    %50 = vector.load %arg2[%c4_55, %c0_56, %c0_57] : memref<9x192x128xbf16, #tpu.memory_space<vmem>>, vector<1x192x128xbf16>
    %51 = vector.shape_cast %50 : vector<1x192x128xbf16> to vector<192x128xbf16>
    %cst_58 = arith.constant dense<0.000000e+00> : vector<16x128xf32>
    %52 = tpu.matmul %49, %51, %cst_58 {dimension_numbers = #tpu.dot_dimension_numbers<[1], [0], [0], [1], [0, 0, 1, 1], [], []>} : vector<16x192xbf16>, vector<192x128xbf16>, vector<16x128xf32> -> vector<16x128xf32>
    %53 = arith.addf %48, %52 : vector<16x128xf32>
    %c9 = arith.constant 9 : index
    %c0_59 = arith.constant 0 : index
    %54 = vector.load %arg9[%c9, %c0_59] : memref<32x192xbf16, #tpu.memory_space<vmem>>, vector<16x192xbf16>
    %c5_60 = arith.constant 5 : index
    %c0_61 = arith.constant 0 : index
    %c0_62 = arith.constant 0 : index
    %55 = vector.load %arg2[%c5_60, %c0_61, %c0_62] : memref<9x192x128xbf16, #tpu.memory_space<vmem>>, vector<1x192x128xbf16>
    %56 = vector.shape_cast %55 : vector<1x192x128xbf16> to vector<192x128xbf16>
    %cst_63 = arith.constant dense<0.000000e+00> : vector<16x128xf32>
    %57 = tpu.matmul %54, %56, %cst_63 {dimension_numbers = #tpu.dot_dimension_numbers<[1], [0], [0], [1], [0, 0, 1, 1], [], []>} : vector<16x192xbf16>, vector<192x128xbf16>, vector<16x128xf32> -> vector<16x128xf32>
    %58 = arith.addf %53, %57 : vector<16x128xf32>
    %c10 = arith.constant 10 : index
    %c0_64 = arith.constant 0 : index
    %59 = vector.load %arg9[%c10, %c0_64] : memref<32x192xbf16, #tpu.memory_space<vmem>>, vector<16x192xbf16>
    %c6_65 = arith.constant 6 : index
    %c0_66 = arith.constant 0 : index
    %c0_67 = arith.constant 0 : index
    %60 = vector.load %arg2[%c6_65, %c0_66, %c0_67] : memref<9x192x128xbf16, #tpu.memory_space<vmem>>, vector<1x192x128xbf16>
    %61 = vector.shape_cast %60 : vector<1x192x128xbf16> to vector<192x128xbf16>
    %cst_68 = arith.constant dense<0.000000e+00> : vector<16x128xf32>
    %62 = tpu.matmul %59, %61, %cst_68 {dimension_numbers = #tpu.dot_dimension_numbers<[1], [0], [0], [1], [0, 0, 1, 1], [], []>} : vector<16x192xbf16>, vector<192x128xbf16>, vector<16x128xf32> -> vector<16x128xf32>
    %63 = arith.addf %58, %62 : vector<16x128xf32>
    %c11 = arith.constant 11 : index
    %c0_69 = arith.constant 0 : index
    %64 = vector.load %arg9[%c11, %c0_69] : memref<32x192xbf16, #tpu.memory_space<vmem>>, vector<16x192xbf16>
    %c7_70 = arith.constant 7 : index
    %c0_71 = arith.constant 0 : index
    %c0_72 = arith.constant 0 : index
    %65 = vector.load %arg2[%c7_70, %c0_71, %c0_72] : memref<9x192x128xbf16, #tpu.memory_space<vmem>>, vector<1x192x128xbf16>
    %66 = vector.shape_cast %65 : vector<1x192x128xbf16> to vector<192x128xbf16>
    %cst_73 = arith.constant dense<0.000000e+00> : vector<16x128xf32>
    %67 = tpu.matmul %64, %66, %cst_73 {dimension_numbers = #tpu.dot_dimension_numbers<[1], [0], [0], [1], [0, 0, 1, 1], [], []>} : vector<16x192xbf16>, vector<192x128xbf16>, vector<16x128xf32> -> vector<16x128xf32>
    %68 = arith.addf %63, %67 : vector<16x128xf32>
    %c12 = arith.constant 12 : index
    %c0_74 = arith.constant 0 : index
    %69 = vector.load %arg9[%c12, %c0_74] : memref<32x192xbf16, #tpu.memory_space<vmem>>, vector<16x192xbf16>
    %c8_75 = arith.constant 8 : index
    %c0_76 = arith.constant 0 : index
    %c0_77 = arith.constant 0 : index
    %70 = vector.load %arg2[%c8_75, %c0_76, %c0_77] : memref<9x192x128xbf16, #tpu.memory_space<vmem>>, vector<1x192x128xbf16>
    %71 = vector.shape_cast %70 : vector<1x192x128xbf16> to vector<192x128xbf16>
    %cst_78 = arith.constant dense<0.000000e+00> : vector<16x128xf32>
    %72 = tpu.matmul %69, %71, %cst_78 {dimension_numbers = #tpu.dot_dimension_numbers<[1], [0], [0], [1], [0, 0, 1, 1], [], []>} : vector<16x192xbf16>, vector<192x128xbf16>, vector<16x128xf32> -> vector<16x128xf32>
    %73 = arith.addf %68, %72 : vector<16x128xf32>
    %c0_79 = arith.constant 0 : index
    %c0_80 = arith.constant 0 : index
    %74 = vector.load %arg6[%c0_79, %c0_80] : memref<4x128xf32, #tpu.memory_space<vmem>>, vector<1x128xf32>
    %c0_81 = arith.constant 0 : index
    %c0_82 = arith.constant 0 : index
    %75 = vector.load %arg7[%c0_81, %c0_82] : memref<4x128xf32, #tpu.memory_space<vmem>>, vector<1x128xf32>
    %76 = vector.broadcast %74 : vector<1x128xf32> to vector<16x128xf32>
    %77 = arith.mulf %73, %76 : vector<16x128xf32>
    %78 = vector.broadcast %75 : vector<1x128xf32> to vector<16x128xf32>
    %79 = arith.addf %77, %78 : vector<16x128xf32>
    %cst_83 = arith.constant 0.000000e+00 : f32
    %80 = vector.broadcast %cst_83 : f32 to vector<16x128xf32>
    %81 = arith.maximumf %79, %80 : vector<16x128xf32>
    %82 = arith.truncf %81 : vector<16x128xf32> to vector<16x128xbf16>
    %c8_84 = arith.constant 8 : index
    %c32_85 = arith.constant 32 : index
    %83 = vector.load %arg10[%c8_84, %c32_85] : memref<32x192xbf16, #tpu.memory_space<vmem>>, vector<16x128xbf16>
    tpu.vector_store %arg10[%c8_84, %c32_85], %82 {strides = array<i32>} : memref<32x192xbf16, #tpu.memory_space<vmem>>, vector<16x128xbf16>,
    %cst_86 = arith.constant 0.000000e+00 : f32
    %84 = vector.broadcast %cst_86 : f32 to vector<16x128xf32>
    %c5_87 = arith.constant 5 : index
    %c0_88 = arith.constant 0 : index
    %85 = vector.load %arg10[%c5_87, %c0_88] : memref<32x192xbf16, #tpu.memory_space<vmem>>, vector<16x192xbf16>
    %c0_89 = arith.constant 0 : index
    %c0_90 = arith.constant 0 : index
    %c0_91 = arith.constant 0 : index
    %86 = vector.load %arg3[%c0_89, %c0_90, %c0_91] : memref<7x192x128xbf16, #tpu.memory_space<vmem>>, vector<1x192x128xbf16>
    %87 = vector.shape_cast %86 : vector<1x192x128xbf16> to vector<192x128xbf16>
    %cst_92 = arith.constant dense<0.000000e+00> : vector<16x128xf32>
    %88 = tpu.matmul %85, %87, %cst_92 {dimension_numbers = #tpu.dot_dimension_numbers<[1], [0], [0], [1], [0, 0, 1, 1], [], []>} : vector<16x192xbf16>, vector<192x128xbf16>, vector<16x128xf32> -> vector<16x128xf32>
    %89 = arith.addf %84, %88 : vector<16x128xf32>
    %c6_93 = arith.constant 6 : index
    %c0_94 = arith.constant 0 : index
    %90 = vector.load %arg10[%c6_93, %c0_94] : memref<32x192xbf16, #tpu.memory_space<vmem>>, vector<16x192xbf16>
    %c1_95 = arith.constant 1 : index
    %c0_96 = arith.constant 0 : index
    %c0_97 = arith.constant 0 : index
    %91 = vector.load %arg3[%c1_95, %c0_96, %c0_97] : memref<7x192x128xbf16, #tpu.memory_space<vmem>>, vector<1x192x128xbf16>
    %92 = vector.shape_cast %91 : vector<1x192x128xbf16> to vector<192x128xbf16>
    %cst_98 = arith.constant dense<0.000000e+00> : vector<16x128xf32>
    %93 = tpu.matmul %90, %92, %cst_98 {dimension_numbers = #tpu.dot_dimension_numbers<[1], [0], [0], [1], [0, 0, 1, 1], [], []>} : vector<16x192xbf16>, vector<192x128xbf16>, vector<16x128xf32> -> vector<16x128xf32>
    %94 = arith.addf %89, %93 : vector<16x128xf32>
    %c7_99 = arith.constant 7 : index
    %c0_100 = arith.constant 0 : index
    %95 = vector.load %arg10[%c7_99, %c0_100] : memref<32x192xbf16, #tpu.memory_space<vmem>>, vector<16x192xbf16>
    %c2_101 = arith.constant 2 : index
    %c0_102 = arith.constant 0 : index
    %c0_103 = arith.constant 0 : index
    %96 = vector.load %arg3[%c2_101, %c0_102, %c0_103] : memref<7x192x128xbf16, #tpu.memory_space<vmem>>, vector<1x192x128xbf16>
    %97 = vector.shape_cast %96 : vector<1x192x128xbf16> to vector<192x128xbf16>
    %cst_104 = arith.constant dense<0.000000e+00> : vector<16x128xf32>
    %98 = tpu.matmul %95, %97, %cst_104 {dimension_numbers = #tpu.dot_dimension_numbers<[1], [0], [0], [1], [0, 0, 1, 1], [], []>} : vector<16x192xbf16>, vector<192x128xbf16>, vector<16x128xf32> -> vector<16x128xf32>
    %99 = arith.addf %94, %98 : vector<16x128xf32>
    %c8_105 = arith.constant 8 : index
    %c0_106 = arith.constant 0 : index
    %100 = vector.load %arg10[%c8_105, %c0_106] : memref<32x192xbf16, #tpu.memory_space<vmem>>, vector<16x192xbf16>
    %c3_107 = arith.constant 3 : index
    %c0_108 = arith.constant 0 : index
    %c0_109 = arith.constant 0 : index
    %101 = vector.load %arg3[%c3_107, %c0_108, %c0_109] : memref<7x192x128xbf16, #tpu.memory_space<vmem>>, vector<1x192x128xbf16>
    %102 = vector.shape_cast %101 : vector<1x192x128xbf16> to vector<192x128xbf16>
    %cst_110 = arith.constant dense<0.000000e+00> : vector<16x128xf32>
    %103 = tpu.matmul %100, %102, %cst_110 {dimension_numbers = #tpu.dot_dimension_numbers<[1], [0], [0], [1], [0, 0, 1, 1], [], []>} : vector<16x192xbf16>, vector<192x128xbf16>, vector<16x128xf32> -> vector<16x128xf32>
    %104 = arith.addf %99, %103 : vector<16x128xf32>
    %c9_111 = arith.constant 9 : index
    %c0_112 = arith.constant 0 : index
    %105 = vector.load %arg10[%c9_111, %c0_112] : memref<32x192xbf16, #tpu.memory_space<vmem>>, vector<16x192xbf16>
    %c4_113 = arith.constant 4 : index
    %c0_114 = arith.constant 0 : index
    %c0_115 = arith.constant 0 : index
    %106 = vector.load %arg3[%c4_113, %c0_114, %c0_115] : memref<7x192x128xbf16, #tpu.memory_space<vmem>>, vector<1x192x128xbf16>
    %107 = vector.shape_cast %106 : vector<1x192x128xbf16> to vector<192x128xbf16>
    %cst_116 = arith.constant dense<0.000000e+00> : vector<16x128xf32>
    %108 = tpu.matmul %105, %107, %cst_116 {dimension_numbers = #tpu.dot_dimension_numbers<[1], [0], [0], [1], [0, 0, 1, 1], [], []>} : vector<16x192xbf16>, vector<192x128xbf16>, vector<16x128xf32> -> vector<16x128xf32>
    %109 = arith.addf %104, %108 : vector<16x128xf32>
    %c10_117 = arith.constant 10 : index
    %c0_118 = arith.constant 0 : index
    %110 = vector.load %arg10[%c10_117, %c0_118] : memref<32x192xbf16, #tpu.memory_space<vmem>>, vector<16x192xbf16>
    %c5_119 = arith.constant 5 : index
    %c0_120 = arith.constant 0 : index
    %c0_121 = arith.constant 0 : index
    %111 = vector.load %arg3[%c5_119, %c0_120, %c0_121] : memref<7x192x128xbf16, #tpu.memory_space<vmem>>, vector<1x192x128xbf16>
    %112 = vector.shape_cast %111 : vector<1x192x128xbf16> to vector<192x128xbf16>
    %cst_122 = arith.constant dense<0.000000e+00> : vector<16x128xf32>
    %113 = tpu.matmul %110, %112, %cst_122 {dimension_numbers = #tpu.dot_dimension_numbers<[1], [0], [0], [1], [0, 0, 1, 1], [], []>} : vector<16x192xbf16>, vector<192x128xbf16>, vector<16x128xf32> -> vector<16x128xf32>
    %114 = arith.addf %109, %113 : vector<16x128xf32>
    %c11_123 = arith.constant 11 : index
    %c0_124 = arith.constant 0 : index
    %115 = vector.load %arg10[%c11_123, %c0_124] : memref<32x192xbf16, #tpu.memory_space<vmem>>, vector<16x192xbf16>
    %c6_125 = arith.constant 6 : index
    %c0_126 = arith.constant 0 : index
    %c0_127 = arith.constant 0 : index
    %116 = vector.load %arg3[%c6_125, %c0_126, %c0_127] : memref<7x192x128xbf16, #tpu.memory_space<vmem>>, vector<1x192x128xbf16>
    %117 = vector.shape_cast %116 : vector<1x192x128xbf16> to vector<192x128xbf16>
    %cst_128 = arith.constant dense<0.000000e+00> : vector<16x128xf32>
    %118 = tpu.matmul %115, %117, %cst_128 {dimension_numbers = #tpu.dot_dimension_numbers<[1], [0], [0], [1], [0, 0, 1, 1], [], []>} : vector<16x192xbf16>, vector<192x128xbf16>, vector<16x128xf32> -> vector<16x128xf32>
    %119 = arith.addf %114, %118 : vector<16x128xf32>
    %c1_129 = arith.constant 1 : index
    %c0_130 = arith.constant 0 : index
    %120 = vector.load %arg6[%c1_129, %c0_130] : memref<4x128xf32, #tpu.memory_space<vmem>>, vector<1x128xf32>
    %c1_131 = arith.constant 1 : index
    %c0_132 = arith.constant 0 : index
    %121 = vector.load %arg7[%c1_131, %c0_132] : memref<4x128xf32, #tpu.memory_space<vmem>>, vector<1x128xf32>
    %122 = vector.broadcast %120 : vector<1x128xf32> to vector<16x128xf32>
    %123 = arith.mulf %119, %122 : vector<16x128xf32>
    %124 = vector.broadcast %121 : vector<1x128xf32> to vector<16x128xf32>
    %125 = arith.addf %123, %124 : vector<16x128xf32>
    %126 = arith.addf %125, %25 : vector<16x128xf32>
    %cst_133 = arith.constant 0.000000e+00 : f32
    %127 = vector.broadcast %cst_133 : f32 to vector<16x128xf32>
    %128 = arith.maximumf %126, %127 : vector<16x128xf32>
    %129 = arith.truncf %128 : vector<16x128xf32> to vector<16x128xbf16>
    %c8_134 = arith.constant 8 : index
    %c32_135 = arith.constant 32 : index
    %130 = vector.load %arg11[%c8_134, %c32_135] : memref<32x192xbf16, #tpu.memory_space<vmem>>, vector<16x128xbf16>
    tpu.vector_store %arg11[%c8_134, %c32_135], %129 {strides = array<i32>} : memref<32x192xbf16, #tpu.memory_space<vmem>>, vector<16x128xbf16>,
    %cst_136 = arith.constant 0.000000e+00 : f32
    %131 = vector.broadcast %cst_136 : f32 to vector<16x128xf32>
    %c6_137 = arith.constant 6 : index
    %c0_138 = arith.constant 0 : index
    %132 = vector.load %arg11[%c6_137, %c0_138] : memref<32x192xbf16, #tpu.memory_space<vmem>>, vector<16x192xbf16>
    %c0_139 = arith.constant 0 : index
    %c0_140 = arith.constant 0 : index
    %c0_141 = arith.constant 0 : index
    %133 = vector.load %arg4[%c0_139, %c0_140, %c0_141] : memref<5x192x128xbf16, #tpu.memory_space<vmem>>, vector<1x192x128xbf16>
    %134 = vector.shape_cast %133 : vector<1x192x128xbf16> to vector<192x128xbf16>
    %cst_142 = arith.constant dense<0.000000e+00> : vector<16x128xf32>
    %135 = tpu.matmul %132, %134, %cst_142 {dimension_numbers = #tpu.dot_dimension_numbers<[1], [0], [0], [1], [0, 0, 1, 1], [], []>} : vector<16x192xbf16>, vector<192x128xbf16>, vector<16x128xf32> -> vector<16x128xf32>
    %136 = arith.addf %131, %135 : vector<16x128xf32>
    %c7_143 = arith.constant 7 : index
    %c0_144 = arith.constant 0 : index
    %137 = vector.load %arg11[%c7_143, %c0_144] : memref<32x192xbf16, #tpu.memory_space<vmem>>, vector<16x192xbf16>
    %c1_145 = arith.constant 1 : index
    %c0_146 = arith.constant 0 : index
    %c0_147 = arith.constant 0 : index
    %138 = vector.load %arg4[%c1_145, %c0_146, %c0_147] : memref<5x192x128xbf16, #tpu.memory_space<vmem>>, vector<1x192x128xbf16>
    %139 = vector.shape_cast %138 : vector<1x192x128xbf16> to vector<192x128xbf16>
    %cst_148 = arith.constant dense<0.000000e+00> : vector<16x128xf32>
    %140 = tpu.matmul %137, %139, %cst_148 {dimension_numbers = #tpu.dot_dimension_numbers<[1], [0], [0], [1], [0, 0, 1, 1], [], []>} : vector<16x192xbf16>, vector<192x128xbf16>, vector<16x128xf32> -> vector<16x128xf32>
    %141 = arith.addf %136, %140 : vector<16x128xf32>
    %c8_149 = arith.constant 8 : index
    %c0_150 = arith.constant 0 : index
    %142 = vector.load %arg11[%c8_149, %c0_150] : memref<32x192xbf16, #tpu.memory_space<vmem>>, vector<16x192xbf16>
    %c2_151 = arith.constant 2 : index
    %c0_152 = arith.constant 0 : index
    %c0_153 = arith.constant 0 : index
    %143 = vector.load %arg4[%c2_151, %c0_152, %c0_153] : memref<5x192x128xbf16, #tpu.memory_space<vmem>>, vector<1x192x128xbf16>
    %144 = vector.shape_cast %143 : vector<1x192x128xbf16> to vector<192x128xbf16>
    %cst_154 = arith.constant dense<0.000000e+00> : vector<16x128xf32>
    %145 = tpu.matmul %142, %144, %cst_154 {dimension_numbers = #tpu.dot_dimension_numbers<[1], [0], [0], [1], [0, 0, 1, 1], [], []>} : vector<16x192xbf16>, vector<192x128xbf16>, vector<16x128xf32> -> vector<16x128xf32>
    %146 = arith.addf %141, %145 : vector<16x128xf32>
    %c9_155 = arith.constant 9 : index
    %c0_156 = arith.constant 0 : index
    %147 = vector.load %arg11[%c9_155, %c0_156] : memref<32x192xbf16, #tpu.memory_space<vmem>>, vector<16x192xbf16>
    %c3_157 = arith.constant 3 : index
    %c0_158 = arith.constant 0 : index
    %c0_159 = arith.constant 0 : index
    %148 = vector.load %arg4[%c3_157, %c0_158, %c0_159] : memref<5x192x128xbf16, #tpu.memory_space<vmem>>, vector<1x192x128xbf16>
    %149 = vector.shape_cast %148 : vector<1x192x128xbf16> to vector<192x128xbf16>
    %cst_160 = arith.constant dense<0.000000e+00> : vector<16x128xf32>
    %150 = tpu.matmul %147, %149, %cst_160 {dimension_numbers = #tpu.dot_dimension_numbers<[1], [0], [0], [1], [0, 0, 1, 1], [], []>} : vector<16x192xbf16>, vector<192x128xbf16>, vector<16x128xf32> -> vector<16x128xf32>
    %151 = arith.addf %146, %150 : vector<16x128xf32>
    %c10_161 = arith.constant 10 : index
    %c0_162 = arith.constant 0 : index
    %152 = vector.load %arg11[%c10_161, %c0_162] : memref<32x192xbf16, #tpu.memory_space<vmem>>, vector<16x192xbf16>
    %c4_163 = arith.constant 4 : index
    %c0_164 = arith.constant 0 : index
    %c0_165 = arith.constant 0 : index
    %153 = vector.load %arg4[%c4_163, %c0_164, %c0_165] : memref<5x192x128xbf16, #tpu.memory_space<vmem>>, vector<1x192x128xbf16>
    %154 = vector.shape_cast %153 : vector<1x192x128xbf16> to vector<192x128xbf16>
    %cst_166 = arith.constant dense<0.000000e+00> : vector<16x128xf32>
    %155 = tpu.matmul %152, %154, %cst_166 {dimension_numbers = #tpu.dot_dimension_numbers<[1], [0], [0], [1], [0, 0, 1, 1], [], []>} : vector<16x192xbf16>, vector<192x128xbf16>, vector<16x128xf32> -> vector<16x128xf32>
    %156 = arith.addf %151, %155 : vector<16x128xf32>
    %c2_167 = arith.constant 2 : index
    %c0_168 = arith.constant 0 : index
    %157 = vector.load %arg6[%c2_167, %c0_168] : memref<4x128xf32, #tpu.memory_space<vmem>>, vector<1x128xf32>
    %c2_169 = arith.constant 2 : index
    %c0_170 = arith.constant 0 : index
    %158 = vector.load %arg7[%c2_169, %c0_170] : memref<4x128xf32, #tpu.memory_space<vmem>>, vector<1x128xf32>
    %159 = vector.broadcast %157 : vector<1x128xf32> to vector<16x128xf32>
    %160 = arith.mulf %156, %159 : vector<16x128xf32>
    %161 = vector.broadcast %158 : vector<1x128xf32> to vector<16x128xf32>
    %162 = arith.addf %160, %161 : vector<16x128xf32>
    %cst_171 = arith.constant 0.000000e+00 : f32
    %163 = vector.broadcast %cst_171 : f32 to vector<16x128xf32>
    %164 = arith.maximumf %162, %163 : vector<16x128xf32>
    %165 = arith.truncf %164 : vector<16x128xf32> to vector<16x128xbf16>
    %c8_172 = arith.constant 8 : index
    %c32_173 = arith.constant 32 : index
    %166 = vector.load %arg10[%c8_172, %c32_173] : memref<32x192xbf16, #tpu.memory_space<vmem>>, vector<16x128xbf16>
    tpu.vector_store %arg10[%c8_172, %c32_173], %165 {strides = array<i32>} : memref<32x192xbf16, #tpu.memory_space<vmem>>, vector<16x128xbf16>,
    %cst_174 = arith.constant 0.000000e+00 : f32
    %167 = vector.broadcast %cst_174 : f32 to vector<16x128xf32>
    %c7_175 = arith.constant 7 : index
    %c0_176 = arith.constant 0 : index
    %168 = vector.load %arg10[%c7_175, %c0_176] : memref<32x192xbf16, #tpu.memory_space<vmem>>, vector<16x192xbf16>
    %c0_177 = arith.constant 0 : index
    %c0_178 = arith.constant 0 : index
    %c0_179 = arith.constant 0 : index
    %169 = vector.load %arg5[%c0_177, %c0_178, %c0_179] : memref<3x192x128xbf16, #tpu.memory_space<vmem>>, vector<1x192x128xbf16>
    %170 = vector.shape_cast %169 : vector<1x192x128xbf16> to vector<192x128xbf16>
    %cst_180 = arith.constant dense<0.000000e+00> : vector<16x128xf32>
    %171 = tpu.matmul %168, %170, %cst_180 {dimension_numbers = #tpu.dot_dimension_numbers<[1], [0], [0], [1], [0, 0, 1, 1], [], []>} : vector<16x192xbf16>, vector<192x128xbf16>, vector<16x128xf32> -> vector<16x128xf32>
    %172 = arith.addf %167, %171 : vector<16x128xf32>
    %c8_181 = arith.constant 8 : index
    %c0_182 = arith.constant 0 : index
    %173 = vector.load %arg10[%c8_181, %c0_182] : memref<32x192xbf16, #tpu.memory_space<vmem>>, vector<16x192xbf16>
    %c1_183 = arith.constant 1 : index
    %c0_184 = arith.constant 0 : index
    %c0_185 = arith.constant 0 : index
    %174 = vector.load %arg5[%c1_183, %c0_184, %c0_185] : memref<3x192x128xbf16, #tpu.memory_space<vmem>>, vector<1x192x128xbf16>
    %175 = vector.shape_cast %174 : vector<1x192x128xbf16> to vector<192x128xbf16>
    %cst_186 = arith.constant dense<0.000000e+00> : vector<16x128xf32>
    %176 = tpu.matmul %173, %175, %cst_186 {dimension_numbers = #tpu.dot_dimension_numbers<[1], [0], [0], [1], [0, 0, 1, 1], [], []>} : vector<16x192xbf16>, vector<192x128xbf16>, vector<16x128xf32> -> vector<16x128xf32>
    %177 = arith.addf %172, %176 : vector<16x128xf32>
    %c9_187 = arith.constant 9 : index
    %c0_188 = arith.constant 0 : index
    %178 = vector.load %arg10[%c9_187, %c0_188] : memref<32x192xbf16, #tpu.memory_space<vmem>>, vector<16x192xbf16>
    %c2_189 = arith.constant 2 : index
    %c0_190 = arith.constant 0 : index
    %c0_191 = arith.constant 0 : index
    %179 = vector.load %arg5[%c2_189, %c0_190, %c0_191] : memref<3x192x128xbf16, #tpu.memory_space<vmem>>, vector<1x192x128xbf16>
    %180 = vector.shape_cast %179 : vector<1x192x128xbf16> to vector<192x128xbf16>
    %cst_192 = arith.constant dense<0.000000e+00> : vector<16x128xf32>
    %181 = tpu.matmul %178, %180, %cst_192 {dimension_numbers = #tpu.dot_dimension_numbers<[1], [0], [0], [1], [0, 0, 1, 1], [], []>} : vector<16x192xbf16>, vector<192x128xbf16>, vector<16x128xf32> -> vector<16x128xf32>
    %182 = arith.addf %177, %181 : vector<16x128xf32>
    %c3_193 = arith.constant 3 : index
    %c0_194 = arith.constant 0 : index
    %183 = vector.load %arg6[%c3_193, %c0_194] : memref<4x128xf32, #tpu.memory_space<vmem>>, vector<1x128xf32>
    %c3_195 = arith.constant 3 : index
    %c0_196 = arith.constant 0 : index
    %184 = vector.load %arg7[%c3_195, %c0_196] : memref<4x128xf32, #tpu.memory_space<vmem>>, vector<1x128xf32>
    %185 = vector.broadcast %183 : vector<1x128xf32> to vector<16x128xf32>
    %186 = arith.mulf %182, %185 : vector<16x128xf32>
    %187 = vector.broadcast %184 : vector<1x128xf32> to vector<16x128xf32>
    %188 = arith.addf %186, %187 : vector<16x128xf32>
    %189 = arith.addf %188, %128 : vector<16x128xf32>
    %cst_197 = arith.constant 0.000000e+00 : f32
    %190 = vector.broadcast %cst_197 : f32 to vector<16x128xf32>
    %191 = arith.maximumf %189, %190 : vector<16x128xf32>
    %192 = vector.shape_cast %191 : vector<16x128xf32> to vector<1x16x128xf32>
    %c0_198 = arith.constant 0 : index
    %c0_199 = arith.constant 0 : index
    %c0_200 = arith.constant 0 : index
    %193 = vector.load %arg8[%c0_198, %c0_199, %c0_200] : memref<1x16x128xf32, #tpu.memory_space<vmem>>, vector<1x16x128xf32>
    tpu.vector_store %arg8[%c0_198, %c0_199, %c0_200], %192 {strides = array<i32>} : memref<1x16x128xf32, #tpu.memory_space<vmem>>, vector<1x16x128xf32>,
    return
  }
  func.func @transform_0(%arg0: i32) -> (i32, i32, i32) {
    %c0_i32 = arith.constant 0 : i32
    %c0_i32_0 = arith.constant 0 : i32
    %c0_i32_1 = arith.constant 0 : i32
    return %arg0, %c0_i32, %c0_i32_0 : i32, i32, i32
  }
  func.func @transform_1(%arg0: i32) -> (i32, i32, i32) {
    %c0_i32 = arith.constant 0 : i32
    %c0_i32_0 = arith.constant 0 : i32
    %c0_i32_1 = arith.constant 0 : i32
    %c0_i32_2 = arith.constant 0 : i32
    return %c0_i32, %c0_i32_0, %c0_i32_1 : i32, i32, i32
  }
  func.func @transform_2(%arg0: i32) -> (i32, i32, i32) {
    %c0_i32 = arith.constant 0 : i32
    %c0_i32_0 = arith.constant 0 : i32
    %c0_i32_1 = arith.constant 0 : i32
    %c0_i32_2 = arith.constant 0 : i32
    return %c0_i32, %c0_i32_0, %c0_i32_1 : i32, i32, i32
  }
  func.func @transform_3(%arg0: i32) -> (i32, i32, i32) {
    %c0_i32 = arith.constant 0 : i32
    %c0_i32_0 = arith.constant 0 : i32
    %c0_i32_1 = arith.constant 0 : i32
    %c0_i32_2 = arith.constant 0 : i32
    return %c0_i32, %c0_i32_0, %c0_i32_1 : i32, i32, i32
  }
  func.func @transform_4(%arg0: i32) -> (i32, i32, i32) {
    %c0_i32 = arith.constant 0 : i32
    %c0_i32_0 = arith.constant 0 : i32
    %c0_i32_1 = arith.constant 0 : i32
    %c0_i32_2 = arith.constant 0 : i32
    return %c0_i32, %c0_i32_0, %c0_i32_1 : i32, i32, i32
  }
  func.func @transform_5(%arg0: i32) -> (i32, i32) {
    %c0_i32 = arith.constant 0 : i32
    %c0_i32_0 = arith.constant 0 : i32
    %c0_i32_1 = arith.constant 0 : i32
    return %c0_i32, %c0_i32_0 : i32, i32
  }
  func.func @transform_6(%arg0: i32) -> (i32, i32) {
    %c0_i32 = arith.constant 0 : i32
    %c0_i32_0 = arith.constant 0 : i32
    %c0_i32_1 = arith.constant 0 : i32
    return %c0_i32, %c0_i32_0 : i32, i32
  }
  func.func @transform_7(%arg0: i32) -> (i32, i32, i32) {
    %c0_i32 = arith.constant 0 : i32
    %c0_i32_0 = arith.constant 0 : i32
    %c0_i32_1 = arith.constant 0 : i32
    return %arg0, %c0_i32, %c0_i32_0 : i32, i32, i32
  }
}

</mosaic_0001>

<bundles_post_ra>
// kernel: tile.43
= control target key start
LH: loop header
LB: loop body
LE: loop exit
PB: predicated region body
PF: predicated region fallthrough
CT: control target
= control target key end

     0   :  { %s28_s0 = inlined_call_operand.vmem [shape: f32[8], index: 0, kind: input, shape index: {}]   ;;  %s29_s1 = inlined_call_operand.vmem [shape: f32[16,8], index: 1, kind: output, shape index: {}]  }
   0x1   :  { %v4_v0 = vld [vmem:[%s28_s0] ss:$0 sm:$0xff] }
   0x2   :  { %5 = vst [vmem:[%s29_s1] sm:$0xff] %v4_v0  ;;  %8 = vst [vmem:[%s29_s1 + $0x8] sm:$0xff] %v4_v0 }

// kernel: tile.56
= control target key start
LH: loop header
LB: loop body
LE: loop exit
PB: predicated region body
PF: predicated region fallthrough
CT: control target
= control target key end

     0   :  { %s131_s10 = smov 120   ;;  %s132_s11 = smov 104   ;;  %vm3_vm0 = vcmask 64512   ;;  %vm9_vm1 = vcmask 1048512   ;;  %vm15_vm2 = vcmask 982912   ;;  %vm21_vm3 = vcmask 917312   ;;  %s207_s0 = inlined_call_operand.vmem [shape: f32[16,8], index: 0, kind: input, shape index: {}]   ;;  %s208_s1 = inlined_call_operand.vmem [shape: f32[1,128], index: 1, kind: output, shape index: {}]  }
   0x1   :  { %v101_v0 = vld [vmem:[%s207_s0 + $0xf] sm:$0x1]   ;;  %v103_v1 = vld [vmem:[%s207_s0 + $0xd] sm:$0x1]   ;;  %v102_v2 = vld [vmem:[%s207_s0 + $0xe] sm:$0x1]  }
   0x2   :  { %7 = vrot.lane.b32.xlu0 %v101_v0, %s131_s10  ;;  %19 = vrot.lane.b32.xlu1 %v103_v1, %s132_s11  ;;  %v104_v3 = vld [vmem:[%s207_s0 + $0xc] sm:$0x1]   ;;  %s133_s16 = smov 112   ;;  %s134_s17 = smov 96   ;;  %v105_v4 = vld [vmem:[%s207_s0 + $0xb] sm:$0x1]  }
   0x3   :  { %v106_v5 = vld [vmem:[%s207_s0 + $0xa] sm:$0x1]   ;;  %v2_v6 = vld [vmem:[%s207_s0] sm:$0x1]   ;;  %s135_s24 = smov 88   ;;  %s136_s25 = smov 80  }
   0x4   :  { %4 = vst.msk [vmem:[#allocation0] sm:$0x1] %vm3_vm0, %v2_v6   ;;  %v107_v7 = vld [vmem:[%s207_s0 + $0x9] sm:$0x1]   ;;  %v108_v8 = vld [vmem:[%s207_s0 + $0x8] sm:$0x1]  }
   0x5   :  { %s137_s30 = smov 72   ;;  %s138_s2 = smov 64   ;;  %v109_v9 = vld [vmem:[%s207_s0 + $0x7] sm:$0x1]   ;;  %v110_v10 = vld [vmem:[%s207_s0 + $0x6] sm:$0x1]  }
   0x6   :  { %13 = vrot.lane.b32.xlu0 %v102_v2, %s133_s16  ;;  %25 = vrot.lane.b32.xlu1 %v104_v3, %s134_s17  ;;  %s139_s7 = smov 56   ;;  %s140_s8 = smov 48   ;;  %v111_v11 = vld [vmem:[%s207_s0 + $0x5] sm:$0x1]   ;;  %v112_v12 = vld [vmem:[%s207_s0 + $0x4] sm:$0x1]  }
   0x7   :  { %s141_s13 = smov 40   ;;  %s142_s14 = smov 32   ;;  %v113_v13 = vld [vmem:[%s207_s0 + $0x3] sm:$0x1]   ;;  %v114_v14 = vld [vmem:[%s207_s0 + $0x2] sm:$0x1]  }
   0x8   :  { %s143_s19 = smov 24   ;;  %s144_s20 = smov 16   ;;  %v115_v15 = vld [vmem:[%s207_s0 + $0x1] sm:$0x1]   ;;  %vm27_vm4 = vcmask 851712   ;;  %vm33_vm5 = vcmask 786112  }
   0x9   :  { %s145_s0 = smov 8   ;;  %vm39_vm6 = vcmask 720512   ;;  %vm45_vm7 = vcmask 654912   ;;  %vm51_vm8 = vcmask 589312   ;;  %vm57_vm9 = vcmask 523712  }
   0xa   :  { %31 = vrot.lane.b32.xlu0 %v105_v4, %s135_s24  ;;  %37 = vrot.lane.b32.xlu1 %v106_v5, %s136_s25  ;;  %vm63_vm10 = vcmask 458112   ;;  %vm69_vm11 = vcmask 392512   ;;  %vm75_vm12 = vcmask 326912   ;;  %vm81_vm13 = vcmask 261312  }
   0xb   :  { %vm87_vm14 = vcmask 195712   ;;  %vm93_vm15 = vcmask 130112  }
   0xe   :  { %43 = vrot.lane.b32.xlu0 %v107_v7, %s137_s30  ;;  %49 = vrot.lane.b32.xlu1 %v108_v8, %s138_s2 }
  0x12   :  { %55 = vrot.lane.b32.xlu0 %v109_v9, %s139_s7  ;;  %61 = vrot.lane.b32.xlu1 %v110_v10, %s140_s8 }
  0x16   :  { %67 = vrot.lane.b32.xlu0 %v111_v11, %s141_s13  ;;  %73 = vrot.lane.b32.xlu1 %v112_v12, %s142_s14 }
  0x1a   :  { %79 = vrot.lane.b32.xlu0 %v113_v13, %s143_s19  ;;  %85 = vrot.lane.b32.xlu1 %v114_v14, %s144_s20 }
  0x1e   :  { %91 = vrot.lane.b32.xlu0 %v115_v15, %s145_s0 }
  0x74   :  { %v8_v16 = vpop.permute.xlu0 %7   ;;  %v20_v17 = vpop.permute.xlu1 %19  }
  0x75   :  { %10 = vst.msk [vmem:[#allocation0] sm:$0x1] %vm9_vm1, %v8_v16  }
  0x78   :  { %v14_v18 = vpop.permute.xlu0 %13   ;;  %v26_v19 = vpop.permute.xlu1 %25  }
  0x79   :  { %16 = vst.msk [vmem:[#allocation0] sm:$0x1] %vm15_vm2, %v14_v18  }
  0x7a   :  { %22 = vst.msk [vmem:[#allocation0] sm:$0x1] %vm21_vm3, %v20_v17  }
  0x7b   :  { %28 = vst.msk [vmem:[#allocation0] sm:$0x1] %vm27_vm4, %v26_v19  }
  0x7c   :  { %v32_v20 = vpop.permute.xlu0 %31   ;;  %v38_v21 = vpop.permute.xlu1 %37  }
  0x7d   :  { %34 = vst.msk [vmem:[#allocation0] sm:$0x1] %vm33_vm5, %v32_v20  }
  0x7e   :  { %40 = vst.msk [vmem:[#allocation0] sm:$0x1] %vm39_vm6, %v38_v21  }
  0x80   :  { %v44_v22 = vpop.permute.xlu0 %43   ;;  %v50_v23 = vpop.permute.xlu1 %49  }
  0x81   :  { %46 = vst.msk [vmem:[#allocation0] sm:$0x1] %vm45_vm7, %v44_v22  }
  0x82   :  { %52 = vst.msk [vmem:[#allocation0] sm:$0x1] %vm51_vm8, %v50_v23  }
  0x84   :  { %v56_v24 = vpop.permute.xlu0 %55   ;;  %v62_v25 = vpop.permute.xlu1 %61  }
  0x85   :  { %58 = vst.msk [vmem:[#allocation0] sm:$0x1] %vm57_vm9, %v56_v24  }
  0x86   :  { %64 = vst.msk [vmem:[#allocation0] sm:$0x1] %vm63_vm10, %v62_v25  }
  0x88   :  { %v68_v26 = vpop.permute.xlu0 %67   ;;  %v74_v27 = vpop.permute.xlu1 %73  }
  0x89   :  { %70 = vst.msk [vmem:[#allocation0] sm:$0x1] %vm69_vm11, %v68_v26  }
  0x8a   :  { %76 = vst.msk [vmem:[#allocation0] sm:$0x1] %vm75_vm12, %v74_v27  }
  0x8c   :  { %v80_v28 = vpop.permute.xlu0 %79   ;;  %v86_v29 = vpop.permute.xlu1 %85  }
  0x8d   :  { %82 = vst.msk [vmem:[#allocation0] sm:$0x1] %vm81_vm13, %v80_v28  }
  0x8e   :  { %88 = vst.msk [vmem:[#allocation0] sm:$0x1] %vm87_vm14, %v86_v29  }
  0x90   :  { %v92_v30 = vpop.permute.xlu0 %91  }
  0x91   :  { %94 = vst.msk [vmem:[#allocation0] sm:$0x1] %vm93_vm15, %v92_v30  }
  0x98   :  { %v98_v31 = vld [vmem:[#allocation0] sm:$0x1] }
  0x99   :  { %100 = vst [vmem:[%s208_s1] sm:$0x1] %v98_v31 }

// kernel: res_block_v2.1
= control target key start
LH: loop header
LB: loop body
LE: loop exit
PB: predicated region body
PF: predicated region fallthrough
CT: control target
= control target key end

     0   :  { %s5752_s24 = smov 0   ;;  %s7214_s0 = inlined_call_operand.vmem [shape: f32[2,16,128], index: 0, kind: input, shape index: {}]   ;;  %s7215_s1 = inlined_call_operand.vmem [shape: bf16[9,192,128], index: 1, kind: input, shape index: {}]   ;;  %s7216_s2 = inlined_call_operand.vmem [shape: bf16[7,192,128], index: 2, kind: input, shape index: {}]   ;;  %s7217_s3 = inlined_call_operand.vmem [shape: bf16[5,192,128], index: 3, kind: input, shape index: {}]   ;;  %s7218_s4 = inlined_call_operand.vmem [shape: bf16[3,192,128], index: 4, kind: input, shape index: {}]   ;;  %s7219_s5 = inlined_call_operand.vmem [shape: f32[4,128], index: 5, kind: input, shape index: {}]   ;;  %s7220_s6 = inlined_call_operand.vmem [shape: f32[4,128], index: 6, kind: input, shape index: {}]   ;;  %s7221_s7 = inlined_call_operand.vmem [shape: f32[2,16,128], index: 7, kind: output, shape index: {}]  }
   0x1 LB: > { %s4509_s25 = sadd.s32 4294967295, %s5708_s24   ;;  %p4513_p0 = scmp.ge.s32.totalorder %s5708_s24, 1  ;;  %s5708_s24 = sphi %s5752_s24, %s17_s24  }
   0x2   : > { %p237_p1 = scmp.lt.s32.totalorder %s5708_s24, 3 }
   0x4   : > { %p238_p2 = pnand %p4513_p0, %p237_p1 }
   0x5   : > { %p269_p3 = scmp.lt.s32.totalorder (!%p238_p2), %s4509_s25, 1  ;;  %v5412_v0 = vld [vmem:[%s7215_s1 + $0x60] sm:$0xff] (!%p238_p2)   ;;  %v5710_v1 = vmov (!%p238_p2), 0   ;;  %v5413_v2 = vld [vmem:[%s7215_s1 + $0x68] sm:$0xff] (!%p238_p2)   ;;  %vm286_vm0 = vcmask (!%p238_p2), 261124   ;;  %vm288_vm1 = vcmask (!%p238_p2), 257024  }
   0x6   : > { %241 = sbr.rel (%p238_p2) target bundleno = 2406 (0x966), region = 48  ;;  %491 = vmatprep.subr.bf16.mxu0 (!%p238_p2), %v5710_v1  ;;  %280 = vst [vmem:[#allocation2] sm:$0xf] (!%p238_p2), %v5710_v1  ;;  %283 = vst [vmem:[#allocation2 + $0x10] sm:$0xf0] (!%p238_p2), %v5710_v1  ;;  %1998 = vmatprep.subr.bf16.mxu1 (!%p238_p2), %v5710_v1  ;;  %v5414_v5 = vld [vmem:[%s7215_s1 + $0x70] sm:$0xff] (!%p238_p2)  }
   0x7   : > { %294 = vst [vmem:[#allocation3] sm:$0xf] (!%p238_p2), %v5710_v1  ;;  %296 = vst [vmem:[#allocation3 + $0x10] sm:$0xf0] (!%p238_p2), %v5710_v1  ;;  %492 = vmatpush1.bf16.msra.mxu0 (!%p238_p2), %v5412_v0  ;;  %vm290_vm2 = vcmask (!%p238_p2), 523524   ;;  %vm292_vm3 = vcmask (!%p238_p2), 519424  }
   0x8   : > { %302 = vst [vmem:[#allocation4] sm:$0xf] (!%p238_p2), %v5710_v1  ;;  %304 = vst [vmem:[#allocation4 + $0x10] sm:$0xf0] (!%p238_p2), %v5710_v1  ;;  %493 = vmatprep.subr.bf16.mxu0 (!%p238_p2), %v5710_v1  ;;  %vm281_vm4 = vcmask (!%p238_p2), 519168   ;;  %v5415_v8 = vld [vmem:[%s7215_s1 + $0x78] sm:$0xff] (!%p238_p2)  }
   0x9   : > { %287 = vst.msk [vmem:[#allocation2] sm:$0xf0] (!%p238_p2), %vm286_vm0, %v5710_v1  ;;  %298 = vst.msk [vmem:[#allocation3] sm:$0xf0] (!%p238_p2), %vm286_vm0, %v5710_v1  ;;  %s5711_s15 = smov (!%p238_p2), 32   ;;  %vm284_vm5 = vcmask (!%p238_p2), 523268  }
   0xa   : > { %306 = vst.msk [vmem:[#allocation4] sm:$0xf0] (!%p238_p2), %vm286_vm0, %v5710_v1  ;;  %v5416_v9 = vld [vmem:[%s7215_s1 + $0x80] sm:$0xff] (!%p238_p2)   ;;  %v5417_v10 = vld [vmem:[%s7215_s1 + $0x88] sm:$0xff] (!%p238_p2)   ;;  %v5418_v11 = vld [vmem:[%s7215_s1 + $0x90] sm:$0xff] (!%p238_p2)   ;;  %vm318_vm6 = vcmask (!%p238_p2), 1047812  }
   0xb   : > { %494 = vmatpush1.bf16.msra.mxu0 (!%p238_p2), %v5413_v2  ;;  %289 = vst.msk [vmem:[#allocation2 + $0x10] sm:$0xf] (!%p238_p2), %vm288_vm1, %v5710_v1  ;;  %299 = vst.msk [vmem:[#allocation3 + $0x10] sm:$0xf] (!%p238_p2), %vm288_vm1, %v5710_v1  ;;  %v5419_v12 = vld [vmem:[%s7215_s1 + $0x98] sm:$0xff] (!%p238_p2)   ;;  %v5420_v13 = vld [vmem:[%s7215_s1 + $0xa0] sm:$0xff] (!%p238_p2)  }
   0xc   : > { %307 = vst.msk [vmem:[#allocation4 + $0x10] sm:$0xf] (!%p238_p2), %vm288_vm1, %v5710_v1  ;;  %495 = vmatprep.subr.bf16.mxu0 (!%p238_p2), %v5710_v1  ;;  %v5421_v14 = vld [vmem:[%s7215_s1 + $0xa8] sm:$0xff] (!%p238_p2)   ;;  %v5422_v15 = vld [vmem:[%s7215_s1 + $0xb0] sm:$0xff] (!%p238_p2)   ;;  %v5423_v16 = vld [vmem:[%s7215_s1 + $0xb8] sm:$0xff] (!%p238_p2)   ;;  %vm321_vm7 = vcmask (!%p238_p2), 1043712  }
   0xd   : > { %s7223_s25 = smov (!%p269_p3, %s4509_s25), 1  ;;  %291 = vst.msk [vmem:[#allocation2 + $0x8] sm:$0xf0] %vm290_vm2, %v5710_v1  ;;  %300 = vst.msk [vmem:[#allocation3 + $0x8] sm:$0xf0] %vm290_vm2, %v5710_v1  ;;  %vm487_vm8 = vcmask 523264  }
   0xe   : > { %s5320_s30 = sshll.u32 %s7223_s25, 4  ;;  %293 = vst.msk [vmem:[#allocation2 + $0x18] sm:$0xf] %vm292_vm3, %v5710_v1  ;;  %301 = vst.msk [vmem:[#allocation3 + $0x18] sm:$0xf] %vm292_vm3, %v5710_v1  ;;  %v5424_v45 = vld [vmem:[%s7215_s1] sm:$0xff]  }
   0xf   : > { %s5789_s10 = scalar_lea.vmem %s7214_s0, %s5320_s30  ;;  %308 = vst.msk [vmem:[#allocation4 + $0x8] sm:$0xf0] %vm290_vm2, %v5710_v1  ;;  %496 = vmatpush1.bf16.msra.mxu0 %v5414_v5  ;;  %vm379_vm9 = vsmask.f32 5376  ;;  %vm536_vm10 = vcmask 1045504   ;;  %v5425_v49 = vld [vmem:[%s7215_s1 + $0x8] sm:$0xff]   ;;  %s278_s12 = scalar_lea.vmem %s7221_s7, %s5320_s30 }
  0x10   : > { %v310_v3 = vld [vmem:[%s5789_s10] sm:$0xff]  ;;  %v311_v4 = vld [vmem:[%s5789_s10 + $0x8] sm:$0xff]  ;;  %309 = vst.msk [vmem:[#allocation4 + $0x18] sm:$0xf] %vm292_vm3, %v5710_v1  ;;  %497 = vmatprep.subr.bf16.mxu0 %v5710_v1  ;;  %v5426_v50 = vld [vmem:[%s7215_s1 + $0x10] sm:$0xff]   ;;  %vm691_vm11 = vcmask 1044480  }
  0x11   : > { %v312_v6 = vpack.c.bf16 %v311_v4, %v310_v3  ;;  %282 = vst.msk [vmem:[#allocation2 + $0x8] sm:$0xf] %vm281_vm4, %v5710_v1  ;;  %295 = vst.msk [vmem:[#allocation3 + $0x8] sm:$0xf] %vm281_vm4, %v5710_v1  ;;  %v5427_v51 = vld [vmem:[%s7215_s1 + $0x18] sm:$0xff]   ;;  %v5428_v52 = vld [vmem:[%s7215_s1 + $0x20] sm:$0xff]  }
  0x12   : > { %303 = vst.msk [vmem:[#allocation4 + $0x8] sm:$0xf] %vm281_vm4, %v5710_v1  ;;  %v5429_v53 = vld [vmem:[%s7215_s1 + $0x28] sm:$0xff]   ;;  %v5430_v54 = vld [vmem:[%s7215_s1 + $0x30] sm:$0xff]   ;;  %v5431_v55 = vld [vmem:[%s7215_s1 + $0x38] sm:$0xff]   ;;  %vm1029_vm13 = vcmask 1043456  }
  0x13   : > { %v314_v7 = vrot.slane %v312_v6, 4  ;;  %285 = vst.msk [vmem:[#allocation2 + $0x18] sm:$0xf0] %vm284_vm5, %v5710_v1  ;;  %297 = vst.msk [vmem:[#allocation3 + $0x18] sm:$0xf0] %vm284_vm5, %v5710_v1  ;;  %498 = vmatpush1.bf16.msra.mxu0 %v5415_v8  ;;  %v5432_v56 = vld [vmem:[%s7215_s1 + $0x40] sm:$0xff]  }
  0x14   : > { %305 = vst.msk [vmem:[#allocation4 + $0x18] sm:$0xf0] %vm284_vm5, %v5710_v1  ;;  %499 = vmatprep.subr.bf16.mxu0 %v5710_v1  ;;  %v5433_v57 = vld [vmem:[%s7215_s1 + $0x48] sm:$0xff]   ;;  %v5434_v59 = vld [vmem:[%s7215_s1 + $0x50] sm:$0xff]   ;;  %v5435_v63 = vld [vmem:[%s7215_s1 + $0x58] sm:$0xff]   ;;  %vm1367_vm15 = vcmask 1042432  }
  0x15   : > { %315 = vrot.lane.b32.xlu0 %v314_v7, %s5711_s15  ;;  %v5436_v3 = vld [vmem:[%s7215_s1 + $0xc0] sm:$0xff]   ;;  %v5437_v5 = vld [vmem:[%s7215_s1 + $0xc8] sm:$0xff]   ;;  %v5438_v7 = vld [vmem:[%s7215_s1 + $0xd0] sm:$0xff]   ;;  %vm844_vm12 = vsmask.f32 4352  ;;  %vm1705_vm3 = vcmask 1041408  }
  0x16   : > { %v5439_v8 = vld [vmem:[%s7215_s1 + $0xd8] sm:$0xff]   ;;  %vm1182_vm14 = vsmask.f32 3328  ;;  %vm1520_vm2 = vsmask.f32 2304 }
  0x17   : > { %500 = vmatpush1.bf16.msra.mxu0 %v5416_v9  ;;  %v5440_v9 = vld [vmem:[%s7215_s1 + $0xe0] sm:$0xff]  }
  0x18   : > { %501 = vmatprep.subr.bf16.mxu0 %v5710_v1 }
  0x1b   : > { %502 = vmatpush1.bf16.msra.mxu0 %v5417_v10  ;;  %v5441_v10 = vld [vmem:[%s7215_s1 + $0xe8] sm:$0xff]  }
  0x1c   : > { %503 = vmatprep.subr.bf16.mxu0 %v5710_v1 }
  0x1f   : > { %504 = vmatpush1.bf16.msra.mxu0 %v5418_v11  ;;  %v5442_v11 = vld [vmem:[%s7215_s1 + $0xf0] sm:$0xff]  }
  0x20   : > { %505 = vmatprep.subr.bf16.mxu0 %v5710_v1 }
  0x23   : > { %506 = vmatpush1.bf16.msra.mxu0 %v5419_v12  ;;  %v5443_v12 = vld [vmem:[%s7215_s1 + $0xf8] sm:$0xff]  }
  0x24   : > { %507 = vmatprep.subr.bf16.mxu0 %v5710_v1 }
  0x27   : > { %508 = vmatpush1.bf16.msra.mxu0 %v5420_v13 }
  0x28   : > { %509 = vmatprep.subr.bf16.mxu0 %v5710_v1 }
  0x2b   : > { %510 = vmatpush1.bf16.msra.mxu0 %v5421_v14 }
  0x2c   : > { %511 = vmatprep.subr.bf16.mxu0 %v5710_v1 }
  0x2f   : > { %512 = vmatpush1.bf16.msra.mxu0 %v5422_v15 }
  0x30   : > { %513 = vmatprep.subr.bf16.mxu0 %v5710_v1 }
  0x33   : > { %514 = vmatpush1.bf16.msra.mxu0 %v5423_v16  ;;  %v5444_v16 = vld [vmem:[%s7215_s1 + $0x100] sm:$0xff]  }
  0x34   : > { %619 = vmatprep.subr.bf16.mxu0 %v5710_v1 }
  0x87   : > { %v316_v17 = vpop.permute.xlu0 %315 }
  0x88   : > { %319 = vst.msk [vmem:[#allocation2] sm:$0xf0] %vm318_vm6, %v316_v17 }
  0x89   : > { %320 = vst.msk [vmem:[#allocation2 + $0x8] sm:$0xf0] %vm286_vm0, %v316_v17 }
  0x8a   : > { %322 = vst.msk [vmem:[#allocation2 + $0x10] sm:$0xf] %vm321_vm7, %v316_v17 }
  0x8b   : > { %323 = vst.msk [vmem:[#allocation2 + $0x18] sm:$0xf] %vm288_vm1, %v316_v17 }
  0x8f   : > { %v5859_v20 = vld [vmem:[#allocation2] sm:$0xfc] }
  0x90   : > { %v325_v18 = vld [vmem:[#allocation2 + $0x8] sm:$0xfc]  ;;  %v381_v26 = vshrl.u32 %v5859_v20, 16  ;;  %v384_v27 = vshll.u32 %v5859_v20, 16  ;;  %v537_v61 = vrot.slane %v5859_v20, 2 }
  0x91   : > { %v398_v21 = vshrl.u32 %v325_v18, 16  ;;  %v401_v22 = vshll.u32 %v325_v18, 16  ;;  %v5863_v25 = vld [vmem:[#allocation2 + $0x10] sm:$0x7]  ;;  %v540_v41 = vrot.slane %v325_v18, 2 }
  0x92   : > { %v5857_v19 = vld [vmem:[#allocation2 + $0x18] sm:$0x7]  ;;  %v389_v28 = vshrl.u32 %v5863_v25, 16  ;;  %v392_v29 = vshll.u32 %v5863_v25, 16  ;;  %v383_v35 = vrot.slane %v381_v26, 2  ;;  %v386_v36 = vrot.slane %v384_v27, 3 }
  0x93   : > { %v406_v23 = vshrl.u32 %v5857_v19, 16  ;;  %v409_v24 = vshll.u32 %v5857_v19, 16  ;;  %v327_v30 = vld [vmem:[#allocation2 + $0x18] sm:$0x3]  ;;  %v400_v31 = vrot.slane %v398_v21, 2  ;;  %v403_v32 = vrot.slane %v401_v22, 3 }
  0x94   : > { %v391_v37 = vrot.slane %v389_v28, 2  ;;  %v394_v38 = vrot.slane %v392_v29, 3  ;;  %v541_v42 = vrot.slane %v327_v30, 2  ;;  %v387_v43 = vor.u32 %v386_v36, %v383_v35  ;;  %v326_v58 = vld [vmem:[#allocation2 + $0x10] sm:$0x3]  ;;  %v5447_v27 = vld [vmem:[%s7215_s1 + $0x118] sm:$0xff]  }
  0x95   : > { %v408_v33 = vrot.slane %v406_v23, 2  ;;  %v411_v34 = vrot.slane %v409_v24, 3  ;;  %v404_v39 = vor.u32 %v403_v32, %v400_v31  ;;  %v661_v60 = vld [vmem:[#allocation2 + $0x8] sm:$0xf8]  ;;  %v538_v62 = vrot.slane %v326_v58, 2  ;;  %v5446_v22 = vld [vmem:[%s7215_s1 + $0x110] sm:$0xff]  }
  0x96   : > { %v395_v44 = vor.u32 %v394_v38, %v391_v37  ;;  %v542_v48 = vsel %vm536_vm10, %v540_v41, %v541_v42  ;;  %v695_v0 = vrot.slane %v661_v60, 3  ;;  %v696_v2 = vrot.slane %v5857_v19, 3  ;;  %v5957_v13 = vld [vmem:[#allocation2 + $0x18] sm:$0xf]  ;;  %v5445_v19 = vld [vmem:[%s7215_s1 + $0x108] sm:$0xff]   ;;  %v5448_v30 = vld [vmem:[%s7215_s1 + $0x120] sm:$0xff]  }
  0x97   : > { %v412_v40 = vor.u32 %v411_v34, %v408_v33  ;;  %v539_v4 = vsel %vm536_vm10, %v537_v61, %v538_v62  ;;  %v863_v14 = vshrl.u32 %v661_v60, 16  ;;  %v866_v15 = vshll.u32 %v661_v60, 16  ;;  %v660_v23 = vld [vmem:[#allocation2] sm:$0xf8]  ;;  %v5450_v35 = vld [vmem:[%s7215_s1 + $0x130] sm:$0xff]   ;;  %v5451_v36 = vld [vmem:[%s7215_s1 + $0x138] sm:$0xff]  }
  0x98   : > { %v396_v47 = vsel %vm379_vm9, %v387_v43, %v395_v44  ;;  %v697_v6 = vsel %vm691_vm11, %v695_v0, %v696_v2  ;;  %v871_v17 = vshrl.u32 %v5957_v13, 16  ;;  %v874_v18 = vshll.u32 %v5957_v13, 16  ;;  %v5452_v37 = vld [vmem:[%s7215_s1 + $0x140] sm:$0xff]   ;;  %v5453_v38 = vld [vmem:[%s7215_s1 + $0x148] sm:$0xff]   ;;  %v6018_v42 = vld [vmem:[#allocation2 + $0x10] sm:$0xf] }
  0x99   : > { %v413_v46 = vsel %vm379_vm9, %v404_v39, %v412_v40  ;;  %v865_v20 = vrot.slane %v863_v14, 3  ;;  %v868_v21 = vrot.slane %v866_v15, 4  ;;  %v692_v28 = vrot.slane %v660_v23, 3  ;;  %v5454_v39 = vld [vmem:[%s7215_s1 + $0x150] sm:$0xff]   ;;  %v5455_v40 = vld [vmem:[%s7215_s1 + $0x158] sm:$0xff]   ;;  %v5456_v41 = vld [vmem:[%s7215_s1 + $0x160] sm:$0xff]  }
  0x9a   : > { %4554 = vmatprep.mubr.msk.bf16.mxu0 %vm487_vm8, %v413_v46  ;;  %v873_v24 = vrot.slane %v871_v17, 3  ;;  %v876_v26 = vrot.slane %v874_v18, 4  ;;  %v693_v29 = vrot.slane %v5863_v25, 3  ;;  %v5449_v25 = vld [vmem:[%s7215_s1 + $0x128] sm:$0xff]   ;;  %v846_v44 = vshrl.u32 %v660_v23, 16  ;;  %v5463_v0 = vld [vmem:[%s7215_s1 + $0x198] sm:$0xff]  }
  0x9b   : > { %524 = vmatmul.mubr.bf16.vlgmr.msra.gmra.mrb[0].mxu0 %v396_v47  ;;  %v869_v31 = vor.u32 %v868_v21, %v865_v20  ;;  %v5457_v43 = vld [vmem:[%s7215_s1 + $0x168] sm:$0xff]   ;;  %v854_v46 = vshrl.u32 %v6018_v42, 16  ;;  %v857_v47 = vshll.u32 %v6018_v42, 16  ;;  %v1034_v58 = vrot.slane %v5957_v13, 4  ;;  %v5464_v2 = vld [vmem:[%s7215_s1 + $0x1a0] sm:$0xff]   ;;  %v5470_v13 = vld [vmem:[%s7215_s1 + $0x1d0] sm:$0xff]  }
  0x9c   : > { %620 = vmatpush1.bf16.msra.mxu0 %v5424_v45  ;;  %4567 = vmatprep.mubr.msk.bf16.mxu0 %vm487_vm8, %v542_v48  ;;  %v877_v32 = vor.u32 %v876_v26, %v873_v24  ;;  %v694_v33 = vsel %vm691_vm11, %v692_v28, %v693_v29  ;;  %v849_v45 = vshll.u32 %v660_v23, 16  ;;  %v5458_v48 = vld [vmem:[%s7215_s1 + $0x170] sm:$0xff]   ;;  %v5461_v62 = vld [vmem:[%s7215_s1 + $0x188] sm:$0xff]   ;;  %v998_v14 = vld [vmem:[#allocation2] sm:$0xf0]  ;;  %v1031_v21 = vrot.slane %v6018_v42, 4 }
  0x9d   : > { %621 = vmatprep.subr.bf16.mxu0 %v5710_v1  ;;  %v1030_v20 = vrot.slane %v998_v14, 4  ;;  %v5472_v24 = vld [vmem:[%s7215_s1 + $0x1e0] sm:$0xff]   ;;  %v5473_v28 = vld [vmem:[%s7215_s1 + $0x1e8] sm:$0xff]   ;;  %v5474_v29 = vld [vmem:[%s7215_s1 + $0x1f0] sm:$0xff]  }
  0x9e   : > { %v878_v34 = vsel %vm844_vm12, %v869_v31, %v877_v32  ;;  %v5476_v31 = vld [vmem:[%s7215_s1 + $0x200] sm:$0xff]   ;;  %v5477_v32 = vld [vmem:[%s7215_s1 + $0x208] sm:$0xff]  }
  0x9f   : > { %v1032_v26 = vsel %vm1029_vm13, %v1030_v20, %v1031_v21  ;;  %v5497_v20 = vld [vmem:[%s7215_s1 + $0x2a8] sm:$0xff]   ;;  %v5498_v21 = vld [vmem:[%s7215_s1 + $0x2b0] sm:$0xff]  }
  0xa0   : > { %622 = vmatpush1.bf16.msra.mxu0 %v5425_v49  ;;  %v848_v49 = vrot.slane %v846_v44, 3 }
  0xa1   : > { %623 = vmatprep.subr.bf16.mxu0 %v5710_v1 }
  0xa4   : > { %624 = vmatpush1.bf16.msra.mxu0 %v5426_v50  ;;  %v851_v50 = vrot.slane %v849_v45, 4 }
  0xa5   : > { %625 = vmatprep.subr.bf16.mxu0 %v5710_v1 }
  0xa8   : > { %626 = vmatpush1.bf16.msra.mxu0 %v5427_v51  ;;  %v856_v51 = vrot.slane %v854_v46, 3  ;;  %v5483_v46 = vld [vmem:[%s7215_s1 + $0x238] sm:$0xff]  }
  0xa9   : > { %627 = vmatprep.subr.bf16.mxu0 %v5710_v1 }
  0xac   : > { %628 = vmatpush1.bf16.msra.mxu0 %v5428_v52  ;;  %v859_v52 = vrot.slane %v857_v47, 4  ;;  %v1337_v47 = vld [vmem:[#allocation2 + $0x8] sm:$0xe0] }
  0xad   : > { %629 = vmatprep.subr.bf16.mxu0 %v5710_v1 }
  0xb0   : > { %630 = vmatpush1.bf16.msra.mxu0 %v5429_v53  ;;  %v5459_v53 = vld [vmem:[%s7215_s1 + $0x178] sm:$0xff]  }
  0xb1   : > { %631 = vmatprep.subr.bf16.mxu0 %v5710_v1 }
  0xb4   : > { %632 = vmatpush1.bf16.msra.mxu0 %v5430_v54  ;;  %v999_v54 = vld [vmem:[#allocation2 + $0x8] sm:$0xf0] }
  0xb5   : > { %633 = vmatprep.subr.bf16.mxu0 %v5710_v1 }
  0xb8   : > { %634 = vmatpush1.bf16.msra.mxu0 %v5431_v55  ;;  %v852_v55 = vor.u32 %v851_v50, %v848_v49  ;;  %v1371_v50 = vrot.slane %v1337_v47, 5 }
  0xb9   : > { %635 = vmatprep.subr.bf16.mxu0 %v5710_v1 }
  0xbc   : > { %636 = vmatpush1.bf16.msra.mxu0 %v5432_v56  ;;  %v860_v56 = vor.u32 %v859_v52, %v856_v51  ;;  %v5484_v52 = vld [vmem:[%s7215_s1 + $0x240] sm:$0xff]  }
  0xbd   : > { %637 = vmatprep.subr.bf16.mxu0 %v5710_v1 }
  0xbe   : > { %v861_v60 = vsel %vm844_vm12, %v852_v55, %v860_v56  ;;  %v5485_v55 = vld [vmem:[%s7215_s1 + $0x248] sm:$0xff]   ;;  %v5486_v56 = vld [vmem:[%s7215_s1 + $0x250] sm:$0xff]  }
  0xc0   : > { %638 = vmatpush1.bf16.msra.mxu0 %v5433_v57  ;;  %v1033_v57 = vrot.slane %v999_v54, 4 }
  0xc1   : > { %639 = vmatprep.subr.bf16.mxu0 %v5710_v1 }
  0xc2   : > { %v1035_v61 = vsel %vm1029_vm13, %v1033_v57, %v1034_v58  ;;  %v5487_v57 = vld [vmem:[%s7215_s1 + $0x258] sm:$0xff]   ;;  %v5488_v58 = vld [vmem:[%s7215_s1 + $0x260] sm:$0xff]  }
  0xc4   : > { %640 = vmatpush1.bf16.msra.mxu0 %v5434_v59  ;;  %v5460_v59 = vld [vmem:[%s7215_s1 + $0x180] sm:$0xff]  }
  0xc5   : > { %641 = vmatprep.subr.bf16.mxu0 %v5710_v1 }
  0xc8   : > { %642 = vmatpush1.bf16.msra.mxu0 %v5435_v63  ;;  %v5462_v63 = vld [vmem:[%s7215_s1 + $0x190] sm:$0xff]  }
  0xc9   : > { %774 = vmatprep.subr.bf16.mxu0 %v5710_v1 }
  0xcb   : > { %652 = vmatmul.mubr.bf16.vlgmr.msra.gmra.mrb[0].mxu0 %v539_v4  ;;  %v5466_v4 = vld [vmem:[%s7215_s1 + $0x1b0] sm:$0xff]  }
  0xcc   : > { %775 = vmatpush1.bf16.msra.mxu0 %v5436_v3  ;;  %4604 = vmatprep.mubr.msk.bf16.mxu0 %vm487_vm8, %v697_v6  ;;  %v5465_v3 = vld [vmem:[%s7215_s1 + $0x1a8] sm:$0xff]   ;;  %v5468_v6 = vld [vmem:[%s7215_s1 + $0x1c0] sm:$0xff]  }
  0xcd   : > { %776 = vmatprep.subr.bf16.mxu0 %v5710_v1 }
  0xd0   : > { %777 = vmatpush1.bf16.msra.mxu0 %v5437_v5  ;;  %v5467_v5 = vld [vmem:[%s7215_s1 + $0x1b8] sm:$0xff]  }
  0xd1   : > { %778 = vmatprep.subr.bf16.mxu0 %v5710_v1 }
  0xd4   : > { %779 = vmatpush1.bf16.msra.mxu0 %v5438_v7  ;;  %v5469_v7 = vld [vmem:[%s7215_s1 + $0x1c8] sm:$0xff]  }
  0xd5   : > { %780 = vmatprep.subr.bf16.mxu0 %v5710_v1 }
  0xd8   : > { %781 = vmatpush1.bf16.msra.mxu0 %v5439_v8  ;;  %v6077_v8 = vld [vmem:[#allocation2 + $0x18] sm:$0x1f] }
  0xd9   : > { %782 = vmatprep.subr.bf16.mxu0 %v5710_v1  ;;  %v1372_v51 = vrot.slane %v6077_v8, 5 }
  0xdc   : > { %783 = vmatpush1.bf16.msra.mxu0 %v5440_v9  ;;  %v1201_v9 = vshrl.u32 %v999_v54, 16 }
  0xdd   : > { %784 = vmatprep.subr.bf16.mxu0 %v5710_v1 }
  0xde   : > { %v1203_v15 = vrot.slane %v1201_v9, 4 }
  0xe0   : > { %785 = vmatpush1.bf16.msra.mxu0 %v5441_v10  ;;  %v1204_v10 = vshll.u32 %v999_v54, 16  ;;  %v1373_v54 = vsel %vm1367_vm15, %v1371_v50, %v1372_v51  ;;  %v5511_v50 = vld [vmem:[%s7215_s1 + $0x318] sm:$0xff]   ;;  %v5512_v51 = vld [vmem:[%s7215_s1 + $0x320] sm:$0xff]  }
  0xe1   : > { %786 = vmatprep.subr.bf16.mxu0 %v5710_v1 }
  0xe4   : > { %787 = vmatpush1.bf16.msra.mxu0 %v5442_v11  ;;  %v1209_v11 = vshrl.u32 %v6077_v8, 16 }
  0xe5   : > { %788 = vmatprep.subr.bf16.mxu0 %v5710_v1 }
  0xe6   : > { %v1211_v17 = vrot.slane %v1209_v11, 4 }
  0xe8   : > { %789 = vmatpush1.bf16.msra.mxu0 %v5443_v12  ;;  %v1212_v12 = vshll.u32 %v6077_v8, 16 }
  0xe9   : > { %790 = vmatprep.subr.bf16.mxu0 %v5710_v1 }
  0xea   : > { %v1214_v18 = vrot.slane %v1212_v12, 5  ;;  %v5495_v12 = vld [vmem:[%s7215_s1 + $0x298] sm:$0xff]  }
  0xec   : > { %791 = vmatpush1.bf16.msra.mxu0 %v5444_v16  ;;  %v1206_v16 = vrot.slane %v1204_v10, 5  ;;  %v1215_v23 = vor.u32 %v1214_v18, %v1211_v17  ;;  %v5496_v17 = vld [vmem:[%s7215_s1 + $0x2a0] sm:$0xff]  }
  0xed   : > { %792 = vmatprep.subr.bf16.mxu0 %v5710_v1 }
  0xf0   : > { %793 = vmatpush1.bf16.msra.mxu0 %v5445_v19  ;;  %v5471_v19 = vld [vmem:[%s7215_s1 + $0x1d8] sm:$0xff]  }
  0xf1   : > { %794 = vmatprep.subr.bf16.mxu0 %v5710_v1 }
  0xf4   : > { %795 = vmatpush1.bf16.msra.mxu0 %v5446_v22  ;;  %v1207_v22 = vor.u32 %v1206_v16, %v1203_v15 }
  0xf5   : > { %796 = vmatprep.subr.bf16.mxu0 %v5710_v1 }
  0xf8   : > { %797 = vmatpush1.bf16.msra.mxu0 %v5447_v27  ;;  %v1216_v27 = vsel %vm1182_vm14, %v1207_v22, %v1215_v23  ;;  %v5499_v22 = vld [vmem:[%s7215_s1 + $0x2b8] sm:$0xff]   ;;  %v5500_v23 = vld [vmem:[%s7215_s1 + $0x2c0] sm:$0xff]  }
  0xf9   : > { %955 = vmatprep.subr.bf16.mxu0 %v5710_v1 }
  0xfb   : > { %807 = vmatmul.mubr.bf16.vlgmr.msra.gmra.mrb[0].mxu0 %v694_v33  ;;  %v5478_v33 = vld [vmem:[%s7215_s1 + $0x210] sm:$0xff]  }
  0xfc   : > { %956 = vmatpush1.bf16.msra.mxu0 %v5448_v30  ;;  %4641 = vmatprep.mubr.msk.bf16.mxu0 %vm487_vm8, %v878_v34  ;;  %v5475_v30 = vld [vmem:[%s7215_s1 + $0x1f8] sm:$0xff]  }
  0xfd   : > { %957 = vmatprep.subr.bf16.mxu0 %v5710_v1  ;;  %v5479_v34 = vld [vmem:[%s7215_s1 + $0x218] sm:$0xff]  }
 0x100   : > { %958 = vmatpush1.bf16.msra.mxu0 %v5449_v25  ;;  %v5480_v25 = vld [vmem:[%s7215_s1 + $0x220] sm:$0xff]  }
 0x101   : > { %959 = vmatprep.subr.bf16.mxu0 %v5710_v1 }
 0x104   : > { %960 = vmatpush1.bf16.msra.mxu0 %v5450_v35  ;;  %v6130_v35 = vld [vmem:[#allocation2 + $0x10] sm:$0x1f] }
 0x105   : > { %961 = vmatprep.subr.bf16.mxu0 %v5710_v1 }
 0x108   : > { %962 = vmatpush1.bf16.msra.mxu0 %v5451_v36  ;;  %v5481_v36 = vld [vmem:[%s7215_s1 + $0x228] sm:$0xff]  }
 0x109   : > { %963 = vmatprep.subr.bf16.mxu0 %v5710_v1 }
 0x10c   : > { %964 = vmatpush1.bf16.msra.mxu0 %v5452_v37  ;;  %v1184_v37 = vshrl.u32 %v998_v14, 16 }
 0x10d   : > { %965 = vmatprep.subr.bf16.mxu0 %v5710_v1 }
 0x10e   : > { %v1186_v42 = vrot.slane %v1184_v37, 4 }
 0x110   : > { %966 = vmatpush1.bf16.msra.mxu0 %v5453_v38  ;;  %v1187_v38 = vshll.u32 %v998_v14, 16  ;;  %v1369_v14 = vrot.slane %v6130_v35, 5 }
 0x111   : > { %967 = vmatprep.subr.bf16.mxu0 %v5710_v1 }
 0x114   : > { %968 = vmatpush1.bf16.msra.mxu0 %v5454_v39  ;;  %v1192_v39 = vshrl.u32 %v6130_v35, 16 }
 0x115   : > { %969 = vmatprep.subr.bf16.mxu0 %v5710_v1 }
 0x116   : > { %v1194_v44 = vrot.slane %v1192_v39, 4  ;;  %v5507_v39 = vld [vmem:[%s7215_s1 + $0x2f8] sm:$0xff]  }
 0x118   : > { %970 = vmatpush1.bf16.msra.mxu0 %v5455_v40  ;;  %v1195_v40 = vshll.u32 %v6130_v35, 16 }
 0x119   : > { %971 = vmatprep.subr.bf16.mxu0 %v5710_v1 }
 0x11a   : > { %v1197_v45 = vrot.slane %v1195_v40, 5  ;;  %v1675_v40 = vld [vmem:[#allocation2 + $0x8] sm:$0xc0] }
 0x11c   : > { %972 = vmatpush1.bf16.msra.mxu0 %v5456_v41  ;;  %v5482_v41 = vld [vmem:[%s7215_s1 + $0x230] sm:$0xff]   ;;  %v1198_v49 = vor.u32 %v1197_v45, %v1194_v44  ;;  %v5508_v45 = vld [vmem:[%s7215_s1 + $0x300] sm:$0xff]  }
 0x11d   : > { %973 = vmatprep.subr.bf16.mxu0 %v5710_v1 }
 0x120   : > { %974 = vmatpush1.bf16.msra.mxu0 %v5457_v43  ;;  %v1189_v43 = vrot.slane %v1187_v38, 5 }
 0x121   : > { %975 = vmatprep.subr.bf16.mxu0 %v5710_v1 }
 0x124   : > { %976 = vmatpush1.bf16.msra.mxu0 %v5458_v48  ;;  %v1190_v48 = vor.u32 %v1189_v43, %v1186_v42  ;;  %v1709_v43 = vrot.slane %v1675_v40, 6 }
 0x125   : > { %977 = vmatprep.subr.bf16.mxu0 %v5710_v1 }
 0x128   : > { %978 = vmatpush1.bf16.msra.mxu0 %v5459_v53  ;;  %v1199_v53 = vsel %vm1182_vm14, %v1190_v48, %v1198_v49  ;;  %v5509_v48 = vld [vmem:[%s7215_s1 + $0x308] sm:$0xff]   ;;  %v5510_v49 = vld [vmem:[%s7215_s1 + $0x310] sm:$0xff]  }
 0x129   : > { %1112 = vmatprep.subr.bf16.mxu0 %v5710_v1 }
 0x12b   : > { %988 = vmatmul.mubr.bf16.vlgmr.msra.gmra.mrb[0].mxu0 %v861_v60  ;;  %v5490_v60 = vld [vmem:[%s7215_s1 + $0x270] sm:$0xff]  }
 0x12c   : > { %1113 = vmatpush1.bf16.msra.mxu0 %v5460_v59  ;;  %4678 = vmatprep.mubr.msk.bf16.mxu0 %vm487_vm8, %v1035_v61  ;;  %v5489_v59 = vld [vmem:[%s7215_s1 + $0x268] sm:$0xff]   ;;  %v5491_v61 = vld [vmem:[%s7215_s1 + $0x278] sm:$0xff]  }
 0x12d   : > { %1114 = vmatprep.subr.bf16.mxu0 %v5710_v1 }
 0x130   : > { %1115 = vmatpush1.bf16.msra.mxu0 %v5461_v62  ;;  %v5492_v62 = vld [vmem:[%s7215_s1 + $0x280] sm:$0xff]  }
 0x131   : > { %1116 = vmatprep.subr.bf16.mxu0 %v5710_v1 }
 0x134   : > { %1117 = vmatpush1.bf16.msra.mxu0 %v5462_v63  ;;  %v5493_v63 = vld [vmem:[%s7215_s1 + $0x288] sm:$0xff]  }
 0x135   : > { %1118 = vmatprep.subr.bf16.mxu0 %v5710_v1 }
 0x138   : > { %1119 = vmatpush1.bf16.msra.mxu0 %v5463_v0  ;;  %v6189_v0 = vld [vmem:[#allocation2 + $0x18] sm:$0x3f] }
 0x139   : > { %1120 = vmatprep.subr.bf16.mxu0 %v5710_v1  ;;  %v1710_v44 = vrot.slane %v6189_v0, 6 }
 0x13c   : > { %1121 = vmatpush1.bf16.msra.mxu0 %v5464_v2  ;;  %v1539_v2 = vshrl.u32 %v1337_v47, 16 }
 0x13d   : > { %1122 = vmatprep.subr.bf16.mxu0 %v5710_v1 }
 0x13e   : > { %v1541_v8 = vrot.slane %v1539_v2, 5  ;;  %v5522_v2 = vld [vmem:[%s7216_s2 + $0x70] sm:$0xff]  }
 0x140   : > { %1123 = vmatpush1.bf16.msra.mxu0 %v5465_v3  ;;  %v1542_v3 = vshll.u32 %v1337_v47, 16  ;;  %v1711_v47 = vsel %vm1705_vm3, %v1709_v43, %v1710_v44 }
 0x141   : > { %1124 = vmatprep.subr.bf16.mxu0 %v5710_v1 }
 0x142   : > { %v1544_v9 = vrot.slane %v1542_v3, 6  ;;  %v5523_v3 = vld [vmem:[%s7216_s2 + $0x78] sm:$0xff]  }
 0x144   : > { %1125 = vmatpush1.bf16.msra.mxu0 %v5466_v4  ;;  %v1547_v4 = vshrl.u32 %v6189_v0, 16  ;;  %v1545_v15 = vor.u32 %v1544_v9, %v1541_v8  ;;  %v5528_v8 = vld [vmem:[%s7216_s2 + $0xa0] sm:$0xff]  }
 0x145   : > { %1126 = vmatprep.subr.bf16.mxu0 %v5710_v1  ;;  %v4827_v9 = vld [vmem:[%s7219_s5] ss:$0 sm:$0xff] }
 0x146   : > { %v1549_v10 = vrot.slane %v1547_v4, 5  ;;  %v5524_v4 = vld [vmem:[%s7216_s2 + $0x80] sm:$0xff]  }
 0x148   : > { %1127 = vmatpush1.bf16.msra.mxu0 %v5467_v5  ;;  %v1550_v5 = vshll.u32 %v6189_v0, 16  ;;  %v5521_v0 = vld [vmem:[%s7216_s2 + $0x68] sm:$0xff]  }
 0x149   : > { %1128 = vmatprep.subr.bf16.mxu0 %v5710_v1 }
 0x14a   : > { %v1552_v11 = vrot.slane %v1550_v5, 6  ;;  %v5525_v5 = vld [vmem:[%s7216_s2 + $0x88] sm:$0xff]  }
 0x14c   : > { %1129 = vmatpush1.bf16.msra.mxu0 %v5468_v6  ;;  %v5494_v6 = vld [vmem:[%s7215_s1 + $0x290] sm:$0xff]   ;;  %v1553_v16 = vor.u32 %v1552_v11, %v1549_v10  ;;  %v4828_v11 = vld [vmem:[%s7220_s6] ss:$0 sm:$0xff] }
 0x14d   : > { %1130 = vmatprep.subr.bf16.mxu0 %v5710_v1 }
 0x150   : > { %1131 = vmatpush1.bf16.msra.mxu0 %v5469_v7  ;;  %v1336_v7 = vld [vmem:[#allocation2] sm:$0xe0] }
 0x151   : > { %1132 = vmatprep.subr.bf16.mxu0 %v5710_v1 }
 0x154   : > { %1133 = vmatpush1.bf16.msra.mxu0 %v5470_v13  ;;  %v1368_v13 = vrot.slane %v1336_v7, 5 }
 0x155   : > { %1134 = vmatprep.subr.bf16.mxu0 %v5710_v1 }
 0x156   : > { %v1370_v18 = vsel %vm1367_vm15, %v1368_v13, %v1369_v14 }
 0x158   : > { %1135 = vmatpush1.bf16.msra.mxu0 %v5471_v19  ;;  %v1554_v19 = vsel %vm1520_vm2, %v1545_v15, %v1553_v16  ;;  %v5530_v16 = vld [vmem:[%s7216_s2 + $0xb0] sm:$0xff]  }
 0x159   : > { %1293 = vmatprep.subr.bf16.mxu0 %v5710_v1 }
 0x15b   : > { %1145 = vmatmul.mubr.bf16.vlgmr.msra.gmra.mrb[0].mxu0 %v1032_v26  ;;  %v5502_v26 = vld [vmem:[%s7215_s1 + $0x2d0] sm:$0xff]  }
 0x15c   : > { %1294 = vmatpush1.bf16.msra.mxu0 %v5472_v24  ;;  %4715 = vmatprep.mubr.msk.bf16.mxu0 %vm487_vm8, %v1216_v27  ;;  %v5501_v24 = vld [vmem:[%s7215_s1 + $0x2c8] sm:$0xff]   ;;  %v5503_v27 = vld [vmem:[%s7215_s1 + $0x2d8] sm:$0xff]  }
 0x15d   : > { %1295 = vmatprep.subr.bf16.mxu0 %v5710_v1 }
 0x160   : > { %1296 = vmatpush1.bf16.msra.mxu0 %v5473_v28  ;;  %v5504_v28 = vld [vmem:[%s7215_s1 + $0x2e0] sm:$0xff]  }
 0x161   : > { %1297 = vmatprep.subr.bf16.mxu0 %v5710_v1 }
 0x164   : > { %1298 = vmatpush1.bf16.msra.mxu0 %v5474_v29  ;;  %v6242_v29 = vld [vmem:[#allocation2 + $0x10] sm:$0x3f] }
 0x165   : > { %1299 = vmatprep.subr.bf16.mxu0 %v5710_v1 }
 0x168   : > { %1300 = vmatpush1.bf16.msra.mxu0 %v5475_v30  ;;  %v5505_v30 = vld [vmem:[%s7215_s1 + $0x2e8] sm:$0xff]  }
 0x169   : > { %1301 = vmatprep.subr.bf16.mxu0 %v5710_v1 }
 0x16c   : > { %1302 = vmatpush1.bf16.msra.mxu0 %v5476_v31  ;;  %v1522_v31 = vshrl.u32 %v1336_v7, 16 }
 0x16d   : > { %1303 = vmatprep.subr.bf16.mxu0 %v5710_v1 }
 0x16e   : > { %v1524_v35 = vrot.slane %v1522_v31, 5 }
 0x170   : > { %1304 = vmatpush1.bf16.msra.mxu0 %v5477_v32  ;;  %v1525_v32 = vshll.u32 %v1336_v7, 16  ;;  %v5527_v7 = vld [vmem:[%s7216_s2 + $0x98] sm:$0xff]  }
 0x171   : > { %1305 = vmatprep.subr.bf16.mxu0 %v5710_v1 }
 0x174   : > { %1306 = vmatpush1.bf16.msra.mxu0 %v5478_v33  ;;  %v1530_v33 = vshrl.u32 %v6242_v29, 16 }
 0x175   : > { %1307 = vmatprep.subr.bf16.mxu0 %v5710_v1 }
 0x176   : > { %v1532_v37 = vrot.slane %v1530_v33, 5 }
 0x178   : > { %1308 = vmatpush1.bf16.msra.mxu0 %v5479_v34  ;;  %v1533_v34 = vshll.u32 %v6242_v29, 16 }
 0x179   : > { %1309 = vmatprep.subr.bf16.mxu0 %v5710_v1 }
 0x17a   : > { %v1535_v38 = vrot.slane %v1533_v34, 6 }
 0x17c   : > { %1310 = vmatpush1.bf16.msra.mxu0 %v5480_v25  ;;  %v5506_v25 = vld [vmem:[%s7215_s1 + $0x2f0] sm:$0xff]   ;;  %v1536_v42 = vor.u32 %v1535_v38, %v1532_v37 }
 0x17d   : > { %1311 = vmatprep.subr.bf16.mxu0 %v5710_v1 }
 0x180   : > { %1312 = vmatpush1.bf16.msra.mxu0 %v5481_v36  ;;  %v1527_v36 = vrot.slane %v1525_v32, 6 }
 0x181   : > { %1313 = vmatprep.subr.bf16.mxu0 %v5710_v1 }
 0x184   : > { %1314 = vmatpush1.bf16.msra.mxu0 %v5482_v41  ;;  %v1528_v41 = vor.u32 %v1527_v36, %v1524_v35  ;;  %v5532_v36 = vld [vmem:[%s7216_s2] sm:$0xff]  }
 0x185   : > { %1315 = vmatprep.subr.bf16.mxu0 %v5710_v1 }
 0x188   : > { %1316 = vmatpush1.bf16.msra.mxu0 %v5483_v46  ;;  %v1537_v46 = vsel %vm1520_vm2, %v1528_v41, %v1536_v42 }
 0x189   : > { %1450 = vmatprep.subr.bf16.mxu0 %v5710_v1 }
 0x18b   : > { %1326 = vmatmul.mubr.bf16.vlgmr.msra.gmra.mrb[0].mxu0 %v1199_v53  ;;  %v5514_v53 = vld [vmem:[%s7215_s1 + $0x330] sm:$0xff]  }
 0x18c   : > { %1451 = vmatpush1.bf16.msra.mxu0 %v5484_v52  ;;  %4752 = vmatprep.mubr.msk.bf16.mxu0 %vm487_vm8, %v1373_v54  ;;  %v5513_v52 = vld [vmem:[%s7215_s1 + $0x328] sm:$0xff]   ;;  %v5515_v54 = vld [vmem:[%s7215_s1 + $0x338] sm:$0xff]  }
 0x18d   : > { %1452 = vmatprep.subr.bf16.mxu0 %v5710_v1 }
 0x190   : > { %1453 = vmatpush1.bf16.msra.mxu0 %v5485_v55  ;;  %v5516_v55 = vld [vmem:[%s7215_s1 + $0x340] sm:$0xff]  }
 0x191   : > { %1454 = vmatprep.subr.bf16.mxu0 %v5710_v1 }
 0x194   : > { %1455 = vmatpush1.bf16.msra.mxu0 %v5486_v56  ;;  %v5517_v56 = vld [vmem:[%s7215_s1 + $0x348] sm:$0xff]  }
 0x195   : > { %1456 = vmatprep.subr.bf16.mxu0 %v5710_v1 }
 0x198   : > { %1457 = vmatpush1.bf16.msra.mxu0 %v5487_v57  ;;  %v5518_v57 = vld [vmem:[%s7215_s1 + $0x350] sm:$0xff]  }
 0x199   : > { %1458 = vmatprep.subr.bf16.mxu0 %v5710_v1 }
 0x19c   : > { %1459 = vmatpush1.bf16.msra.mxu0 %v5488_v58  ;;  %v1674_v58 = vld [vmem:[#allocation2] sm:$0xc0] }
 0x19d   : > { %1460 = vmatprep.subr.bf16.mxu0 %v5710_v1 }
 0x1a0   : > { %1461 = vmatpush1.bf16.msra.mxu0 %v5489_v59  ;;  %v5519_v59 = vld [vmem:[%s7215_s1 + $0x358] sm:$0xff]  }
 0x1a1   : > { %1462 = vmatprep.subr.bf16.mxu0 %v5710_v1 }
 0x1a4   : > { %1463 = vmatpush1.bf16.msra.mxu0 %v5490_v60  ;;  %v1706_v60 = vrot.slane %v1674_v58, 6 }
 0x1a5   : > { %1464 = vmatprep.subr.bf16.mxu0 %v5710_v1 }
 0x1a8   : > { %1465 = vmatpush1.bf16.msra.mxu0 %v5491_v61  ;;  %v1707_v61 = vrot.slane %v6242_v29, 6 }
 0x1a9   : > { %1466 = vmatprep.subr.bf16.mxu0 %v5710_v1 }
 0x1ac   : > { %1467 = vmatpush1.bf16.msra.mxu0 %v5492_v62  ;;  %v1708_v62 = vsel %vm1705_vm3, %v1706_v60, %v1707_v61 }
 0x1ad   : > { %1468 = vmatprep.subr.bf16.mxu0 %v5710_v1 }
 0x1b0   : > { %1469 = vmatpush1.bf16.msra.mxu0 %v5493_v63  ;;  %v5520_v63 = vld [vmem:[%s7216_s2 + $0x60] sm:$0xff]  }
 0x1b1   : > { %1470 = vmatprep.subr.bf16.mxu0 %v5710_v1  ;;  %1999 = vmatpush1.bf16.msra.mxu1 %v5520_v63 }
 0x1b2   : > { %2000 = vmatprep.subr.bf16.mxu1 %v5710_v1 }
 0x1b4   : > { %1471 = vmatpush1.bf16.msra.mxu0 %v5494_v6  ;;  %v5526_v6 = vld [vmem:[%s7216_s2 + $0x90] sm:$0xff]  }
 0x1b5   : > { %1472 = vmatprep.subr.bf16.mxu0 %v5710_v1  ;;  %2001 = vmatpush1.bf16.msra.mxu1 %v5521_v0 }
 0x1b6   : > { %2002 = vmatprep.subr.bf16.mxu1 %v5710_v1 }
 0x1b8   : > { %1473 = vmatpush1.bf16.msra.mxu0 %v5495_v12  ;;  %v5529_v12 = vld [vmem:[%s7216_s2 + $0xa8] sm:$0xff]  }
 0x1b9   : > { %1631 = vmatprep.subr.bf16.mxu0 %v5710_v1  ;;  %2003 = vmatpush1.bf16.msra.mxu1 %v5522_v2 }
 0x1ba   : > { %2004 = vmatprep.subr.bf16.mxu1 %v5710_v1 }
 0x1bb   : > { %1483 = vmatmul.mubr.bf16.vlgmr.msra.gmra.mrb[0].mxu0 %v1370_v18 }
 0x1bc   : > { %1632 = vmatpush1.bf16.msra.mxu0 %v5496_v17  ;;  %4789 = vmatprep.mubr.msk.bf16.mxu0 %vm487_vm8, %v1554_v19 }
 0x1bd   : > { %1633 = vmatprep.subr.bf16.mxu0 %v5710_v1  ;;  %2005 = vmatpush1.bf16.msra.mxu1 %v5523_v3 }
 0x1be   : > { %2006 = vmatprep.subr.bf16.mxu1 %v5710_v1 }
 0x1c0   : > { %1634 = vmatpush1.bf16.msra.mxu0 %v5497_v20 }
 0x1c1   : > { %1635 = vmatprep.subr.bf16.mxu0 %v5710_v1  ;;  %2007 = vmatpush1.bf16.msra.mxu1 %v5524_v4 }
 0x1c2   : > { %2008 = vmatprep.subr.bf16.mxu1 %v5710_v1 }
 0x1c4   : > { %1636 = vmatpush1.bf16.msra.mxu0 %v5498_v21  ;;  %v5531_v21 = vld [vmem:[%s7216_s2 + $0xb8] sm:$0xff]  }
 0x1c5   : > { %1637 = vmatprep.subr.bf16.mxu0 %v5710_v1  ;;  %2009 = vmatpush1.bf16.msra.mxu1 %v5525_v5 }
 0x1c6   : > { %2010 = vmatprep.subr.bf16.mxu1 %v5710_v1 }
 0x1c8   : > { %1638 = vmatpush1.bf16.msra.mxu0 %v5499_v22 }
 0x1c9   : > { %1639 = vmatprep.subr.bf16.mxu0 %v5710_v1  ;;  %2011 = vmatpush1.bf16.msra.mxu1 %v5526_v6  ;;  %v5542_v6 = vld [vmem:[%s7216_s2 + $0x50] sm:$0xff]  }
 0x1ca   : > { %2012 = vmatprep.subr.bf16.mxu1 %v5710_v1 }
 0x1cc   : > { %1640 = vmatpush1.bf16.msra.mxu0 %v5500_v23 }
 0x1cd   : > { %1641 = vmatprep.subr.bf16.mxu0 %v5710_v1  ;;  %2013 = vmatpush1.bf16.msra.mxu1 %v5527_v7 }
 0x1ce   : > { %2014 = vmatprep.subr.bf16.mxu1 %v5710_v1 }
 0x1d0   : > { %1642 = vmatpush1.bf16.msra.mxu0 %v5501_v24 }
 0x1d1   : > { %1643 = vmatprep.subr.bf16.mxu0 %v5710_v1  ;;  %2015 = vmatpush1.bf16.msra.mxu1 %v5528_v8 }
 0x1d2   : > { %2016 = vmatprep.subr.bf16.mxu1 %v5710_v1 }
 0x1d4   : > { %1644 = vmatpush1.bf16.msra.mxu0 %v5502_v26 }
 0x1d5   : > { %1645 = vmatprep.subr.bf16.mxu0 %v5710_v1  ;;  %2017 = vmatpush1.bf16.msra.mxu1 %v5529_v12 }
 0x1d6   : > { %2018 = vmatprep.subr.bf16.mxu1 %v5710_v1 }
 0x1d8   : > { %1646 = vmatpush1.bf16.msra.mxu0 %v5503_v27 }
 0x1d9   : > { %1647 = vmatprep.subr.bf16.mxu0 %v5710_v1  ;;  %2019 = vmatpush1.bf16.msra.mxu1 %v5530_v16 }
 0x1da   : > { %2020 = vmatprep.subr.bf16.mxu1 %v5710_v1 }
 0x1dc   : > { %1648 = vmatpush1.bf16.msra.mxu0 %v5504_v28 }
 0x1dd   : > { %1649 = vmatprep.subr.bf16.mxu0 %v5710_v1  ;;  %2021 = vmatpush1.bf16.msra.mxu1 %v5531_v21 }
 0x1de   : > { %2149 = vmatprep.subr.bf16.mxu1 %v5710_v1 }
 0x1e0   : > { %1650 = vmatpush1.bf16.msra.mxu0 %v5505_v30 }
 0x1e1   : > { %1651 = vmatprep.subr.bf16.mxu0 %v5710_v1 }
 0x1e4   : > { %1652 = vmatpush1.bf16.msra.mxu0 %v5506_v25 }
 0x1e5   : > { %1653 = vmatprep.subr.bf16.mxu0 %v5710_v1 }
 0x1e8   : > { %1654 = vmatpush1.bf16.msra.mxu0 %v5507_v39 }
 0x1e9   : > { %1788 = vmatprep.subr.bf16.mxu0 %v5710_v1 }
 0x1eb   : > { %1664 = vmatmul.mubr.bf16.vlgmr.msra.gmra.mrb[0].mxu0 %v1537_v46 }
 0x1ec   : > { %1789 = vmatpush1.bf16.msra.mxu0 %v5508_v45  ;;  %4826 = vmatprep.mubr.msk.bf16.mxu0 %vm487_vm8, %v1711_v47 }
 0x1ed   : > { %1790 = vmatprep.subr.bf16.mxu0 %v5710_v1 }
 0x1f0   : > { %1791 = vmatpush1.bf16.msra.mxu0 %v5509_v48  ;;  %v5533_v48 = vld [vmem:[%s7216_s2 + $0x8] sm:$0xff]  }
 0x1f1   : > { %1792 = vmatprep.subr.bf16.mxu0 %v5710_v1 }
 0x1f4   : > { %1793 = vmatpush1.bf16.msra.mxu0 %v5510_v49 }
 0x1f5   : > { %1794 = vmatprep.subr.bf16.mxu0 %v5710_v1 }
 0x1f8   : > { %1795 = vmatpush1.bf16.msra.mxu0 %v5511_v50 }
 0x1f9   : > { %1796 = vmatprep.subr.bf16.mxu0 %v5710_v1 }
 0x1fc   : > { %1797 = vmatpush1.bf16.msra.mxu0 %v5512_v51  ;;  %v5534_v51 = vld [vmem:[%s7216_s2 + $0x10] sm:$0xff]  }
 0x1fd   : > { %1798 = vmatprep.subr.bf16.mxu0 %v5710_v1 }
 0x200   : > { %1799 = vmatpush1.bf16.msra.mxu0 %v5513_v52  ;;  %v5535_v52 = vld [vmem:[%s7216_s2 + $0x18] sm:$0xff]  }
 0x201   : > { %1800 = vmatprep.subr.bf16.mxu0 %v5710_v1 }
 0x204   : > { %1801 = vmatpush1.bf16.msra.mxu0 %v5514_v53  ;;  %v5536_v53 = vld [vmem:[%s7216_s2 + $0x20] sm:$0xff]  }
 0x205   : > { %1802 = vmatprep.subr.bf16.mxu0 %v5710_v1 }
 0x208   : > { %1803 = vmatpush1.bf16.msra.mxu0 %v5515_v54  ;;  %v5537_v54 = vld [vmem:[%s7216_s2 + $0x28] sm:$0xff]  }
 0x209   : > { %1804 = vmatprep.subr.bf16.mxu0 %v5710_v1 }
 0x20c   : > { %1805 = vmatpush1.bf16.msra.mxu0 %v5516_v55  ;;  %v5538_v55 = vld [vmem:[%s7216_s2 + $0x30] sm:$0xff]  }
 0x20d   : > { %1806 = vmatprep.subr.bf16.mxu0 %v5710_v1 }
 0x210   : > { %1807 = vmatpush1.bf16.msra.mxu0 %v5517_v56  ;;  %v5539_v56 = vld [vmem:[%s7216_s2 + $0x38] sm:$0xff]  }
 0x211   : > { %1808 = vmatprep.subr.bf16.mxu0 %v5710_v1 }
 0x214   : > { %1809 = vmatpush1.bf16.msra.mxu0 %v5518_v57  ;;  %v5540_v57 = vld [vmem:[%s7216_s2 + $0x40] sm:$0xff]  }
 0x215   : > { %1810 = vmatprep.subr.bf16.mxu0 %v5710_v1 }
 0x218   : > { %1811 = vmatpush1.bf16.msra.mxu0 %v5519_v59  ;;  %v5541_v59 = vld [vmem:[%s7216_s2 + $0x48] sm:$0xff]  }
 0x219   : > { %4062 = vmatprep.subr.bf16.mxu0 %v5710_v1 }
 0x21b   : > { %1821 = vmatmul.mubr.bf16.vlgmr.msra.gmra.mrb[0].mxu0 %v1708_v62 }
 0x2ee   : > { %v1822_v10 = vpop.f32.mrb[0].mxu0 }
 0x2ef   : > { %v1837_v13 = vmul.f32 %v4827_v9, %v1822_v10  ;;  %v1824_v14 = vpop.f32.mrb[1].mxu0 }
 0x2f0   : > { %v1825_v15 = vpop.f32.mrb[2].mxu0 }
 0x2f1   : > { %v1843_v17 = vadd.f32 %v4828_v11, %v1837_v13  ;;  %v1838_v18 = vmul.f32 %v4827_v9, %v1825_v15  ;;  %v1827_v19 = vpop.f32.mrb[3].mxu0  ;;  %v5543_v15 = vld [vmem:[%s7216_s2 + $0x58] sm:$0xff]  }
 0x2f3   : > { %v1844_v20 = vadd.f32 %v4828_v11, %v1838_v18  ;;  %v1845_v22 = vmax.f32 %v1843_v17, 0.0 }
 0x2f5   : > { %v1846_v23 = vmax.f32 %v1844_v20, 0.0  ;;  %v5544_v20 = vld [vmem:[%s7216_s2 + $0xc0] sm:$0xff]  }
 0x2f7   : > { %v1847_v24 = vpack.c.bf16 %v1846_v23, %v1845_v22  ;;  %v5545_v23 = vld [vmem:[%s7216_s2 + $0xc8] sm:$0xff]  }
 0x2f9   : > { %v1849_v26 = vrot.slane %v1847_v24, 4  ;;  %v5546_v24 = vld [vmem:[%s7216_s2 + $0xd0] sm:$0xff]  }
 0x2fb   : > { %1850 = vrot.lane.b32.xlu0 %v1849_v26, %s5711_s15  ;;  %v5547_v26 = vld [vmem:[%s7216_s2 + $0xd8] sm:$0xff]  }
 0x36d   : > { %v1851_v27 = vpop.permute.xlu0 %1850 }
 0x36e   : > { %1853 = vst.msk [vmem:[#allocation3] sm:$0xf0] %vm318_vm6, %v1851_v27 }
 0x36f   : > { %1854 = vst.msk [vmem:[#allocation3 + $0x8] sm:$0xf0] %vm286_vm0, %v1851_v27 }
 0x370   : > { %1855 = vst.msk [vmem:[#allocation3 + $0x10] sm:$0xf] %vm321_vm7, %v1851_v27 }
 0x371   : > { %1856 = vst.msk [vmem:[#allocation3 + $0x18] sm:$0xf] %vm288_vm1, %v1851_v27  ;;  %v5548_v27 = vld [vmem:[%s7216_s2 + $0xe0] sm:$0xff]  }
 0x375   : > { %v6377_v33 = vld [vmem:[#allocation3] sm:$0xf8] }
 0x376   : > { %v6372_v29 = vld [vmem:[#allocation3 + $0x8] sm:$0xf8]  ;;  %v1916_v35 = vrot.slane %v6377_v33, 3  ;;  %v1857_v58 = vld [vmem:[#allocation3] sm:$0xfc] }
 0x377   : > { %v6374_v30 = vld [vmem:[#allocation3 + $0x10] sm:$0x7]  ;;  %v1919_v31 = vrot.slane %v6372_v29, 3  ;;  %v1858_v37 = vld [vmem:[#allocation3 + $0x8] sm:$0xfc]  ;;  %v2040_v61 = vshrl.u32 %v1857_v58, 16 }
 0x378   : > { %v1860_v28 = vld [vmem:[#allocation3 + $0x18] sm:$0x7]  ;;  %v1917_v34 = vrot.slane %v6374_v30, 3  ;;  %v2057_v40 = vshrl.u32 %v1858_v37, 16  ;;  %v2060_v41 = vshll.u32 %v1858_v37, 16  ;;  %v2043_v62 = vshll.u32 %v1857_v58, 16 }
 0x379   : > { %v1920_v32 = vrot.slane %v1860_v28, 3  ;;  %v2065_v25 = vshrl.u32 %v1860_v28, 16  ;;  %v2068_v38 = vshll.u32 %v1860_v28, 16  ;;  %v6424_v60 = vld [vmem:[#allocation3 + $0x18] sm:$0xf]  ;;  %v2048_v63 = vshrl.u32 %v6374_v30, 16 }
 0x37a   : > { %v1918_v43 = vsel %vm691_vm11, %v1916_v35, %v1917_v34  ;;  %v2059_v45 = vrot.slane %v2057_v40, 2  ;;  %v2062_v46 = vrot.slane %v2060_v41, 3  ;;  %v2051_v0 = vshll.u32 %v6374_v30, 16  ;;  %v5549_v28 = vld [vmem:[%s7216_s2 + $0xe8] sm:$0xff]   ;;  %v5551_v30 = vld [vmem:[%s7216_s2 + $0xf8] sm:$0xff]   ;;  %v5564_v58 = vld [vmem:[%s7216_s2 + $0x160] sm:$0xff]  }
 0x37b   : > { %v1921_v39 = vsel %vm691_vm11, %v1919_v31, %v1920_v32  ;;  %v2067_v42 = vrot.slane %v2065_v25, 2  ;;  %v2070_v44 = vrot.slane %v2068_v38, 3  ;;  %v2235_v2 = vshrl.u32 %v6372_v29, 16  ;;  %v5552_v31 = vld [vmem:[%s7216_s2 + $0x100] sm:$0xff]   ;;  %v6480_v32 = vld [vmem:[#allocation3 + $0x10] sm:$0xf] }
 0x37c   : > { %4865 = vmatprep.mubr.msk.bf16.mxu1 %vm487_vm8, %v1921_v39  ;;  %v2063_v49 = vor.u32 %v2062_v46, %v2059_v45  ;;  %v2238_v3 = vshll.u32 %v6372_v29, 16  ;;  %v2243_v4 = vshrl.u32 %v6424_v60, 16  ;;  %v2246_v5 = vshll.u32 %v6424_v60, 16  ;;  %v5550_v29 = vld [vmem:[%s7216_s2 + $0xf0] sm:$0xff]   ;;  %v5553_v34 = vld [vmem:[%s7216_s2 + $0x108] sm:$0xff]  }
 0x37d   : > { %2031 = vmatmul.mubr.bf16.vlgmr.msra.gmra.mrb[0].mxu1 %v1918_v43  ;;  %v2071_v47 = vor.u32 %v2070_v44, %v2067_v42  ;;  %v2042_v7 = vrot.slane %v2040_v61, 2  ;;  %v2045_v8 = vrot.slane %v2043_v62, 3  ;;  %v2050_v9 = vrot.slane %v2048_v63, 2  ;;  %v5554_v38 = vld [vmem:[%s7216_s2 + $0x110] sm:$0xff]   ;;  %v2371_v43 = vld [vmem:[#allocation3 + $0x8] sm:$0xf0] }
 0x37e   : > { %2150 = vmatpush1.bf16.msra.mxu1 %v5532_v36  ;;  %v2053_v10 = vrot.slane %v2051_v0, 3  ;;  %v2237_v11 = vrot.slane %v2235_v2, 3  ;;  %v2240_v12 = vrot.slane %v2238_v3, 4  ;;  %v2245_v13 = vrot.slane %v2243_v4, 3  ;;  %v5566_v2 = vld [vmem:[%s7216_s2 + $0x170] sm:$0xff]  }
 0x37f   : > { %2151 = vmatprep.subr.bf16.mxu1 %v5710_v1  ;;  %v2072_v50 = vsel %vm379_vm9, %v2063_v49, %v2071_v47  ;;  %v2248_v14 = vrot.slane %v2246_v5, 4  ;;  %v2046_v16 = vor.u32 %v2045_v8, %v2042_v7  ;;  %v2218_v25 = vshrl.u32 %v6377_v33, 16  ;;  %v2370_v3 = vld [vmem:[#allocation3] sm:$0xf0]  ;;  %v5567_v8 = vld [vmem:[%s7216_s2 + $0x178] sm:$0xff]  }
 0x380   : > { %4878 = vmatprep.mubr.msk.bf16.mxu1 %vm487_vm8, %v2072_v50  ;;  %v2054_v17 = vor.u32 %v2053_v10, %v2050_v9  ;;  %v2241_v18 = vor.u32 %v2240_v12, %v2237_v11  ;;  %v2221_v35 = vshll.u32 %v6377_v33, 16  ;;  %v2226_v36 = vshrl.u32 %v6480_v32, 16  ;;  %v5555_v33 = vld [vmem:[%s7216_s2 + $0x118] sm:$0xff]  }
 0x381   : > { %v2249_v19 = vor.u32 %v2248_v14, %v2245_v13  ;;  %v2229_v37 = vshll.u32 %v6480_v32, 16  ;;  %v2220_v39 = vrot.slane %v2218_v25, 3  ;;  %v2404_v46 = vrot.slane %v2371_v43, 4  ;;  %v5568_v13 = vld [vmem:[%s7216_s2 + $0x180] sm:$0xff]  }
 0x382   : > { %2152 = vmatpush1.bf16.msra.mxu1 %v5533_v48  ;;  %v2055_v21 = vsel %vm379_vm9, %v2046_v16, %v2054_v17  ;;  %v2223_v40 = vrot.slane %v2221_v35, 4  ;;  %v2228_v41 = vrot.slane %v2226_v36, 3  ;;  %v2405_v47 = vrot.slane %v6424_v60, 4  ;;  %v5556_v48 = vld [vmem:[%s7216_s2 + $0x120] sm:$0xff]   ;;  %v6541_v60 = vld [vmem:[#allocation3 + $0x18] sm:$0x1f] }
 0x383   : > { %2153 = vmatprep.subr.bf16.mxu1 %v5710_v1  ;;  %v2250_v22 = vsel %vm844_vm12, %v2241_v18, %v2249_v19  ;;  %v2231_v42 = vrot.slane %v2229_v37, 4  ;;  %v2571_v61 = vshrl.u32 %v2371_v43, 16  ;;  %v2574_v62 = vshll.u32 %v2371_v43, 16  ;;  %v5569_v16 = vld [vmem:[%s7216_s2 + $0x188] sm:$0xff]   ;;  %v5570_v17 = vld [vmem:[%s7216_s2 + $0x190] sm:$0xff]   ;;  %v5571_v18 = vld [vmem:[%s7216_s2 + $0x198] sm:$0xff]  }
 0x384   : > { %v2224_v44 = vor.u32 %v2223_v40, %v2220_v39  ;;  %v2406_v50 = vsel %vm1029_vm13, %v2404_v46, %v2405_v47  ;;  %v2579_v63 = vshrl.u32 %v6541_v60, 16  ;;  %v2582_v0 = vshll.u32 %v6541_v60, 16  ;;  %v5572_v19 = vld [vmem:[%s7216_s2 + $0x1a0] sm:$0xff]   ;;  %v5579_v36 = vld [vmem:[%s7216_s2 + $0x1d8] sm:$0xff]   ;;  %v2707_v37 = vld [vmem:[#allocation3 + $0x8] sm:$0xe0] }
 0x385   : > { %v2232_v45 = vor.u32 %v2231_v42, %v2228_v41  ;;  %v2573_v4 = vrot.slane %v2571_v61, 4  ;;  %v2576_v5 = vrot.slane %v2574_v62, 5  ;;  %v2401_v9 = vrot.slane %v2370_v3, 4  ;;  %v5580_v42 = vld [vmem:[%s7216_s2 + $0x1e0] sm:$0xff]   ;;  %v5583_v46 = vld [vmem:[%s7216_s2 + $0x1f8] sm:$0xff]  }
 0x386   : > { %2154 = vmatpush1.bf16.msra.mxu1 %v5534_v51  ;;  %v5557_v51 = vld [vmem:[%s7216_s2 + $0x128] sm:$0xff]   ;;  %v2584_v7 = vrot.slane %v2582_v0, 5  ;;  %v2402_v10 = vrot.slane %v6480_v32, 4  ;;  %v2740_v40 = vrot.slane %v2707_v37, 5  ;;  %v2741_v41 = vrot.slane %v6541_v60, 5  ;;  %v5584_v47 = vld [vmem:[%s7216_s2 + $0x200] sm:$0xff]  }
 0x387   : > { %2155 = vmatprep.subr.bf16.mxu1 %v5710_v1  ;;  %v2233_v49 = vsel %vm844_vm12, %v2224_v44, %v2232_v45  ;;  %v2577_v11 = vor.u32 %v2576_v5, %v2573_v4  ;;  %v5581_v44 = vld [vmem:[%s7216_s2 + $0x1e8] sm:$0xff]   ;;  %v5582_v45 = vld [vmem:[%s7216_s2 + $0x1f0] sm:$0xff]   ;;  %v5591_v0 = vld [vmem:[%s7216_s2 + $0x238] sm:$0xff]  }
 0x388   : > { %v2403_v14 = vsel %vm1029_vm13, %v2401_v9, %v2402_v10  ;;  %v2742_v43 = vsel %vm1367_vm15, %v2740_v40, %v2741_v41  ;;  %v5593_v9 = vld [vmem:[%s7216_s2 + $0x248] sm:$0xff]   ;;  %v5594_v10 = vld [vmem:[%s7216_s2 + $0x250] sm:$0xff]   ;;  %v5611_v40 = vld [vmem:[%s7217_s3 + $0x98] sm:$0xff]  }
 0x389   : > { %v5064_v41 = vld [vmem:[%s7219_s5 + $0x1] ss:$0 sm:$0xff] }
 0x38a   : > { %2156 = vmatpush1.bf16.msra.mxu1 %v5535_v52  ;;  %v5558_v52 = vld [vmem:[%s7216_s2 + $0x130] sm:$0xff]  }
 0x38b   : > { %2157 = vmatprep.subr.bf16.mxu1 %v5710_v1 }
 0x38e   : > { %2158 = vmatpush1.bf16.msra.mxu1 %v5536_v53  ;;  %v5559_v53 = vld [vmem:[%s7216_s2 + $0x138] sm:$0xff]  }
 0x38f   : > { %2159 = vmatprep.subr.bf16.mxu1 %v5710_v1 }
 0x392   : > { %2160 = vmatpush1.bf16.msra.mxu1 %v5537_v54  ;;  %v5560_v54 = vld [vmem:[%s7216_s2 + $0x140] sm:$0xff]  }
 0x393   : > { %2161 = vmatprep.subr.bf16.mxu1 %v5710_v1 }
 0x396   : > { %2162 = vmatpush1.bf16.msra.mxu1 %v5538_v55  ;;  %v5561_v55 = vld [vmem:[%s7216_s2 + $0x148] sm:$0xff]  }
 0x397   : > { %2163 = vmatprep.subr.bf16.mxu1 %v5710_v1 }
 0x39a   : > { %2164 = vmatpush1.bf16.msra.mxu1 %v5539_v56  ;;  %v5562_v56 = vld [vmem:[%s7216_s2 + $0x150] sm:$0xff]  }
 0x39b   : > { %2165 = vmatprep.subr.bf16.mxu1 %v5710_v1 }
 0x39e   : > { %2166 = vmatpush1.bf16.msra.mxu1 %v5540_v57  ;;  %v5563_v57 = vld [vmem:[%s7216_s2 + $0x158] sm:$0xff]  }
 0x39f   : > { %2167 = vmatprep.subr.bf16.mxu1 %v5710_v1 }
 0x3a2   : > { %2168 = vmatpush1.bf16.msra.mxu1 %v5541_v59  ;;  %v5565_v59 = vld [vmem:[%s7216_s2 + $0x168] sm:$0xff]  }
 0x3a3   : > { %2169 = vmatprep.subr.bf16.mxu1 %v5710_v1 }
 0x3a6   : > { %2170 = vmatpush1.bf16.msra.mxu1 %v5542_v6  ;;  %v2581_v6 = vrot.slane %v2579_v63, 4 }
 0x3a7   : > { %2171 = vmatprep.subr.bf16.mxu1 %v5710_v1 }
 0x3a8   : > { %v2585_v12 = vor.u32 %v2584_v7, %v2581_v6  ;;  %v5592_v6 = vld [vmem:[%s7216_s2 + $0x240] sm:$0xff]  }
 0x3aa   : > { %2172 = vmatpush1.bf16.msra.mxu1 %v5543_v15  ;;  %v2586_v15 = vsel %vm1182_vm14, %v2577_v11, %v2585_v12  ;;  %v5595_v11 = vld [vmem:[%s7216_s2 + $0x258] sm:$0xff]   ;;  %v5596_v12 = vld [vmem:[%s7216_s2 + $0x260] sm:$0xff]  }
 0x3ab   : > { %2327 = vmatprep.subr.bf16.mxu1 %v5710_v1 }
 0x3ad   : > { %2182 = vmatmul.mubr.bf16.vlgmr.msra.gmra.mrb[0].mxu1 %v2055_v21  ;;  %v5574_v21 = vld [vmem:[%s7216_s2 + $0x1b0] sm:$0xff]  }
 0x3ae   : > { %2328 = vmatpush1.bf16.msra.mxu1 %v5544_v20  ;;  %4915 = vmatprep.mubr.msk.bf16.mxu1 %vm487_vm8, %v2250_v22  ;;  %v5573_v20 = vld [vmem:[%s7216_s2 + $0x1a8] sm:$0xff]   ;;  %v5575_v22 = vld [vmem:[%s7216_s2 + $0x1b8] sm:$0xff]  }
 0x3af   : > { %2329 = vmatprep.subr.bf16.mxu1 %v5710_v1 }
 0x3b2   : > { %2330 = vmatpush1.bf16.msra.mxu1 %v5545_v23  ;;  %v5576_v23 = vld [vmem:[%s7216_s2 + $0x1c0] sm:$0xff]  }
 0x3b3   : > { %2331 = vmatprep.subr.bf16.mxu1 %v5710_v1 }
 0x3b6   : > { %2332 = vmatpush1.bf16.msra.mxu1 %v5546_v24  ;;  %v6594_v24 = vld [vmem:[#allocation3 + $0x10] sm:$0x1f] }
 0x3b7   : > { %2333 = vmatprep.subr.bf16.mxu1 %v5710_v1 }
 0x3ba   : > { %2334 = vmatpush1.bf16.msra.mxu1 %v5547_v26  ;;  %v5577_v26 = vld [vmem:[%s7216_s2 + $0x1c8] sm:$0xff]  }
 0x3bb   : > { %2335 = vmatprep.subr.bf16.mxu1 %v5710_v1 }
 0x3be   : > { %2336 = vmatpush1.bf16.msra.mxu1 %v5548_v27  ;;  %v2554_v27 = vshrl.u32 %v2370_v3, 16 }
 0x3bf   : > { %2337 = vmatprep.subr.bf16.mxu1 %v5710_v1 }
 0x3c0   : > { %v2556_v32 = vrot.slane %v2554_v27, 4 }
 0x3c2   : > { %2338 = vmatpush1.bf16.msra.mxu1 %v5549_v28  ;;  %v2557_v28 = vshll.u32 %v2370_v3, 16  ;;  %v2738_v3 = vrot.slane %v6594_v24, 5 }
 0x3c3   : > { %2339 = vmatprep.subr.bf16.mxu1 %v5710_v1 }
 0x3c6   : > { %2340 = vmatpush1.bf16.msra.mxu1 %v5550_v29  ;;  %v2562_v29 = vshrl.u32 %v6594_v24, 16 }
 0x3c7   : > { %2341 = vmatprep.subr.bf16.mxu1 %v5710_v1 }
 0x3c8   : > { %v2564_v25 = vrot.slane %v2562_v29, 4  ;;  %v5603_v29 = vld [vmem:[%s7216_s2 + $0x298] sm:$0xff]  }
 0x3ca   : > { %2342 = vmatpush1.bf16.msra.mxu1 %v5551_v30  ;;  %v2565_v30 = vshll.u32 %v6594_v24, 16 }
 0x3cb   : > { %2343 = vmatprep.subr.bf16.mxu1 %v5710_v1 }
 0x3cc   : > { %v2567_v35 = vrot.slane %v2565_v30, 5 }
 0x3ce   : > { %2344 = vmatpush1.bf16.msra.mxu1 %v5552_v31  ;;  %v5578_v31 = vld [vmem:[%s7216_s2 + $0x1d0] sm:$0xff]   ;;  %v2568_v39 = vor.u32 %v2567_v35, %v2564_v25  ;;  %v5605_v25 = vld [vmem:[%s7217_s3 + $0x68] sm:$0xff]  }
 0x3cf   : > { %2345 = vmatprep.subr.bf16.mxu1 %v5710_v1  ;;  %v5606_v35 = vld [vmem:[%s7217_s3 + $0x70] sm:$0xff]  }
 0x3d2   : > { %2346 = vmatpush1.bf16.msra.mxu1 %v5553_v34  ;;  %v2559_v34 = vrot.slane %v2557_v28, 5 }
 0x3d3   : > { %2347 = vmatprep.subr.bf16.mxu1 %v5710_v1 }
 0x3d6   : > { %2348 = vmatpush1.bf16.msra.mxu1 %v5554_v38  ;;  %v2560_v38 = vor.u32 %v2559_v34, %v2556_v32  ;;  %v5604_v34 = vld [vmem:[%s7217_s3 + $0x60] sm:$0xff]  }
 0x3d7   : > { %2349 = vmatprep.subr.bf16.mxu1 %v5710_v1 }
 0x3da   : > { %2350 = vmatpush1.bf16.msra.mxu1 %v5555_v33  ;;  %v2569_v33 = vsel %vm1182_vm14, %v2560_v38, %v2568_v39  ;;  %v5609_v38 = vld [vmem:[%s7217_s3 + $0x88] sm:$0xff]   ;;  %v5610_v39 = vld [vmem:[%s7217_s3 + $0x90] sm:$0xff]  }
 0x3db   : > { %2483 = vmatprep.subr.bf16.mxu1 %v5710_v1 }
 0x3dd   : > { %2360 = vmatmul.mubr.bf16.vlgmr.msra.gmra.mrb[0].mxu1 %v2233_v49  ;;  %v5586_v49 = vld [vmem:[%s7216_s2 + $0x210] sm:$0xff]  }
 0x3de   : > { %2484 = vmatpush1.bf16.msra.mxu1 %v5556_v48  ;;  %4952 = vmatprep.mubr.msk.bf16.mxu1 %vm487_vm8, %v2406_v50  ;;  %v5585_v48 = vld [vmem:[%s7216_s2 + $0x208] sm:$0xff]   ;;  %v5587_v50 = vld [vmem:[%s7216_s2 + $0x218] sm:$0xff]  }
 0x3df   : > { %2485 = vmatprep.subr.bf16.mxu1 %v5710_v1 }
 0x3e2   : > { %2486 = vmatpush1.bf16.msra.mxu1 %v5557_v51  ;;  %v5588_v51 = vld [vmem:[%s7216_s2 + $0x220] sm:$0xff]  }
 0x3e3   : > { %2487 = vmatprep.subr.bf16.mxu1 %v5710_v1 }
 0x3e6   : > { %2488 = vmatpush1.bf16.msra.mxu1 %v5558_v52  ;;  %v5589_v52 = vld [vmem:[%s7216_s2 + $0x228] sm:$0xff]  }
 0x3e7   : > { %2489 = vmatprep.subr.bf16.mxu1 %v5710_v1 }
 0x3ea   : > { %2490 = vmatpush1.bf16.msra.mxu1 %v5559_v53  ;;  %v2863_v53 = vld [vmem:[#allocation3 + $0x18] sm:$0x3f] }
 0x3eb   : > { %2491 = vmatprep.subr.bf16.mxu1 %v5710_v1 }
 0x3ee   : > { %2492 = vmatpush1.bf16.msra.mxu1 %v5560_v54  ;;  %v2907_v54 = vshrl.u32 %v2707_v37, 16 }
 0x3ef   : > { %2493 = vmatprep.subr.bf16.mxu1 %v5710_v1 }
 0x3f0   : > { %v2909_v60 = vrot.slane %v2907_v54, 5  ;;  %v5701_v54 = vld [vmem:[%s5789_s10 + $0x8] sm:$0xff] }
 0x3f2   : > { %2494 = vmatpush1.bf16.msra.mxu1 %v5561_v55  ;;  %v2910_v55 = vshll.u32 %v2707_v37, 16  ;;  %v5608_v37 = vld [vmem:[%s7217_s3 + $0x80] sm:$0xff]  }
 0x3f3   : > { %2495 = vmatprep.subr.bf16.mxu1 %v5710_v1 }
 0x3f4   : > { %v2912_v61 = vrot.slane %v2910_v55, 6 }
 0x3f6   : > { %2496 = vmatpush1.bf16.msra.mxu1 %v5562_v56  ;;  %v2915_v56 = vshrl.u32 %v2863_v53, 16  ;;  %v2913_v4 = vor.u32 %v2912_v61, %v2909_v60  ;;  %v5615_v60 = vld [vmem:[%s7217_s3 + $0xb8] sm:$0xff]  }
 0x3f7   : > { %2497 = vmatprep.subr.bf16.mxu1 %v5710_v1 }
 0x3f8   : > { %v2917_v62 = vrot.slane %v2915_v56, 5  ;;  %v5614_v56 = vld [vmem:[%s7217_s3 + $0xb0] sm:$0xff]  }
 0x3fa   : > { %2498 = vmatpush1.bf16.msra.mxu1 %v5563_v57  ;;  %v2918_v57 = vshll.u32 %v2863_v53, 16 }
 0x3fb   : > { %2499 = vmatprep.subr.bf16.mxu1 %v5710_v1 }
 0x3fc   : > { %v2920_v63 = vrot.slane %v2918_v57, 6 }
 0x3fe   : > { %2500 = vmatpush1.bf16.msra.mxu1 %v5564_v58  ;;  %v5590_v58 = vld [vmem:[%s7216_s2 + $0x230] sm:$0xff]   ;;  %v2921_v5 = vor.u32 %v2920_v63, %v2917_v62 }
 0x3ff   : > { %2501 = vmatprep.subr.bf16.mxu1 %v5710_v1 }
 0x402   : > { %2502 = vmatpush1.bf16.msra.mxu1 %v5565_v59  ;;  %v2706_v59 = vld [vmem:[#allocation3] sm:$0xe0] }
 0x403   : > { %2503 = vmatprep.subr.bf16.mxu1 %v5710_v1 }
 0x406   : > { %2504 = vmatpush1.bf16.msra.mxu1 %v5566_v2  ;;  %v2737_v2 = vrot.slane %v2706_v59, 5 }
 0x407   : > { %2505 = vmatprep.subr.bf16.mxu1 %v5710_v1 }
 0x408   : > { %v2739_v7 = vsel %vm1367_vm15, %v2737_v2, %v2738_v3 }
 0x40a   : > { %2506 = vmatpush1.bf16.msra.mxu1 %v5567_v8  ;;  %v2922_v8 = vsel %vm1520_vm2, %v2913_v4, %v2921_v5 }
 0x40b   : > { %2663 = vmatprep.subr.bf16.mxu1 %v5710_v1 }
 0x40d   : > { %2516 = vmatmul.mubr.bf16.vlgmr.msra.gmra.mrb[0].mxu1 %v2403_v14  ;;  %v5598_v14 = vld [vmem:[%s7216_s2 + $0x270] sm:$0xff]  }
 0x40e   : > { %2664 = vmatpush1.bf16.msra.mxu1 %v5568_v13  ;;  %4989 = vmatprep.mubr.msk.bf16.mxu1 %vm487_vm8, %v2586_v15  ;;  %v5597_v13 = vld [vmem:[%s7216_s2 + $0x268] sm:$0xff]   ;;  %v5599_v15 = vld [vmem:[%s7216_s2 + $0x278] sm:$0xff]  }
 0x40f   : > { %2665 = vmatprep.subr.bf16.mxu1 %v5710_v1 }
 0x412   : > { %2666 = vmatpush1.bf16.msra.mxu1 %v5569_v16  ;;  %v5600_v16 = vld [vmem:[%s7216_s2 + $0x280] sm:$0xff]  }
 0x413   : > { %2667 = vmatprep.subr.bf16.mxu1 %v5710_v1 }
 0x416   : > { %2668 = vmatpush1.bf16.msra.mxu1 %v5570_v17  ;;  %v2862_v17 = vld [vmem:[#allocation3 + $0x10] sm:$0x3f] }
 0x417   : > { %2669 = vmatprep.subr.bf16.mxu1 %v5710_v1 }
 0x41a   : > { %2670 = vmatpush1.bf16.msra.mxu1 %v5571_v18  ;;  %v5601_v18 = vld [vmem:[%s7216_s2 + $0x288] sm:$0xff]  }
 0x41b   : > { %2671 = vmatprep.subr.bf16.mxu1 %v5710_v1 }
 0x41e   : > { %2672 = vmatpush1.bf16.msra.mxu1 %v5572_v19  ;;  %v2890_v19 = vshrl.u32 %v2706_v59, 16 }
 0x41f   : > { %2673 = vmatprep.subr.bf16.mxu1 %v5710_v1 }
 0x420   : > { %v2892_v24 = vrot.slane %v2890_v19, 5 }
 0x422   : > { %2674 = vmatpush1.bf16.msra.mxu1 %v5573_v20  ;;  %v2893_v20 = vshll.u32 %v2706_v59, 16 }
 0x423   : > { %2675 = vmatprep.subr.bf16.mxu1 %v5710_v1 }
 0x426   : > { %2676 = vmatpush1.bf16.msra.mxu1 %v5574_v21  ;;  %v2898_v21 = vshrl.u32 %v2862_v17, 16 }
 0x427   : > { %2677 = vmatprep.subr.bf16.mxu1 %v5710_v1 }
 0x428   : > { %v2900_v27 = vrot.slane %v2898_v21, 5 }
 0x42a   : > { %2678 = vmatpush1.bf16.msra.mxu1 %v5575_v22  ;;  %v2901_v22 = vshll.u32 %v2862_v17, 16 }
 0x42b   : > { %2679 = vmatprep.subr.bf16.mxu1 %v5710_v1 }
 0x42c   : > { %v2903_v28 = vrot.slane %v2901_v22, 6 }
 0x42e   : > { %2680 = vmatpush1.bf16.msra.mxu1 %v5576_v23  ;;  %v5602_v23 = vld [vmem:[%s7216_s2 + $0x290] sm:$0xff]  }
 0x42f   : > { %2681 = vmatprep.subr.bf16.mxu1 %v5710_v1 }
 0x432   : > { %2682 = vmatpush1.bf16.msra.mxu1 %v5577_v26  ;;  %v2895_v26 = vrot.slane %v2893_v20, 6 }
 0x433   : > { %2683 = vmatprep.subr.bf16.mxu1 %v5710_v1 }
 0x434   : > { %v2896_v30 = vor.u32 %v2895_v26, %v2892_v24 }
 0x436   : > { %2684 = vmatpush1.bf16.msra.mxu1 %v5578_v31  ;;  %v2904_v31 = vor.u32 %v2903_v28, %v2900_v27  ;;  %v5616_v28 = vld [vmem:[%s7217_s3] sm:$0xff]  }
 0x437   : > { %2685 = vmatprep.subr.bf16.mxu1 %v5710_v1 }
 0x438   : > { %v2905_v32 = vsel %vm1520_vm2, %v2896_v30, %v2904_v31 }
 0x43a   : > { %2686 = vmatpush1.bf16.msra.mxu1 %v5579_v36  ;;  %v5607_v36 = vld [vmem:[%s7217_s3 + $0x78] sm:$0xff]  }
 0x43b   : > { %2819 = vmatprep.subr.bf16.mxu1 %v5710_v1 }
 0x43d   : > { %2696 = vmatmul.mubr.bf16.vlgmr.msra.gmra.mrb[0].mxu1 %v2569_v33  ;;  %v5065_v33 = vld [vmem:[%s7220_s6 + $0x1] ss:$0 sm:$0xff] }
 0x43e   : > { %2820 = vmatpush1.bf16.msra.mxu1 %v5580_v42  ;;  %5026 = vmatprep.mubr.msk.bf16.mxu1 %vm487_vm8, %v2742_v43 }
 0x43f   : > { %2821 = vmatprep.subr.bf16.mxu1 %v5710_v1 }
 0x442   : > { %2822 = vmatpush1.bf16.msra.mxu1 %v5581_v44 }
 0x443   : > { %2823 = vmatprep.subr.bf16.mxu1 %v5710_v1 }
 0x446   : > { %2824 = vmatpush1.bf16.msra.mxu1 %v5582_v45 }
 0x447   : > { %2825 = vmatprep.subr.bf16.mxu1 %v5710_v1 }
 0x44a   : > { %2826 = vmatpush1.bf16.msra.mxu1 %v5583_v46  ;;  %v5612_v46 = vld [vmem:[%s7217_s3 + $0xa0] sm:$0xff]  }
 0x44b   : > { %2827 = vmatprep.subr.bf16.mxu1 %v5710_v1 }
 0x44e   : > { %2828 = vmatpush1.bf16.msra.mxu1 %v5584_v47 }
 0x44f   : > { %2829 = vmatprep.subr.bf16.mxu1 %v5710_v1 }
 0x452   : > { %2830 = vmatpush1.bf16.msra.mxu1 %v5585_v48 }
 0x453   : > { %2831 = vmatprep.subr.bf16.mxu1 %v5710_v1 }
 0x456   : > { %2832 = vmatpush1.bf16.msra.mxu1 %v5586_v49 }
 0x457   : > { %2833 = vmatprep.subr.bf16.mxu1 %v5710_v1 }
 0x45a   : > { %2834 = vmatpush1.bf16.msra.mxu1 %v5587_v50  ;;  %v5613_v50 = vld [vmem:[%s7217_s3 + $0xa8] sm:$0xff]  }
 0x45b   : > { %2835 = vmatprep.subr.bf16.mxu1 %v5710_v1 }
 0x45e   : > { %2836 = vmatpush1.bf16.msra.mxu1 %v5588_v51 }
 0x45f   : > { %2837 = vmatprep.subr.bf16.mxu1 %v5710_v1 }
 0x462   : > { %2838 = vmatpush1.bf16.msra.mxu1 %v5589_v52  ;;  %v5700_v52 = vld [vmem:[%s5789_s10] sm:$0xff] }
 0x463   : > { %2839 = vmatprep.subr.bf16.mxu1 %v5710_v1 }
 0x466   : > { %2840 = vmatpush1.bf16.msra.mxu1 %v5590_v58 }
 0x467   : > { %2841 = vmatprep.subr.bf16.mxu1 %v5710_v1 }
 0x46a   : > { %2842 = vmatpush1.bf16.msra.mxu1 %v5591_v0 }
 0x46b   : > { %2999 = vmatprep.subr.bf16.mxu1 %v5710_v1 }
 0x46d   : > { %2852 = vmatmul.mubr.bf16.vlgmr.msra.gmra.mrb[0].mxu1 %v2739_v7 }
 0x46e   : > { %3000 = vmatpush1.bf16.msra.mxu1 %v5592_v6  ;;  %5063 = vmatprep.mubr.msk.bf16.mxu1 %vm487_vm8, %v2922_v8 }
 0x46f   : > { %3001 = vmatprep.subr.bf16.mxu1 %v5710_v1 }
 0x472   : > { %3002 = vmatpush1.bf16.msra.mxu1 %v5593_v9 }
 0x473   : > { %3003 = vmatprep.subr.bf16.mxu1 %v5710_v1 }
 0x476   : > { %3004 = vmatpush1.bf16.msra.mxu1 %v5594_v10 }
 0x477   : > { %3005 = vmatprep.subr.bf16.mxu1 %v5710_v1 }
 0x47a   : > { %3006 = vmatpush1.bf16.msra.mxu1 %v5595_v11 }
 0x47b   : > { %3007 = vmatprep.subr.bf16.mxu1 %v5710_v1 }
 0x47e   : > { %3008 = vmatpush1.bf16.msra.mxu1 %v5596_v12 }
 0x47f   : > { %3009 = vmatprep.subr.bf16.mxu1 %v5710_v1 }
 0x482   : > { %3010 = vmatpush1.bf16.msra.mxu1 %v5597_v13 }
 0x483   : > { %3011 = vmatprep.subr.bf16.mxu1 %v5710_v1 }
 0x486   : > { %3012 = vmatpush1.bf16.msra.mxu1 %v5598_v14 }
 0x487   : > { %3013 = vmatprep.subr.bf16.mxu1 %v5710_v1 }
 0x48a   : > { %3014 = vmatpush1.bf16.msra.mxu1 %v5599_v15 }
 0x48b   : > { %3015 = vmatprep.subr.bf16.mxu1 %v5710_v1 }
 0x48e   : > { %3016 = vmatpush1.bf16.msra.mxu1 %v5600_v16 }
 0x48f   : > { %3017 = vmatprep.subr.bf16.mxu1 %v5710_v1 }
 0x492   : > { %3018 = vmatpush1.bf16.msra.mxu1 %v5601_v18 }
 0x493   : > { %3019 = vmatprep.subr.bf16.mxu1 %v5710_v1 }
 0x496   : > { %3020 = vmatpush1.bf16.msra.mxu1 %v5602_v23 }
 0x497   : > { %3021 = vmatprep.subr.bf16.mxu1 %v5710_v1 }
 0x49a   : > { %3022 = vmatpush1.bf16.msra.mxu1 %v5603_v29 }
 0x49b   : > { %3235 = vmatprep.subr.bf16.mxu1 %v5710_v1 }
 0x49d   : > { %3032 = vmatmul.mubr.bf16.vlgmr.msra.gmra.mrb[0].mxu1 %v2905_v32  ;;  %v5617_v32 = vld [vmem:[%s7217_s3 + $0x8] sm:$0xff]  }
 0x49e   : > { %3236 = vmatpush1.bf16.msra.mxu1 %v5604_v34  ;;  %v5618_v34 = vld [vmem:[%s7217_s3 + $0x10] sm:$0xff]  }
 0x49f   : > { %3237 = vmatprep.subr.bf16.mxu1 %v5710_v1 }
 0x4a2   : > { %3238 = vmatpush1.bf16.msra.mxu1 %v5605_v25  ;;  %v5619_v25 = vld [vmem:[%s7217_s3 + $0x18] sm:$0xff]  }
 0x4a3   : > { %3239 = vmatprep.subr.bf16.mxu1 %v5710_v1 }
 0x4a6   : > { %3240 = vmatpush1.bf16.msra.mxu1 %v5606_v35  ;;  %v5620_v35 = vld [vmem:[%s7217_s3 + $0x20] sm:$0xff]  }
 0x4a7   : > { %3241 = vmatprep.subr.bf16.mxu1 %v5710_v1 }
 0x4aa   : > { %3242 = vmatpush1.bf16.msra.mxu1 %v5607_v36  ;;  %v5621_v36 = vld [vmem:[%s7217_s3 + $0x28] sm:$0xff]  }
 0x4ab   : > { %3243 = vmatprep.subr.bf16.mxu1 %v5710_v1 }
 0x4ae   : > { %3244 = vmatpush1.bf16.msra.mxu1 %v5608_v37  ;;  %v5622_v37 = vld [vmem:[%s7217_s3 + $0x30] sm:$0xff]  }
 0x4af   : > { %3245 = vmatprep.subr.bf16.mxu1 %v5710_v1 }
 0x4b2   : > { %3246 = vmatpush1.bf16.msra.mxu1 %v5609_v38  ;;  %v5623_v38 = vld [vmem:[%s7217_s3 + $0x38] sm:$0xff]  }
 0x4b3   : > { %3247 = vmatprep.subr.bf16.mxu1 %v5710_v1 }
 0x4b6   : > { %3248 = vmatpush1.bf16.msra.mxu1 %v5610_v39  ;;  %v5624_v39 = vld [vmem:[%s7217_s3 + $0x40] sm:$0xff]  }
 0x4b7   : > { %3249 = vmatprep.subr.bf16.mxu1 %v5710_v1 }
 0x4ba   : > { %3250 = vmatpush1.bf16.msra.mxu1 %v5611_v40  ;;  %v5625_v40 = vld [vmem:[%s7217_s3 + $0x48] sm:$0xff]  }
 0x4bb   : > { %3251 = vmatprep.subr.bf16.mxu1 %v5710_v1 }
 0x4be   : > { %3252 = vmatpush1.bf16.msra.mxu1 %v5612_v46 }
 0x4bf   : > { %3253 = vmatprep.subr.bf16.mxu1 %v5710_v1 }
 0x4c2   : > { %3254 = vmatpush1.bf16.msra.mxu1 %v5613_v50 }
 0x4c3   : > { %3255 = vmatprep.subr.bf16.mxu1 %v5710_v1 }
 0x4c6   : > { %3256 = vmatpush1.bf16.msra.mxu1 %v5614_v56  ;;  %v5632_v56 = vld [vmem:[%s7217_s3 + $0xe0] sm:$0xff]  }
 0x4c7   : > { %3257 = vmatprep.subr.bf16.mxu1 %v5710_v1 }
 0x4ca   : > { %3258 = vmatpush1.bf16.msra.mxu1 %v5615_v60  ;;  %v5634_v60 = vld [vmem:[%s7217_s3 + $0xf0] sm:$0xff]  }
 0x4cb   : > { %3362 = vmatprep.subr.bf16.mxu1 %v5710_v1 }
 0x570   : > { %v3033_v42 = vpop.f32.mrb[0].mxu1 }
 0x571   : > { %v3048_v43 = vmul.f32 %v5064_v41, %v3033_v42  ;;  %v3035_v44 = vpop.f32.mrb[1].mxu1 }
 0x572   : > { %v3036_v45 = vpop.f32.mrb[2].mxu1 }
 0x573   : > { %v3054_v47 = vadd.f32 %v5065_v33, %v3048_v43  ;;  %v3049_v48 = vmul.f32 %v5064_v41, %v3036_v45  ;;  %v3038_v49 = vpop.f32.mrb[3].mxu1  ;;  %v5626_v41 = vld [vmem:[%s7217_s3 + $0x50] sm:$0xff]  }
 0x575   : > { %v3055_v51 = vadd.f32 %v5065_v33, %v3049_v48  ;;  %v6761_v53 = vadd.f32 %v5700_v52, %v3054_v47  ;;  %v5627_v33 = vld [vmem:[%s7217_s3 + $0x58] sm:$0xff]   ;;  %v5628_v48 = vld [vmem:[%s7217_s3 + $0xc0] sm:$0xff]   ;;  %v5630_v52 = vld [vmem:[%s7217_s3 + $0xd0] sm:$0xff]  }
 0x577   : > { %v6765_v55 = vadd.f32 %v5701_v54, %v3055_v51  ;;  %v3058_v57 = vmax.f32 %v6761_v53, 0.0  ;;  %v5629_v51 = vld [vmem:[%s7217_s3 + $0xc8] sm:$0xff]   ;;  %v5631_v54 = vld [vmem:[%s7217_s3 + $0xd8] sm:$0xff]  }
 0x579   : > { %v3059_v58 = vmax.f32 %v6765_v55, 0.0 }
 0x57b   : > { %v3060_v59 = vpack.c.bf16 %v3059_v58, %v3058_v57 }
 0x57d   : > { %v3062_v61 = vrot.slane %v3060_v59, 4  ;;  %v5633_v59 = vld [vmem:[%s7217_s3 + $0xe8] sm:$0xff]  }
 0x57f   : > { %3063 = vrot.lane.b32.xlu1 %v3062_v61, %s5711_s15  ;;  %v5635_v61 = vld [vmem:[%s7217_s3 + $0xf8] sm:$0xff]  }
 0x5f1   : > { %v3064_v62 = vpop.permute.xlu1 %3063 }
 0x5f2   : > { %3066 = vst.msk [vmem:[#allocation4] sm:$0xf0] %vm318_vm6, %v3064_v62 }
 0x5f3   : > { %3067 = vst.msk [vmem:[#allocation4 + $0x8] sm:$0xf0] %vm286_vm0, %v3064_v62 }
 0x5f4   : > { %3068 = vst.msk [vmem:[#allocation4 + $0x10] sm:$0xf] %vm321_vm7, %v3064_v62 }
 0x5f5   : > { %3069 = vst.msk [vmem:[#allocation4 + $0x18] sm:$0xf] %vm288_vm1, %v3064_v62  ;;  %v5636_v62 = vld [vmem:[%s7217_s3 + $0x100] sm:$0xff]  }
 0x5f9   : > { %v6789_v2 = vld [vmem:[#allocation4] sm:$0xf8] }
 0x5fa   : > { %v3071_v63 = vld [vmem:[#allocation4 + $0x8] sm:$0xf8]  ;;  %v3126_v8 = vshrl.u32 %v6789_v2, 16  ;;  %v3129_v9 = vshll.u32 %v6789_v2, 16  ;;  %v3280_v44 = vrot.slane %v6789_v2, 3 }
 0x5fb   : > { %v3143_v3 = vshrl.u32 %v3071_v63, 16  ;;  %v3146_v4 = vshll.u32 %v3071_v63, 16  ;;  %v6793_v7 = vld [vmem:[#allocation4 + $0x10] sm:$0xf]  ;;  %v3283_v23 = vrot.slane %v3071_v63, 3  ;;  %v5637_v63 = vld [vmem:[%s7217_s3 + $0x108] sm:$0xff]  }
 0x5fc   : > { %v6787_v0 = vld [vmem:[#allocation4 + $0x18] sm:$0xf]  ;;  %v3134_v10 = vshrl.u32 %v6793_v7, 16  ;;  %v3137_v11 = vshll.u32 %v6793_v7, 16  ;;  %v3128_v17 = vrot.slane %v3126_v8, 3  ;;  %v3131_v18 = vrot.slane %v3129_v9, 4 }
 0x5fd   : > { %v3151_v5 = vshrl.u32 %v6787_v0, 16  ;;  %v3154_v6 = vshll.u32 %v6787_v0, 16  ;;  %v3073_v12 = vld [vmem:[#allocation4 + $0x18] sm:$0x7]  ;;  %v3145_v13 = vrot.slane %v3143_v3, 3  ;;  %v3148_v14 = vrot.slane %v3146_v4, 4 }
 0x5fe   : > { %v3136_v19 = vrot.slane %v3134_v10, 3  ;;  %v3139_v20 = vrot.slane %v3137_v11, 4  ;;  %v3284_v24 = vrot.slane %v3073_v12, 3  ;;  %v3132_v26 = vor.u32 %v3131_v18, %v3128_v17  ;;  %v3072_v42 = vld [vmem:[#allocation4 + $0x10] sm:$0x7]  ;;  %v5640_v18 = vld [vmem:[%s7217_s3 + $0x120] sm:$0xff]  }
 0x5ff   : > { %v3153_v15 = vrot.slane %v3151_v5, 3  ;;  %v3156_v16 = vrot.slane %v3154_v6, 4  ;;  %v3149_v21 = vor.u32 %v3148_v14, %v3145_v13  ;;  %v3404_v43 = vld [vmem:[#allocation4 + $0x8] sm:$0xf0]  ;;  %v3281_v45 = vrot.slane %v3072_v42, 3  ;;  %v5638_v6 = vld [vmem:[%s7217_s3 + $0x110] sm:$0xff]  }
 0x600   : > { %v3140_v27 = vor.u32 %v3139_v20, %v3136_v19  ;;  %v3285_v31 = vsel %vm691_vm11, %v3283_v23, %v3284_v24  ;;  %v3437_v46 = vrot.slane %v3404_v43, 4  ;;  %v3438_v47 = vrot.slane %v6787_v0, 4  ;;  %v6895_v0 = vld [vmem:[#allocation4 + $0x18] sm:$0x1f]  ;;  %v3403_v8 = vld [vmem:[#allocation4] sm:$0xf0] }
 0x601   : > { %v3157_v22 = vor.u32 %v3156_v16, %v3153_v15  ;;  %v3282_v49 = vsel %vm691_vm11, %v3280_v44, %v3281_v45  ;;  %v3604_v2 = vshrl.u32 %v3404_v43, 16  ;;  %v3607_v3 = vshll.u32 %v3404_v43, 16  ;;  %v5639_v13 = vld [vmem:[%s7217_s3 + $0x118] sm:$0xff]   ;;  %v5644_v23 = vld [vmem:[%s7217_s3 + $0x140] sm:$0xff]   ;;  %v5645_v24 = vld [vmem:[%s7217_s3 + $0x148] sm:$0xff]  }
 0x602   : > { %v3141_v30 = vsel %vm844_vm12, %v3132_v26, %v3140_v27  ;;  %v3439_v50 = vsel %vm1029_vm13, %v3437_v46, %v3438_v47  ;;  %v3612_v4 = vshrl.u32 %v6895_v0, 16  ;;  %v3615_v5 = vshll.u32 %v6895_v0, 16  ;;  %v5646_v26 = vld [vmem:[%s7217_s3 + $0x150] sm:$0xff]   ;;  %v5647_v27 = vld [vmem:[%s7217_s3 + $0x158] sm:$0xff]   ;;  %v5652_v45 = vld [vmem:[%s7217_s3 + $0x180] sm:$0xff]  }
 0x603   : > { %v3158_v29 = vsel %vm844_vm12, %v3149_v21, %v3157_v22  ;;  %v3606_v9 = vrot.slane %v3604_v2, 4  ;;  %v3609_v10 = vrot.slane %v3607_v3, 5  ;;  %v3434_v14 = vrot.slane %v3403_v8, 4  ;;  %v5642_v21 = vld [vmem:[%s7217_s3 + $0x130] sm:$0xff]   ;;  %v5643_v22 = vld [vmem:[%s7217_s3 + $0x138] sm:$0xff]  }
 0x604   : > { %5102 = vmatprep.mubr.msk.bf16.mxu1 %vm487_vm8, %v3158_v29  ;;  %v3614_v11 = vrot.slane %v3612_v4, 4  ;;  %v3617_v12 = vrot.slane %v3615_v5, 5  ;;  %v3435_v15 = vrot.slane %v6793_v7, 4  ;;  %v5641_v7 = vld [vmem:[%s7217_s3 + $0x128] sm:$0xff]   ;;  %v6948_v29 = vld [vmem:[#allocation4 + $0x10] sm:$0x1f] }
 0x605   : > { %3268 = vmatmul.mubr.bf16.vlgmr.msra.gmra.mrb[4].mxu1 %v3141_v30  ;;  %v3610_v16 = vor.u32 %v3609_v10, %v3606_v9  ;;  %v5649_v30 = vld [vmem:[%s7217_s3 + $0x168] sm:$0xff]   ;;  %v3774_v44 = vrot.slane %v6895_v0, 5  ;;  %v3771_v2 = vrot.slane %v6948_v29, 5  ;;  %v5664_v4 = vld [vmem:[%s7218_s4 + $0x60] sm:$0xff]  }
 0x606   : > { %3363 = vmatpush1.bf16.msra.mxu1 %v5616_v28  ;;  %5115 = vmatprep.mubr.msk.bf16.mxu1 %vm487_vm8, %v3285_v31  ;;  %v3618_v17 = vor.u32 %v3617_v12, %v3614_v11  ;;  %v3436_v19 = vsel %vm1029_vm13, %v3434_v14, %v3435_v15  ;;  %v5648_v28 = vld [vmem:[%s7217_s3 + $0x160] sm:$0xff]   ;;  %v3587_v31 = vshrl.u32 %v3403_v8, 16  ;;  %v5665_v5 = vld [vmem:[%s7218_s4 + $0x68] sm:$0xff]   ;;  %v5670_v11 = vld [vmem:[%s7218_s4 + $0x90] sm:$0xff]  }
 0x607   : > { %3364 = vmatprep.subr.bf16.mxu1 %v5710_v1  ;;  %4063 = vmatpush1.bf16.msra.mxu0 %v5664_v4  ;;  %v5668_v9 = vld [vmem:[%s7218_s4 + $0x80] sm:$0xff]   ;;  %v5669_v10 = vld [vmem:[%s7218_s4 + $0x88] sm:$0xff]   ;;  %v5671_v12 = vld [vmem:[%s7218_s4 + $0x98] sm:$0xff]  }
 0x608   : > { %v3619_v20 = vsel %vm1182_vm14, %v3610_v16, %v3618_v17  ;;  %4064 = vmatprep.subr.bf16.mxu0 %v5710_v1  ;;  %v5227_v14 = vld [vmem:[%s7219_s5 + $0x2] ss:$0 sm:$0xff]  ;;  %v5673_v17 = vld [vmem:[%s7218_s4 + $0xa8] sm:$0xff]  }
 0x609   : > { %v5228_v16 = vld [vmem:[%s7220_s6 + $0x2] ss:$0 sm:$0xff]  ;;  %v5685_v4 = vld [vmem:[%s7218_s4 + $0x48] sm:$0xff]  }
 0x60a   : > { %3365 = vmatpush1.bf16.msra.mxu1 %v5617_v32  ;;  %v3590_v32 = vshll.u32 %v3403_v8, 16  ;;  %v5667_v8 = vld [vmem:[%s7218_s4 + $0x78] sm:$0xff]  }
 0x60b   : > { %3366 = vmatprep.subr.bf16.mxu1 %v5710_v1  ;;  %4065 = vmatpush1.bf16.msra.mxu0 %v5665_v5 }
 0x60c   : > { %4066 = vmatprep.subr.bf16.mxu0 %v5710_v1 }
 0x60e   : > { %3367 = vmatpush1.bf16.msra.mxu1 %v5618_v34  ;;  %v3595_v34 = vshrl.u32 %v6948_v29, 16 }
 0x60f   : > { %3368 = vmatprep.subr.bf16.mxu1 %v5710_v1 }
 0x612   : > { %3369 = vmatpush1.bf16.msra.mxu1 %v5619_v25  ;;  %v3598_v25 = vshll.u32 %v6948_v29, 16 }
 0x613   : > { %3370 = vmatprep.subr.bf16.mxu1 %v5710_v1 }
 0x616   : > { %3371 = vmatpush1.bf16.msra.mxu1 %v5620_v35  ;;  %v5650_v35 = vld [vmem:[%s7217_s3 + $0x170] sm:$0xff]  }
 0x617   : > { %3372 = vmatprep.subr.bf16.mxu1 %v5710_v1 }
 0x61a   : > { %3373 = vmatpush1.bf16.msra.mxu1 %v5621_v36  ;;  %v3589_v36 = vrot.slane %v3587_v31, 4 }
 0x61b   : > { %3374 = vmatprep.subr.bf16.mxu1 %v5710_v1 }
 0x61e   : > { %3375 = vmatpush1.bf16.msra.mxu1 %v5622_v37  ;;  %v3592_v37 = vrot.slane %v3590_v32, 5 }
 0x61f   : > { %3376 = vmatprep.subr.bf16.mxu1 %v5710_v1 }
 0x620   : > { %v3593_v42 = vor.u32 %v3592_v37, %v3589_v36 }
 0x622   : > { %3377 = vmatpush1.bf16.msra.mxu1 %v5623_v38  ;;  %v3597_v38 = vrot.slane %v3595_v34, 4 }
 0x623   : > { %3378 = vmatprep.subr.bf16.mxu1 %v5710_v1 }
 0x626   : > { %3379 = vmatpush1.bf16.msra.mxu1 %v5624_v39  ;;  %v3600_v39 = vrot.slane %v3598_v25, 5 }
 0x627   : > { %3380 = vmatprep.subr.bf16.mxu1 %v5710_v1 }
 0x62a   : > { %3381 = vmatpush1.bf16.msra.mxu1 %v5625_v40  ;;  %v5651_v40 = vld [vmem:[%s7217_s3 + $0x178] sm:$0xff]  }
 0x62b   : > { %3382 = vmatprep.subr.bf16.mxu1 %v5710_v1 }
 0x62e   : > { %3383 = vmatpush1.bf16.msra.mxu1 %v5626_v41  ;;  %v3740_v41 = vld [vmem:[#allocation4 + $0x8] sm:$0xe0] }
 0x62f   : > { %3384 = vmatprep.subr.bf16.mxu1 %v5710_v1  ;;  %v3773_v43 = vrot.slane %v3740_v41, 5  ;;  %v5676_v41 = vld [vmem:[%s7218_s4] sm:$0xff]  }
 0x631   : > { %v3775_v47 = vsel %vm1367_vm15, %v3773_v43, %v3774_v44 }
 0x632   : > { %3385 = vmatpush1.bf16.msra.mxu1 %v5627_v33  ;;  %v3601_v33 = vor.u32 %v3600_v39, %v3597_v38 }
 0x633   : > { %3516 = vmatprep.subr.bf16.mxu1 %v5710_v1 }
 0x634   : > { %v3602_v46 = vsel %vm1182_vm14, %v3593_v42, %v3601_v33 }
 0x635   : > { %3395 = vmatmul.mubr.bf16.vlgmr.msra.gmra.mrb[4].mxu1 %v3282_v49  ;;  %v5654_v49 = vld [vmem:[%s7217_s3 + $0x190] sm:$0xff]  }
 0x636   : > { %3517 = vmatpush1.bf16.msra.mxu1 %v5628_v48  ;;  %5152 = vmatprep.mubr.msk.bf16.mxu1 %vm487_vm8, %v3439_v50  ;;  %v5653_v48 = vld [vmem:[%s7217_s3 + $0x188] sm:$0xff]   ;;  %v5655_v50 = vld [vmem:[%s7217_s3 + $0x198] sm:$0xff]  }
 0x637   : > { %3518 = vmatprep.subr.bf16.mxu1 %v5710_v1 }
 0x63a   : > { %3519 = vmatpush1.bf16.msra.mxu1 %v5629_v51  ;;  %v5656_v51 = vld [vmem:[%s7217_s3 + $0x1a0] sm:$0xff]  }
 0x63b   : > { %3520 = vmatprep.subr.bf16.mxu1 %v5710_v1 }
 0x63e   : > { %3521 = vmatpush1.bf16.msra.mxu1 %v5630_v52  ;;  %v5657_v52 = vld [vmem:[%s7217_s3 + $0x1a8] sm:$0xff]  }
 0x63f   : > { %3522 = vmatprep.subr.bf16.mxu1 %v5710_v1 }
 0x642   : > { %3523 = vmatpush1.bf16.msra.mxu1 %v5631_v54  ;;  %v5658_v54 = vld [vmem:[%s7217_s3 + $0x1b0] sm:$0xff]  }
 0x643   : > { %3524 = vmatprep.subr.bf16.mxu1 %v5710_v1 }
 0x646   : > { %3525 = vmatpush1.bf16.msra.mxu1 %v5632_v56  ;;  %v5659_v56 = vld [vmem:[%s7217_s3 + $0x1b8] sm:$0xff]  }
 0x647   : > { %3526 = vmatprep.subr.bf16.mxu1 %v5710_v1 }
 0x64a   : > { %3527 = vmatpush1.bf16.msra.mxu1 %v5633_v59  ;;  %v5660_v59 = vld [vmem:[%s7217_s3 + $0x1c0] sm:$0xff]  }
 0x64b   : > { %3528 = vmatprep.subr.bf16.mxu1 %v5710_v1 }
 0x64e   : > { %3529 = vmatpush1.bf16.msra.mxu1 %v5634_v60  ;;  %v5661_v60 = vld [vmem:[%s7217_s3 + $0x1c8] sm:$0xff]  }
 0x64f   : > { %3530 = vmatprep.subr.bf16.mxu1 %v5710_v1 }
 0x652   : > { %3531 = vmatpush1.bf16.msra.mxu1 %v5635_v61  ;;  %v5662_v61 = vld [vmem:[%s7217_s3 + $0x1d0] sm:$0xff]  }
 0x653   : > { %3532 = vmatprep.subr.bf16.mxu1 %v5710_v1 }
 0x656   : > { %3533 = vmatpush1.bf16.msra.mxu1 %v5636_v62  ;;  %v3739_v62 = vld [vmem:[#allocation4] sm:$0xe0] }
 0x657   : > { %3534 = vmatprep.subr.bf16.mxu1 %v5710_v1  ;;  %v3770_v0 = vrot.slane %v3739_v62, 5  ;;  %v5681_v62 = vld [vmem:[%s7218_s4 + $0x28] sm:$0xff]  }
 0x659   : > { %v3772_v3 = vsel %vm1367_vm15, %v3770_v0, %v3771_v2  ;;  %v5683_v0 = vld [vmem:[%s7218_s4 + $0x38] sm:$0xff]   ;;  %v5684_v2 = vld [vmem:[%s7218_s4 + $0x40] sm:$0xff]  }
 0x65a   : > { %3535 = vmatpush1.bf16.msra.mxu1 %v5637_v63  ;;  %v5663_v63 = vld [vmem:[%s7217_s3 + $0x1d8] sm:$0xff]  }
 0x65b   : > { %3536 = vmatprep.subr.bf16.mxu1 %v5710_v1 }
 0x65e   : > { %3537 = vmatpush1.bf16.msra.mxu1 %v5638_v6  ;;  %v5666_v6 = vld [vmem:[%s7218_s4 + $0x70] sm:$0xff]  }
 0x65f   : > { %3538 = vmatprep.subr.bf16.mxu1 %v5710_v1  ;;  %4067 = vmatpush1.bf16.msra.mxu0 %v5666_v6 }
 0x660   : > { %4068 = vmatprep.subr.bf16.mxu0 %v5710_v1 }
 0x662   : > { %3539 = vmatpush1.bf16.msra.mxu1 %v5639_v13  ;;  %v5672_v13 = vld [vmem:[%s7218_s4 + $0xa0] sm:$0xff]  }
 0x663   : > { %3696 = vmatprep.subr.bf16.mxu1 %v5710_v1  ;;  %4069 = vmatpush1.bf16.msra.mxu0 %v5667_v8 }
 0x664   : > { %4070 = vmatprep.subr.bf16.mxu0 %v5710_v1 }
 0x665   : > { %3549 = vmatmul.mubr.bf16.vlgmr.msra.gmra.mrb[4].mxu1 %v3436_v19 }
 0x666   : > { %3697 = vmatpush1.bf16.msra.mxu1 %v5640_v18  ;;  %5189 = vmatprep.mubr.msk.bf16.mxu1 %vm487_vm8, %v3619_v20 }
 0x667   : > { %3698 = vmatprep.subr.bf16.mxu1 %v5710_v1  ;;  %4071 = vmatpush1.bf16.msra.mxu0 %v5668_v9 }
 0x668   : > { %4072 = vmatprep.subr.bf16.mxu0 %v5710_v1 }
 0x66a   : > { %3699 = vmatpush1.bf16.msra.mxu1 %v5641_v7  ;;  %v5674_v7 = vld [vmem:[%s7218_s4 + $0xb0] sm:$0xff]  }
 0x66b   : > { %3700 = vmatprep.subr.bf16.mxu1 %v5710_v1  ;;  %4073 = vmatpush1.bf16.msra.mxu0 %v5669_v10 }
 0x66c   : > { %4074 = vmatprep.subr.bf16.mxu0 %v5710_v1 }
 0x66e   : > { %3701 = vmatpush1.bf16.msra.mxu1 %v5642_v21 }
 0x66f   : > { %3702 = vmatprep.subr.bf16.mxu1 %v5710_v1  ;;  %4075 = vmatpush1.bf16.msra.mxu0 %v5670_v11 }
 0x670   : > { %4076 = vmatprep.subr.bf16.mxu0 %v5710_v1 }
 0x672   : > { %3703 = vmatpush1.bf16.msra.mxu1 %v5643_v22 }
 0x673   : > { %3704 = vmatprep.subr.bf16.mxu1 %v5710_v1  ;;  %4077 = vmatpush1.bf16.msra.mxu0 %v5671_v12 }
 0x674   : > { %4078 = vmatprep.subr.bf16.mxu0 %v5710_v1 }
 0x676   : > { %3705 = vmatpush1.bf16.msra.mxu1 %v5644_v23 }
 0x677   : > { %3706 = vmatprep.subr.bf16.mxu1 %v5710_v1  ;;  %4079 = vmatpush1.bf16.msra.mxu0 %v5672_v13 }
 0x678   : > { %4080 = vmatprep.subr.bf16.mxu0 %v5710_v1 }
 0x67a   : > { %3707 = vmatpush1.bf16.msra.mxu1 %v5645_v24 }
 0x67b   : > { %3708 = vmatprep.subr.bf16.mxu1 %v5710_v1  ;;  %4081 = vmatpush1.bf16.msra.mxu0 %v5673_v17 }
 0x67c   : > { %4082 = vmatprep.subr.bf16.mxu0 %v5710_v1 }
 0x67e   : > { %3709 = vmatpush1.bf16.msra.mxu1 %v5646_v26  ;;  %v5675_v26 = vld [vmem:[%s7218_s4 + $0xb8] sm:$0xff]  }
 0x67f   : > { %3710 = vmatprep.subr.bf16.mxu1 %v5710_v1  ;;  %4083 = vmatpush1.bf16.msra.mxu0 %v5674_v7 }
 0x680   : > { %4084 = vmatprep.subr.bf16.mxu0 %v5710_v1 }
 0x682   : > { %3711 = vmatpush1.bf16.msra.mxu1 %v5647_v27 }
 0x683   : > { %3712 = vmatprep.subr.bf16.mxu1 %v5710_v1  ;;  %4085 = vmatpush1.bf16.msra.mxu0 %v5675_v26 }
 0x684   : > { %4213 = vmatprep.subr.bf16.mxu0 %v5710_v1 }
 0x686   : > { %3713 = vmatpush1.bf16.msra.mxu1 %v5648_v28 }
 0x687   : > { %3714 = vmatprep.subr.bf16.mxu1 %v5710_v1 }
 0x68a   : > { %3715 = vmatpush1.bf16.msra.mxu1 %v5649_v30 }
 0x68b   : > { %3716 = vmatprep.subr.bf16.mxu1 %v5710_v1 }
 0x68e   : > { %3717 = vmatpush1.bf16.msra.mxu1 %v5650_v35 }
 0x68f   : > { %3718 = vmatprep.subr.bf16.mxu1 %v5710_v1 }
 0x692   : > { %3719 = vmatpush1.bf16.msra.mxu1 %v5651_v40 }
 0x693   : > { %3852 = vmatprep.subr.bf16.mxu1 %v5710_v1 }
 0x695   : > { %3729 = vmatmul.mubr.bf16.vlgmr.msra.gmra.mrb[4].mxu1 %v3602_v46 }
 0x696   : > { %3853 = vmatpush1.bf16.msra.mxu1 %v5652_v45  ;;  %5226 = vmatprep.mubr.msk.bf16.mxu1 %vm487_vm8, %v3775_v47 }
 0x697   : > { %3854 = vmatprep.subr.bf16.mxu1 %v5710_v1 }
 0x69a   : > { %3855 = vmatpush1.bf16.msra.mxu1 %v5653_v48 }
 0x69b   : > { %3856 = vmatprep.subr.bf16.mxu1 %v5710_v1 }
 0x69e   : > { %3857 = vmatpush1.bf16.msra.mxu1 %v5654_v49 }
 0x69f   : > { %3858 = vmatprep.subr.bf16.mxu1 %v5710_v1 }
 0x6a2   : > { %3859 = vmatpush1.bf16.msra.mxu1 %v5655_v50 }
 0x6a3   : > { %3860 = vmatprep.subr.bf16.mxu1 %v5710_v1 }
 0x6a6   : > { %3861 = vmatpush1.bf16.msra.mxu1 %v5656_v51 }
 0x6a7   : > { %3862 = vmatprep.subr.bf16.mxu1 %v5710_v1 }
 0x6aa   : > { %3863 = vmatpush1.bf16.msra.mxu1 %v5657_v52  ;;  %v5677_v52 = vld [vmem:[%s7218_s4 + $0x8] sm:$0xff]  }
 0x6ab   : > { %3864 = vmatprep.subr.bf16.mxu1 %v5710_v1 }
 0x6ae   : > { %3865 = vmatpush1.bf16.msra.mxu1 %v5658_v54 }
 0x6af   : > { %3866 = vmatprep.subr.bf16.mxu1 %v5710_v1 }
 0x6b2   : > { %3867 = vmatpush1.bf16.msra.mxu1 %v5659_v56 }
 0x6b3   : > { %3868 = vmatprep.subr.bf16.mxu1 %v5710_v1 }
 0x6b6   : > { %3869 = vmatpush1.bf16.msra.mxu1 %v5660_v59  ;;  %v5678_v59 = vld [vmem:[%s7218_s4 + $0x10] sm:$0xff]  }
 0x6b7   : > { %3870 = vmatprep.subr.bf16.mxu1 %v5710_v1 }
 0x6ba   : > { %3871 = vmatpush1.bf16.msra.mxu1 %v5661_v60  ;;  %v5679_v60 = vld [vmem:[%s7218_s4 + $0x18] sm:$0xff]  }
 0x6bb   : > { %3872 = vmatprep.subr.bf16.mxu1 %v5710_v1 }
 0x6be   : > { %3873 = vmatpush1.bf16.msra.mxu1 %v5662_v61  ;;  %v5680_v61 = vld [vmem:[%s7218_s4 + $0x20] sm:$0xff]  }
 0x6bf   : > { %3874 = vmatprep.subr.bf16.mxu1 %v5710_v1 }
 0x6c2   : > { %3875 = vmatpush1.bf16.msra.mxu1 %v5663_v63  ;;  %v5682_v63 = vld [vmem:[%s7218_s4 + $0x30] sm:$0xff]  }
 0x6c5   : > { %3885 = vmatmul.mubr.bf16.vlgmr.msra.gmra.mrb[4].mxu1 %v3772_v3 }
 0x798   : > { %v3886_v15 = vpop.f32.mrb[4].mxu1 }
 0x799   : > { %v3901_v18 = vmul.f32 %v5227_v14, %v3886_v15  ;;  %v3888_v19 = vpop.f32.mrb[5].mxu1  ;;  %v5686_v15 = vld [vmem:[%s7218_s4 + $0x50] sm:$0xff]  }
 0x79a   : > { %v3889_v20 = vpop.f32.mrb[6].mxu1 }
 0x79b   : > { %v3907_v21 = vadd.f32 %v5228_v16, %v3901_v18  ;;  %v3902_v22 = vmul.f32 %v5227_v14, %v3889_v20  ;;  %v3891_v23 = vpop.f32.mrb[7].mxu1 }
 0x79c   : > { %v5687_v23 = vld [vmem:[%s7218_s4 + $0x58] sm:$0xff]  }
 0x79d   : > { %v3908_v24 = vadd.f32 %v5228_v16, %v3902_v22  ;;  %v3909_v27 = vmax.f32 %v3907_v21, 0.0 }
 0x79f   : > { %v3910_v28 = vmax.f32 %v3908_v24, 0.0 }
 0x7a1   : > { %v3911_v29 = vpack.c.bf16 %v3910_v28, %v3909_v27 }
 0x7a3   : > { %v3913_v30 = vrot.slane %v3911_v29, 4  ;;  %v5688_v29 = vld [vmem:[%s7218_s4 + $0xc0] sm:$0xff]  }
 0x7a5   : > { %3914 = vrot.lane.b32.xlu1 %v3913_v30, %s5711_s15 }
 0x817   : > { %v3915_v31 = vpop.permute.xlu1 %3914 }
 0x818   : > { %3917 = vst.msk [vmem:[#allocation3] sm:$0xf0] %vm318_vm6, %v3915_v31 }
 0x819   : > { %3918 = vst.msk [vmem:[#allocation3 + $0x8] sm:$0xf0] %vm286_vm0, %v3915_v31 }
 0x81a   : > { %3919 = vst.msk [vmem:[#allocation3 + $0x10] sm:$0xf] %vm321_vm7, %v3915_v31 }
 0x81b   : > { %3920 = vst.msk [vmem:[#allocation3 + $0x18] sm:$0xf] %vm288_vm1, %v3915_v31 }
 0x81f   : > { %v7082_v37 = vld [vmem:[#allocation3] sm:$0xf0] }
 0x820   : > { %v7077_v34 = vld [vmem:[#allocation3 + $0x8] sm:$0xf0]  ;;  %v3980_v40 = vrot.slane %v7082_v37, 4  ;;  %v3921_v3 = vld [vmem:[#allocation3] sm:$0xf8] }
 0x821   : > { %v7079_v25 = vld [vmem:[#allocation3 + $0x10] sm:$0xf]  ;;  %v3983_v35 = vrot.slane %v7077_v34, 4  ;;  %v3922_v42 = vld [vmem:[#allocation3 + $0x8] sm:$0xf8]  ;;  %v4104_v6 = vshrl.u32 %v3921_v3, 16 }
 0x822   : > { %v3924_v32 = vld [vmem:[#allocation3 + $0x18] sm:$0xf]  ;;  %v3981_v38 = vrot.slane %v7079_v25, 4  ;;  %v4121_v44 = vshrl.u32 %v3922_v42, 16  ;;  %v4124_v45 = vshll.u32 %v3922_v42, 16  ;;  %v4107_v8 = vshll.u32 %v3921_v3, 16 }
 0x823   : > { %v3984_v36 = vrot.slane %v3924_v32, 4  ;;  %v4129_v39 = vshrl.u32 %v3924_v32, 16  ;;  %v4132_v33 = vshll.u32 %v3924_v32, 16  ;;  %v4255_v5 = vld [vmem:[#allocation3 + $0x18] sm:$0x1f]  ;;  %v4112_v9 = vshrl.u32 %v7079_v25, 16 }
 0x824   : > { %v3982_v47 = vsel %vm1029_vm13, %v3980_v40, %v3981_v38  ;;  %v4123_v49 = vrot.slane %v4121_v44, 3  ;;  %v4126_v50 = vrot.slane %v4124_v45, 4  ;;  %v4115_v10 = vshll.u32 %v7079_v25, 16  ;;  %v5689_v32 = vld [vmem:[%s7218_s4 + $0xc8] sm:$0xff]   ;;  %v5691_v25 = vld [vmem:[%s7218_s4 + $0xd8] sm:$0xff]   ;;  %v5694_v38 = vld [vmem:[%s7218_s4 + $0xf0] sm:$0xff]  }
 0x825   : > { %v3985_v43 = vsel %vm1029_vm13, %v3983_v35, %v3984_v36  ;;  %v4131_v46 = vrot.slane %v4129_v39, 3  ;;  %v4134_v48 = vrot.slane %v4132_v33, 4  ;;  %v4299_v11 = vshrl.u32 %v7077_v34, 16  ;;  %v5692_v35 = vld [vmem:[%s7218_s4 + $0xe0] sm:$0xff]   ;;  %v5693_v36 = vld [vmem:[%s7218_s4 + $0xe8] sm:$0xff]   ;;  %v5695_v39 = vld [vmem:[%s7218_s4 + $0xf8] sm:$0xff]  }
 0x826   : > { %5265 = vmatprep.mubr.msk.bf16.mxu0 %vm487_vm8, %v3985_v43  ;;  %v4127_v54 = vor.u32 %v4126_v50, %v4123_v49  ;;  %v4302_v12 = vshll.u32 %v7077_v34, 16  ;;  %v4307_v13 = vshrl.u32 %v4255_v5, 16  ;;  %v4310_v14 = vshll.u32 %v4255_v5, 16  ;;  %v5690_v34 = vld [vmem:[%s7218_s4 + $0xd0] sm:$0xff]   ;;  %v5696_v40 = vld [vmem:[%s7218_s4 + $0x100] sm:$0xff]   ;;  %v5697_v42 = vld [vmem:[%s7218_s4 + $0x108] sm:$0xff]  }
 0x827   : > { %4095 = vmatmul.mubr.bf16.vlgmr.msra.gmra.mrb[4].mxu0 %v3982_v47  ;;  %v4135_v51 = vor.u32 %v4134_v48, %v4131_v46  ;;  %v4106_v16 = vrot.slane %v4104_v6, 3  ;;  %v4109_v17 = vrot.slane %v4107_v8, 4  ;;  %v4114_v18 = vrot.slane %v4112_v9, 3  ;;  %v5698_v46 = vld [vmem:[%s7218_s4 + $0x110] sm:$0xff]  }
 0x828   : > { %4214 = vmatpush1.bf16.msra.mxu0 %v5676_v41  ;;  %v4117_v19 = vrot.slane %v4115_v10, 4  ;;  %v4301_v20 = vrot.slane %v4299_v11, 4  ;;  %v4304_v7 = vrot.slane %v4302_v12, 5  ;;  %v4309_v21 = vrot.slane %v4307_v13, 4  ;;  %v4254_v41 = vld [vmem:[#allocation3 + $0x10] sm:$0x1f] }
 0x829   : > { %4215 = vmatprep.subr.bf16.mxu0 %v5710_v1  ;;  %v4136_v56 = vsel %vm844_vm12, %v4127_v54, %v4135_v51  ;;  %v4312_v22 = vrot.slane %v4310_v14, 5  ;;  %v4110_v24 = vor.u32 %v4109_v17, %v4106_v16  ;;  %v4282_v33 = vshrl.u32 %v7082_v37, 16  ;;  %v5699_v51 = vld [vmem:[%s7218_s4 + $0x118] sm:$0xff]  }
 0x82a   : > { %5278 = vmatprep.mubr.msk.bf16.mxu0 %vm487_vm8, %v4136_v56  ;;  %v4118_v26 = vor.u32 %v4117_v19, %v4114_v18  ;;  %v4305_v27 = vor.u32 %v4304_v7, %v4301_v20  ;;  %v4285_v43 = vshll.u32 %v7082_v37, 16  ;;  %v4290_v44 = vshrl.u32 %v4254_v41, 16  ;;  %v5316_v56 = vld [vmem:[%s7219_s5 + $0x3] ss:$0 sm:$0xff] }
 0x82b   : > { %v4313_v28 = vor.u32 %v4312_v22, %v4309_v21  ;;  %v4293_v45 = vshll.u32 %v4254_v41, 16  ;;  %v4284_v47 = vrot.slane %v4282_v33, 4 }
 0x82c   : > { %4216 = vmatpush1.bf16.msra.mxu0 %v5677_v52  ;;  %v4119_v30 = vsel %vm844_vm12, %v4110_v24, %v4118_v26  ;;  %v4287_v48 = vrot.slane %v4285_v43, 5  ;;  %v4292_v49 = vrot.slane %v4290_v44, 4 }
 0x82d   : > { %4217 = vmatprep.subr.bf16.mxu0 %v5710_v1  ;;  %v4314_v31 = vsel %vm1182_vm14, %v4305_v27, %v4313_v28  ;;  %v4295_v50 = vrot.slane %v4293_v45, 5 }
 0x82e   : > { %v4288_v37 = vor.u32 %v4287_v48, %v4284_v47 }
 0x82f   : > { %v4296_v52 = vor.u32 %v4295_v50, %v4292_v49 }
 0x830   : > { %4218 = vmatpush1.bf16.msra.mxu0 %v5678_v59 }
 0x831   : > { %4219 = vmatprep.subr.bf16.mxu0 %v5710_v1  ;;  %v4297_v54 = vsel %vm1182_vm14, %v4288_v37, %v4296_v52 }
 0x834   : > { %4220 = vmatpush1.bf16.msra.mxu0 %v5679_v60  ;;  %v5317_v60 = vld [vmem:[%s7220_s6 + $0x3] ss:$0 sm:$0xff] }
 0x835   : > { %4221 = vmatprep.subr.bf16.mxu0 %v5710_v1 }
 0x838   : > { %4222 = vmatpush1.bf16.msra.mxu0 %v5680_v61 }
 0x839   : > { %4223 = vmatprep.subr.bf16.mxu0 %v5710_v1 }
 0x83c   : > { %4224 = vmatpush1.bf16.msra.mxu0 %v5681_v62 }
 0x83d   : > { %4225 = vmatprep.subr.bf16.mxu0 %v5710_v1 }
 0x840   : > { %4226 = vmatpush1.bf16.msra.mxu0 %v5682_v63 }
 0x841   : > { %4227 = vmatprep.subr.bf16.mxu0 %v5710_v1 }
 0x844   : > { %4228 = vmatpush1.bf16.msra.mxu0 %v5683_v0 }
 0x845   : > { %4229 = vmatprep.subr.bf16.mxu0 %v5710_v1 }
 0x848   : > { %4230 = vmatpush1.bf16.msra.mxu0 %v5684_v2 }
 0x849   : > { %4231 = vmatprep.subr.bf16.mxu0 %v5710_v1 }
 0x84c   : > { %4232 = vmatpush1.bf16.msra.mxu0 %v5685_v4 }
 0x84d   : > { %4233 = vmatprep.subr.bf16.mxu0 %v5710_v1 }
 0x850   : > { %4234 = vmatpush1.bf16.msra.mxu0 %v5686_v15 }
 0x851   : > { %4235 = vmatprep.subr.bf16.mxu0 %v5710_v1 }
 0x854   : > { %4236 = vmatpush1.bf16.msra.mxu0 %v5687_v23 }
 0x855   : > { %4391 = vmatprep.subr.bf16.mxu0 %v5710_v1 }
 0x857   : > { %4246 = vmatmul.mubr.bf16.vlgmr.msra.gmra.mrb[4].mxu0 %v4119_v30 }
 0x858   : > { %4392 = vmatpush1.bf16.msra.mxu0 %v5688_v29  ;;  %5315 = vmatprep.mubr.msk.bf16.mxu0 %vm487_vm8, %v4314_v31 }
 0x859   : > { %4393 = vmatprep.subr.bf16.mxu0 %v5710_v1 }
 0x85c   : > { %4394 = vmatpush1.bf16.msra.mxu0 %v5689_v32 }
 0x85d   : > { %4395 = vmatprep.subr.bf16.mxu0 %v5710_v1 }
 0x860   : > { %4396 = vmatpush1.bf16.msra.mxu0 %v5690_v34 }
 0x861   : > { %4397 = vmatprep.subr.bf16.mxu0 %v5710_v1 }
 0x864   : > { %4398 = vmatpush1.bf16.msra.mxu0 %v5691_v25 }
 0x865   : > { %4399 = vmatprep.subr.bf16.mxu0 %v5710_v1 }
 0x868   : > { %4400 = vmatpush1.bf16.msra.mxu0 %v5692_v35 }
 0x869   : > { %4401 = vmatprep.subr.bf16.mxu0 %v5710_v1 }
 0x86c   : > { %4402 = vmatpush1.bf16.msra.mxu0 %v5693_v36 }
 0x86d   : > { %4403 = vmatprep.subr.bf16.mxu0 %v5710_v1 }
 0x870   : > { %4404 = vmatpush1.bf16.msra.mxu0 %v5694_v38 }
 0x871   : > { %4405 = vmatprep.subr.bf16.mxu0 %v5710_v1 }
 0x874   : > { %4406 = vmatpush1.bf16.msra.mxu0 %v5695_v39 }
 0x875   : > { %4407 = vmatprep.subr.bf16.mxu0 %v5710_v1 }
 0x878   : > { %4408 = vmatpush1.bf16.msra.mxu0 %v5696_v40 }
 0x879   : > { %4409 = vmatprep.subr.bf16.mxu0 %v5710_v1 }
 0x87c   : > { %4410 = vmatpush1.bf16.msra.mxu0 %v5697_v42 }
 0x87d   : > { %4411 = vmatprep.subr.bf16.mxu0 %v5710_v1 }
 0x880   : > { %4412 = vmatpush1.bf16.msra.mxu0 %v5698_v46 }
 0x881   : > { %4413 = vmatprep.subr.bf16.mxu0 %v5710_v1 }
 0x884   : > { %4414 = vmatpush1.bf16.msra.mxu0 %v5699_v51 }
 0x887   : > { %4424 = vmatmul.mubr.bf16.vlgmr.msra.gmra.mrb[4].mxu0 %v4297_v54 }
 0x95a   : > { %v4425_v59 = vpop.f32.mrb[4].mxu0 }
 0x95b   : > { %v4440_v61 = vmul.f32 %v5316_v56, %v4425_v59  ;;  %v4427_v62 = vpop.f32.mrb[5].mxu0 }
 0x95c   : > { %v4428_v63 = vpop.f32.mrb[6].mxu0 }
 0x95d   : > { %v4446_v1 = vadd.f32 %v5317_v60, %v4440_v61  ;;  %v4441_v0 = vmul.f32 %v5316_v56, %v4428_v63  ;;  %v4430_v2 = vpop.f32.mrb[7].mxu0 }
 0x95f   : > { %v4448_v3 = vadd.f32 %v4446_v1, %v3058_v57  ;;  %v4447_v4 = vadd.f32 %v5317_v60, %v4441_v0 }
 0x961   : > { %v4450_v5 = vmax.f32 %v4448_v3, 0.0  ;;  %v4449_v6 = vadd.f32 %v4447_v4, %v3059_v58 }
 0x963   : > { %4452 = vst [vmem:[%s278_s12] sm:$0xff] %v4450_v5  ;;  %v4451_v8 = vmax.f32 %v4449_v6, 0.0 }
 0x965   : > { %4453 = vst [vmem:[%s278_s12 + $0x8] sm:$0xff] %v4451_v8 }
 0x966 PF: > { %s17_s24 = sadd.s32 1, %s5708_s24  }
 0x967   : > { %p14_p4 = scmp.ge.s32.totalorder %s17_s24, 4  }
 0x969   :  { %16 = sbr.rel (!%p14_p4) target bundleno = 1 (0x1), region = 98 }

</bundles_post_ra>
